<compile_context>
chip_gen: v7x
topology: tpu7x:2x2x1
jax: 0.10.0
libtpu: 0.0.40
codegen_flags: <defaults>
</compile_context>

<pallas_src>
import numpy as np
import jax
import jax.numpy as jnp
from jax import lax
from jax.experimental import pallas as pl
from jax.experimental.pallas import tpu as pltpu

# ----------------------------- configuration -----------------------------
IN_CHANS = 3
NUM_CLASSES = 10
CLS_PAD = 128                     # classifier padded to a full 128-lane store
DIMS = [8, 16, 32, 32, 64]        # dims[i] -> dims[i+1] per stage
STRIDES = [2, 2, 2, 1]
ACT_NUM = 3
KSIZE = 2 * ACT_NUM + 1           # 7x7 depthwise conv inside activation_poly
POLY_WEIGHT_INITS = [0.1, 0.5, 0.05]
POLY_WEIGHT_FACTORS = [0.25, 1.0, 1.0]

IMG = 64                          # demo input spatial size (NCHW, like PyTorch)
S0 = IMG // 4                     # spatial size after the 4x4 / stride-4 stem

# (spatial, channels) at each activation_poly: stem + 4 stages
ACT_SIZES = []
_s = S0
ACT_SIZES.append((_s, DIMS[0]))
for _i, _st in enumerate(STRIDES):
    _s = _s // _st
    ACT_SIZES.append((_s, DIMS[_i + 1]))
# -> [(16,8),(8,16),(4,32),(2,32),(2,64)]  => lane widths 128,128,128,64,128

N_STEM_W = 5                      # wstem, bstem, poly, dwm, dwb
N_STAGE_W = 6                     # ph, wfused, bfused, poly, dwm, dwb
N_WEIGHTS = N_STEM_W + N_STAGE_W * len(STRIDES) + 3   # + ps, cls_w, cls_b


# ----------------------------- fused Pallas kernel -----------------------------
def _act_poly(x, m, poly_ref, dwm_ref, dwb_ref, xp_ref, H):
    """general_relu_poly (scalar mask) + 7x7 depthwise conv on a stacked
    (B*H, W*C) slab.  H = per-sample rows (static)."""
    BH, _ = x.shape
    p = poly_ref[...]                                   # (3, W*C) = coef * factor
    poly = (p[0:1, :] * x + p[1:2, :]) * x + p[2:3, :]
    r = m * jnp.maximum(x, 0.0) + (1.0 - m) * poly      # f32 elementwise (v5e-safe)

    # Store the interior rows once; halo rows may hold garbage -- every shifted
    # band is row-masked after the matmul, so they never reach the output.
    xp_ref[ACT_NUM:ACT_NUM + BH, :] = r
    r16 = r.astype(jnp.bfloat16)

    # central kernel row (no shift, no mask)
    acc = jnp.dot(r16, dwm_ref[ACT_NUM], preferred_element_type=jnp.float32)

    # per-row index within its sample, for boundary masking
    hrow = lax.broadcasted_iota(jnp.int32, (BH, 1), 0) % H
    for kh in range(KSIZE):
        d = kh - ACT_NUM
        if d == 0 or abs(d) >= H:                       # no valid rows -> skip
            continue
        band = xp_ref[kh:kh + BH, :].astype(jnp.bfloat16)
        contrib = jnp.dot(band, dwm_ref[kh], preferred_element_type=jnp.float32)
        valid = (hrow + d >= 0) & (hrow + d < H)        # same-sample rows only
        acc = acc + jnp.where(valid, contrib, 0.0)
    return acc + dwb_ref[...]


def _fused_kernel(mask_ref, patches_ref, *refs):
    w = refs[:N_WEIGHTS]
    out_ref = refs[N_WEIGHTS]
    xp = refs[N_WEIGHTS + 1:]
    m = mask_ref[0]

    # stem: 4x4 / stride-4 conv as one block-diagonal matmul in (B*H, W*C) layout
    x = jnp.dot(patches_ref[...], w[0][...],
                preferred_element_type=jnp.float32) + w[1][...]
    x = _act_poly(x, m, w[2], w[3], w[4], xp[0], ACT_SIZES[0][0])

    for i in range(len(STRIDES)):
        ph, wf, bf, poly, dwm, dwb = w[N_STEM_W + N_STAGE_W * i:
                                       N_STEM_W + N_STAGE_W * (i + 1)]
        # H-pool first (halves rows), then 1x1 conv + W-pool + pooled/padded
        # shortcut folded into one lane-mixing matrix wf (host-built).
        x16 = x.astype(jnp.bfloat16)
        if STRIDES[i] != 1:
            x16 = jnp.dot(ph[...], x16,
                          preferred_element_type=jnp.float32).astype(jnp.bfloat16)
        y = jnp.dot(x16, wf[...], preferred_element_type=jnp.float32) + bf[...]
        x = _act_poly(y, m, poly, dwm, dwb, xp[i + 1], ACT_SIZES[i + 1][0])

    # AdaptiveAvgPool2d((1,1)) + classifier 1x1 conv (avg fold in cls_w;
    # per-sample row-sum via kron(I_B, 1) matrix ps); output padded to 128 lanes.
    ps, wcls, bcls = w[N_WEIGHTS - 3], w[N_WEIGHTS - 2], w[N_WEIGHTS - 1]
    feat = jnp.dot(ps[...], x.astype(jnp.bfloat16),
                   preferred_element_type=jnp.float32)          # (B, W*C)
    out_ref[...] = jnp.dot(feat.astype(jnp.bfloat16), wcls[...],
                           preferred_element_type=jnp.float32) + bcls[...]


def vanillanet_forward(kp, x_nchw, mask):
    """Fused forward.  x_nchw: (N, 3, 64, 64) like the PyTorch module."""
    N = x_nchw.shape[0]
    B = kp['ps'].shape[0]                               # samples per grid step (static)
    assert x_nchw.shape[1:] == (IN_CHANS, IMG, IMG) and N % B == 0
    G = N // B
    patch_k = IN_CHANS * 16

    x = x_nchw.astype(jnp.float32)
    # one fused XLA transpose: stem patches, lane index = wo*48 + cin*16 + ph*4 + pw,
    # row index = b*S0 + h_out within each group of B samples.
    patches = (x.reshape(G, B, IN_CHANS, S0, 4, S0, 4)
                .transpose(0, 1, 3, 5, 2, 4, 6)
                .reshape(G, B * S0, S0 * patch_k)
                .astype(jnp.bfloat16))
    mask = jnp.asarray(mask, jnp.float32).reshape(1)

    weights = [kp['stem_w'], kp['stem_b'], kp['stem_poly'], kp['stem_dwm'], kp['stem_dwb']]
    for st in kp['stages']:
        weights += [st['ph'], st['wf'], st['bf'], st['poly'], st['dwm'], st['dwb']]
    weights += [kp['ps'], kp['cls_w'], kp['cls_b']]

    in_specs = [pl.BlockSpec(memory_space=pltpu.MemorySpace.SMEM),            # mask
                pl.BlockSpec((None, B * S0, S0 * patch_k), lambda g: (g, 0, 0))]
    for a in weights:                                   # whole-array, grid-invariant
        in_specs.append(pl.BlockSpec(a.shape, lambda g, nd=a.ndim: (0,) * nd))

    # one f32 halo scratch per activation: (B*H + 2*ACT_NUM, W*C)
    scratch = [pltpu.VMEM((B * s + 2 * ACT_NUM, s * c), jnp.float32)
               for (s, c) in ACT_SIZES]

    out = pl.pallas_call(
        _fused_kernel,
        out_shape=jax.ShapeDtypeStruct((G, B, CLS_PAD), jnp.float32),
        grid=(G,),
        in_specs=in_specs,
        out_specs=pl.BlockSpec((None, B, CLS_PAD), lambda g: (g, 0, 0)),
        scratch_shapes=scratch,
        compiler_params=pltpu.CompilerParams(dimension_semantics=("parallel",)),
    )(mask, patches, *weights)
    return out.reshape(N, CLS_PAD)[:, :NUM_CLASSES]


# ----------------------------- host-side weight folding -----------------------------
def _block_diag(w, reps):
    ci, co = w.shape
    out = np.zeros((reps, ci, reps, co), np.float32)
    r = np.arange(reps)
    out[r, :, r, :] = w
    return out.reshape(reps * ci, reps * co)


def _h_pool(s_in, stride):
    s_out = s_in // stride
    P = np.zeros((s_out, s_in), np.float32)
    for h in range(s_in):
        P[h // stride, h] = 1.0 / stride
    return P


def _w_pool(s_in, c, stride):
    s_out = s_in // stride
    P = np.zeros((s_in * c, s_out * c), np.float32)
    ar = np.arange(c)
    for w_ in range(s_in):
        P[w_ * c + ar, (w_ // stride) * c + ar] = 1.0 / stride
    return P


def _w_pool_pad(s_in, ci, co, stride):
    # shortcut path: w-avg-pool + zero channel padding ci -> co
    s_out = s_in // stride
    P = np.zeros((s_in * ci, s_out * co), np.float32)
    ar = np.arange(ci)
    for w_ in range(s_in):
        P[w_ * ci + ar, (w_ // stride) * co + ar] = 1.0 / stride
    return P


def _dw_matrices(dw_w, s):
    # dw_w: (C,1,K,K) -> (K, s*C, s*C): one lane-mixing matrix per kernel row,
    # horizontal SAME padding baked in.
    c = dw_w.shape[0]
    M = np.zeros((KSIZE, s * c, s * c), np.float32)
    ar = np.arange(c)
    for kh in range(KSIZE):
        for w_ in range(s):
            for kw in range(KSIZE):
                wq = w_ + kw - ACT_NUM
                if 0 <= wq < s:
                    M[kh, wq * c + ar, w_ * c + ar] = dw_w[:, 0, kh, kw]
    return M


def to_fused_params(tp, block_batch):
    """Fold conv/pool/shortcut into matrices, kron in the per-step batch B,
    and cast matmul operands to bf16 (biases / poly coefs stay f32)."""
    B = int(block_batch)
    factors = np.asarray(POLY_WEIGHT_FACTORS, np.float32)[:, None]

    def act_pp(ap, s):
        dw_w = np.asarray(ap['dw_w'], np.float32)
        coef = np.asarray(ap['poly_coef'], np.float32) * factors   # fold static factors
        return {'poly': jnp.asarray(np.tile(coef, (1, s))),
                'dwm': jnp.asarray(_dw_matrices(dw_w, s), jnp.bfloat16),
                'dwb': jnp.asarray(np.tile(np.asarray(ap['dw_b'], np.float32), s)[None, :])}

    s0, c0 = ACT_SIZES[0]
    stem2d = np.asarray(tp['stem']['w'], np.float32).reshape(c0, IN_CHANS * 16)
    kp = {'stem_w': jnp.asarray(_block_diag(stem2d.T, s0), jnp.bfloat16),
          'stem_b': jnp.asarray(np.tile(np.asarray(tp['stem']['b'], np.float32), s0)[None, :])}
    sa = act_pp(tp['stem_act'], s0)
    kp['stem_poly'], kp['stem_dwm'], kp['stem_dwb'] = sa['poly'], sa['dwm'], sa['dwb']

    kp['stages'] = []
    for i, stride in enumerate(STRIDES):
        s_in, ci = ACT_SIZES[i]
        s_out, co = ACT_SIZES[i + 1]
        sp = tp['stages'][i]
        w1 = np.asarray(sp['conv_w'], np.float32)[:, :, 0, 0].T          # (ci, co)
        wf = (_block_diag(w1, s_in) @ _w_pool(s_in, co, stride)
              + _w_pool_pad(s_in, ci, co, stride))                       # conv+Wpool+shortcut
        ph = np.kron(np.eye(B, dtype=np.float32), _h_pool(s_in, stride)) # H-pool, B samples
        st = {'ph': jnp.asarray(ph, jnp.bfloat16),
              'wf': jnp.asarray(wf, jnp.bfloat16),
              'bf': jnp.asarray(np.tile(np.asarray(sp['conv_b'], np.float32), s_out)[None, :])}
        st.update(act_pp(sp['act'], s_out))
        kp['stages'].append(st)

    s_l, c_l = ACT_SIZES[-1]
    R = np.zeros((s_l * c_l, c_l), np.float32)
    ar = np.arange(c_l)
    for w_ in range(s_l):
        R[w_ * c_l + ar, ar] = 1.0
    wc = np.asarray(tp['cls']['w'], np.float32)[:, :, 0, 0].T            # (c_l, num_classes)
    cls_w = np.pad((R @ wc) / float(s_l * s_l),                          # fold the avg-pool
                   ((0, 0), (0, CLS_PAD - NUM_CLASSES)))                 # pad to 128 lanes
    cls_b = np.pad(np.asarray(tp['cls']['b'], np.float32),
                   (0, CLS_PAD - NUM_CLASSES))[None, :]
    kp['cls_w'] = jnp.asarray(cls_w, jnp.bfloat16)
    kp['cls_b'] = jnp.asarray(cls_b)
    # per-sample row-sum over the last activation's H rows
    kp['ps'] = jnp.asarray(np.kron(np.eye(B, dtype=np.float32),
                                   np.ones((1, s_l), np.float32)), jnp.bfloat16)
    return kp


# ----------------------------- parameters (PyTorch-layout) -----------------------------
def init_params(key):
    keys = iter(jax.random.split(key, 64))

    def tn(shape, std=0.02):
        return std * jax.random.truncated_normal(next(keys), -2.0, 2.0, shape, jnp.float32)

    def act_params(dim):
        return {'dw_w': tn((dim, 1, KSIZE, KSIZE)),
                'dw_b': tn((dim,)),
                'poly_coef': jnp.asarray(POLY_WEIGHT_INITS, jnp.float32)[:, None]
                             + tn((3, dim), std=0.01)}

    p = {'stem': {'w': tn((DIMS[0], IN_CHANS, 4, 4)), 'b': tn((DIMS[0],))},
         'stem_act': act_params(DIMS[0]),
         'stages': []}
    for i in range(len(STRIDES)):
        p['stages'].append({'conv_w': tn((DIMS[i + 1], DIMS[i], 1, 1)),
                            'conv_b': tn((DIMS[i + 1],)),
                            'act': act_params(DIMS[i + 1])})
    p['cls'] = {'w': tn((NUM_CLASSES, DIMS[-1], 1, 1)), 'b': tn((NUM_CLASSES,))}
    return p


# ----------------------------- pure-JAX reference (NCHW, PyTorch semantics) -----------------------------
def ref_forward(tp, x, mask):
    f0, f1, f2 = POLY_WEIGHT_FACTORS

    def relu_poly_ref(x, coef):
        c0 = coef[0][None, :, None, None] * f0
        c1 = coef[1][None, :, None, None] * f1
        c2 = coef[2][None, :, None, None] * f2
        poly = c0 * x * x + c1 * x + c2
        return mask * jnp.maximum(x, 0.0) + (1.0 - mask) * poly

    def dwconv_ref(x, w, b):
        C = x.shape[1]
        y = lax.conv_general_dilated(x, w, (1, 1), [(ACT_NUM, ACT_NUM)] * 2,
                                     dimension_numbers=('NCHW', 'OIHW', 'NCHW'),
                                     feature_group_count=C)
        return y + b[None, :, None, None]

    def act_ref(x, ap):
        return dwconv_ref(relu_poly_ref(x, ap['poly_coef']), ap['dw_w'], ap['dw_b'])

    def avgpool_ref(x, k):
        if k == 1:
            return x
        N, C, H, W = x.shape
        return x.reshape(N, C, H // k, k, W // k, k).mean(axis=(3, 5))

    y = lax.conv_general_dilated(x, tp['stem']['w'], (4, 4), 'VALID',
                                 dimension_numbers=('NCHW', 'OIHW', 'NCHW'))
    y = y + tp['stem']['b'][None, :, None, None]
    y = act_ref(y, tp['stem_act'])
    for i, s in enumerate(STRIDES):
        sp = tp['stages'][i]
        dim, dim_out = DIMS[i], DIMS[i + 1]
        identity = y
        if s != 1 or dim != dim_out:
            identity = avgpool_ref(identity, s)
        if dim != dim_out:
            identity = jnp.pad(identity, ((0, 0), (0, dim), (0, 0), (0, 0)))
        y = jnp.einsum('nchw,oc->nohw', y, sp['conv_w'][:, :, 0, 0])
        y = y + sp['conv_b'][None, :, None, None]
        if s != 1:
            y = avgpool_ref(y, s)
        y = y + identity
        y = act_ref(y, sp['act'])
    pooled = y.mean(axis=(2, 3))
    return pooled @ tp['cls']['w'][:, :, 0, 0].T + tp['cls']['b'][None, :]


# ----------------------------- main -----------------------------
if __name__ == "__main__":
    key = jax.random.PRNGKey(0)
    kparam, kx = jax.random.split(key)
    torch_params = init_params(kparam)

    # B samples per grid step; N//B grid steps (>= 2 keeps both v7x TCs busy).
    # For throughput runs sweep B in 8..32; small here to keep the demo tiny.
    N, B = 4, 2
    fused_params = to_fused_params(torch_params, block_batch=B)

    x = jax.random.normal(kx, (N, IN_CHANS, IMG, IMG), jnp.float32)  # NCHW like PyTorch
    mask = jnp.float32(0.75)

    fwd = jax.jit(vanillanet_forward)
    out = jax.block_until_ready(fwd(fused_params, x, mask))
    assert out.shape == (N, NUM_CLASSES)

    ref = ref_forward(torch_params, x, float(mask))
    # bf16 matmul operands -> slightly relaxed tolerance vs the f32 reference
    np.testing.assert_allclose(np.asarray(out), np.asarray(ref), rtol=5e-2, atol=5e-3)

    print("KERNEL_OK")
</pallas_src>

<mosaic_0001>
module attributes {stable_mosaic.version = 11 : i64} {
  func.func @_fused_kernel(%arg0: i32, %arg1: memref<1xf32, #tpu.memory_space<smem>>, %arg2: memref<1x32x768xbf16, #tpu.memory_space<vmem>>, %arg3: memref<768x128xbf16, #tpu.memory_space<vmem>>, %arg4: memref<1x128xf32, #tpu.memory_space<vmem>>, %arg5: memref<3x128xf32, #tpu.memory_space<vmem>>, %arg6: memref<7x128x128xbf16, #tpu.memory_space<vmem>>, %arg7: memref<1x128xf32, #tpu.memory_space<vmem>>, %arg8: memref<16x32xbf16, #tpu.memory_space<vmem>>, %arg9: memref<128x128xbf16, #tpu.memory_space<vmem>>, %arg10: memref<1x128xf32, #tpu.memory_space<vmem>>, %arg11: memref<3x128xf32, #tpu.memory_space<vmem>>, %arg12: memref<7x128x128xbf16, #tpu.memory_space<vmem>>, %arg13: memref<1x128xf32, #tpu.memory_space<vmem>>, %arg14: memref<8x16xbf16, #tpu.memory_space<vmem>>, %arg15: memref<128x128xbf16, #tpu.memory_space<vmem>>, %arg16: memref<1x128xf32, #tpu.memory_space<vmem>>, %arg17: memref<3x128xf32, #tpu.memory_space<vmem>>, %arg18: memref<7x128x128xbf16, #tpu.memory_space<vmem>>, %arg19: memref<1x128xf32, #tpu.memory_space<vmem>>, %arg20: memref<4x8xbf16, #tpu.memory_space<vmem>>, %arg21: memref<128x64xbf16, #tpu.memory_space<vmem>>, %arg22: memref<1x64xf32, #tpu.memory_space<vmem>>, %arg23: memref<3x64xf32, #tpu.memory_space<vmem>>, %arg24: memref<7x64x64xbf16, #tpu.memory_space<vmem>>, %arg25: memref<1x64xf32, #tpu.memory_space<vmem>>, %arg26: memref<4x4xbf16, #tpu.memory_space<vmem>>, %arg27: memref<64x128xbf16, #tpu.memory_space<vmem>>, %arg28: memref<1x128xf32, #tpu.memory_space<vmem>>, %arg29: memref<3x128xf32, #tpu.memory_space<vmem>>, %arg30: memref<7x128x128xbf16, #tpu.memory_space<vmem>>, %arg31: memref<1x128xf32, #tpu.memory_space<vmem>>, %arg32: memref<2x4xbf16, #tpu.memory_space<vmem>>, %arg33: memref<128x128xbf16, #tpu.memory_space<vmem>>, %arg34: memref<1x128xf32, #tpu.memory_space<vmem>>, %arg35: memref<1x2x128xf32, #tpu.memory_space<vmem>>, %arg36: memref<38x128xf32, #tpu.memory_space<vmem>>, %arg37: memref<22x128xf32, #tpu.memory_space<vmem>>, %arg38: memref<14x128xf32, #tpu.memory_space<vmem>>, %arg39: memref<10x64xf32, #tpu.memory_space<vmem>>, %arg40: memref<10x128xf32, #tpu.memory_space<vmem>>) attributes {dimension_semantics = [#tpu.dimension_semantics<parallel>], iteration_bounds = array<i64: 2>, scalar_prefetch = 0 : i64, scratch_operands = 5 : i64, tpu.core_type = #tpu.core_type<tc>, window_params = [{transform_indices = @transform_0, window_bounds = array<i64: 1>}, {transform_indices = @transform_1, window_bounds = array<i64: 1, 32, 768>}, {pipeline_mode = #tpu.pipeline_mode<synchronous>, transform_indices = @transform_2, window_bounds = array<i64: 768, 128>}, {pipeline_mode = #tpu.pipeline_mode<synchronous>, transform_indices = @transform_3, window_bounds = array<i64: 1, 128>}, {pipeline_mode = #tpu.pipeline_mode<synchronous>, transform_indices = @transform_4, window_bounds = array<i64: 3, 128>}, {pipeline_mode = #tpu.pipeline_mode<synchronous>, transform_indices = @transform_5, window_bounds = array<i64: 7, 128, 128>}, {pipeline_mode = #tpu.pipeline_mode<synchronous>, transform_indices = @transform_6, window_bounds = array<i64: 1, 128>}, {pipeline_mode = #tpu.pipeline_mode<synchronous>, transform_indices = @transform_7, window_bounds = array<i64: 16, 32>}, {pipeline_mode = #tpu.pipeline_mode<synchronous>, transform_indices = @transform_8, window_bounds = array<i64: 128, 128>}, {pipeline_mode = #tpu.pipeline_mode<synchronous>, transform_indices = @transform_9, window_bounds = array<i64: 1, 128>}, {pipeline_mode = #tpu.pipeline_mode<synchronous>, transform_indices = @transform_10, window_bounds = array<i64: 3, 128>}, {pipeline_mode = #tpu.pipeline_mode<synchronous>, transform_indices = @transform_11, window_bounds = array<i64: 7, 128, 128>}, {pipeline_mode = #tpu.pipeline_mode<synchronous>, transform_indices = @transform_12, window_bounds = array<i64: 1, 128>}, {pipeline_mode = #tpu.pipeline_mode<synchronous>, transform_indices = @transform_13, window_bounds = array<i64: 8, 16>}, {pipeline_mode = #tpu.pipeline_mode<synchronous>, transform_indices = @transform_14, window_bounds = array<i64: 128, 128>}, {pipeline_mode = #tpu.pipeline_mode<synchronous>, transform_indices = @transform_15, window_bounds = array<i64: 1, 128>}, {pipeline_mode = #tpu.pipeline_mode<synchronous>, transform_indices = @transform_16, window_bounds = array<i64: 3, 128>}, {pipeline_mode = #tpu.pipeline_mode<synchronous>, transform_indices = @transform_17, window_bounds = array<i64: 7, 128, 128>}, {pipeline_mode = #tpu.pipeline_mode<synchronous>, transform_indices = @transform_18, window_bounds = array<i64: 1, 128>}, {pipeline_mode = #tpu.pipeline_mode<synchronous>, transform_indices = @transform_19, window_bounds = array<i64: 4, 8>}, {pipeline_mode = #tpu.pipeline_mode<synchronous>, transform_indices = @transform_20, window_bounds = array<i64: 128, 64>}, {pipeline_mode = #tpu.pipeline_mode<synchronous>, transform_indices = @transform_21, window_bounds = array<i64: 1, 64>}, {pipeline_mode = #tpu.pipeline_mode<synchronous>, transform_indices = @transform_22, window_bounds = array<i64: 3, 64>}, {pipeline_mode = #tpu.pipeline_mode<synchronous>, transform_indices = @transform_23, window_bounds = array<i64: 7, 64, 64>}, {pipeline_mode = #tpu.pipeline_mode<synchronous>, transform_indices = @transform_24, window_bounds = array<i64: 1, 64>}, {pipeline_mode = #tpu.pipeline_mode<synchronous>, transform_indices = @transform_25, window_bounds = array<i64: 4, 4>}, {pipeline_mode = #tpu.pipeline_mode<synchronous>, transform_indices = @transform_26, window_bounds = array<i64: 64, 128>}, {pipeline_mode = #tpu.pipeline_mode<synchronous>, transform_indices = @transform_27, window_bounds = array<i64: 1, 128>}, {pipeline_mode = #tpu.pipeline_mode<synchronous>, transform_indices = @transform_28, window_bounds = array<i64: 3, 128>}, {pipeline_mode = #tpu.pipeline_mode<synchronous>, transform_indices = @transform_29, window_bounds = array<i64: 7, 128, 128>}, {pipeline_mode = #tpu.pipeline_mode<synchronous>, transform_indices = @transform_30, window_bounds = array<i64: 1, 128>}, {pipeline_mode = #tpu.pipeline_mode<synchronous>, transform_indices = @transform_31, window_bounds = array<i64: 2, 4>}, {pipeline_mode = #tpu.pipeline_mode<synchronous>, transform_indices = @transform_32, window_bounds = array<i64: 128, 128>}, {pipeline_mode = #tpu.pipeline_mode<synchronous>, transform_indices = @transform_33, window_bounds = array<i64: 1, 128>}, {transform_indices = @transform_34, window_bounds = array<i64: 1, 2, 128>}]} {
    %c0 = arith.constant 0 : index
    %0 = memref.load %arg1[%c0] : memref<1xf32, #tpu.memory_space<smem>>
    %c0_0 = arith.constant 0 : index
    %c0_1 = arith.constant 0 : index
    %c0_2 = arith.constant 0 : index
    %1 = vector.load %arg2[%c0_0, %c0_1, %c0_2] : memref<1x32x768xbf16, #tpu.memory_space<vmem>>, vector<1x32x768xbf16>
    %2 = vector.shape_cast %1 : vector<1x32x768xbf16> to vector<32x768xbf16>
    %c0_3 = arith.constant 0 : index
    %c0_4 = arith.constant 0 : index
    %3 = vector.load %arg3[%c0_3, %c0_4] : memref<768x128xbf16, #tpu.memory_space<vmem>>, vector<768x128xbf16>
    %cst = arith.constant dense<0.000000e+00> : vector<32x128xf32>
    %4 = tpu.matmul %2, %3, %cst {dimension_numbers = #tpu.dot_dimension_numbers<[1], [0], [0], [1], [0, 0, 1, 1], [], []>} : vector<32x768xbf16>, vector<768x128xbf16>, vector<32x128xf32> -> vector<32x128xf32>
    %c0_5 = arith.constant 0 : index
    %c0_6 = arith.constant 0 : index
    %5 = vector.load %arg4[%c0_5, %c0_6] : memref<1x128xf32, #tpu.memory_space<vmem>>, vector<1x128xf32>
    %6 = vector.broadcast %5 : vector<1x128xf32> to vector<32x128xf32>
    %7 = arith.addf %4, %6 : vector<32x128xf32>
    %c0_7 = arith.constant 0 : index
    %c0_8 = arith.constant 0 : index
    %8 = vector.load %arg5[%c0_7, %c0_8] : memref<3x128xf32, #tpu.memory_space<vmem>>, vector<3x128xf32>
    %9 = vector.extract_strided_slice %8 {offsets = [0, 0], sizes = [1, 128], strides = [1, 1]} : vector<3x128xf32> to vector<1x128xf32>
    %10 = vector.broadcast %9 : vector<1x128xf32> to vector<32x128xf32>
    %11 = arith.mulf %10, %7 : vector<32x128xf32>
    %12 = vector.extract_strided_slice %8 {offsets = [1, 0], sizes = [1, 128], strides = [1, 1]} : vector<3x128xf32> to vector<1x128xf32>
    %13 = vector.broadcast %12 : vector<1x128xf32> to vector<32x128xf32>
    %14 = arith.addf %11, %13 : vector<32x128xf32>
    %15 = arith.mulf %14, %7 : vector<32x128xf32>
    %16 = vector.extract_strided_slice %8 {offsets = [2, 0], sizes = [1, 128], strides = [1, 1]} : vector<3x128xf32> to vector<1x128xf32>
    %17 = vector.broadcast %16 : vector<1x128xf32> to vector<32x128xf32>
    %18 = arith.addf %15, %17 : vector<32x128xf32>
    %cst_9 = arith.constant 0.000000e+00 : f32
    %19 = vector.broadcast %cst_9 : f32 to vector<32x128xf32>
    %20 = arith.maximumf %7, %19 : vector<32x128xf32>
    %21 = vector.broadcast %0 : f32 to vector<32x128xf32>
    %22 = arith.mulf %21, %20 : vector<32x128xf32>
    %cst_10 = arith.constant 1.000000e+00 : f32
    %23 = arith.subf %cst_10, %0 : f32
    %24 = vector.broadcast %23 : f32 to vector<32x128xf32>
    %25 = arith.mulf %24, %18 : vector<32x128xf32>
    %26 = arith.addf %22, %25 : vector<32x128xf32>
    %c3 = arith.constant 3 : index
    %c0_11 = arith.constant 0 : index
    %27 = vector.load %arg36[%c3, %c0_11] : memref<38x128xf32, #tpu.memory_space<vmem>>, vector<32x128xf32>
    tpu.vector_store %arg36[%c3, %c0_11], %26 {strides = array<i32>} : memref<38x128xf32, #tpu.memory_space<vmem>>, vector<32x128xf32>,
    %28 = arith.truncf %26 : vector<32x128xf32> to vector<32x128xbf16>
    %c3_12 = arith.constant 3 : index
    %c0_13 = arith.constant 0 : index
    %c0_14 = arith.constant 0 : index
    %29 = vector.load %arg6[%c3_12, %c0_13, %c0_14] : memref<7x128x128xbf16, #tpu.memory_space<vmem>>, vector<1x128x128xbf16>
    %30 = vector.shape_cast %29 : vector<1x128x128xbf16> to vector<128x128xbf16>
    %cst_15 = arith.constant dense<0.000000e+00> : vector<32x128xf32>
    %31 = tpu.matmul %28, %30, %cst_15 {dimension_numbers = #tpu.dot_dimension_numbers<[1], [0], [0], [1], [0, 0, 1, 1], [], []>} : vector<32x128xbf16>, vector<128x128xbf16>, vector<32x128xf32> -> vector<32x128xf32>
    %32 = tpu.iota {dimensions = array<i32: 0>} : vector<32x1xi32>
    %c16_i32 = arith.constant 16 : i32
    %c0_i32 = arith.constant 0 : i32
    %33 = arith.cmpi eq, %c16_i32, %c0_i32 : i32
    %c1_i32 = arith.constant 1 : i32
    %34 = arith.select %33, %c1_i32, %c16_i32 : i32
    %35 = vector.broadcast %34 : i32 to vector<32x1xi32>
    %36 = arith.remsi %32, %35 : vector<32x1xi32>
    %c0_i32_16 = arith.constant 0 : i32
    %37 = vector.broadcast %c0_i32_16 : i32 to vector<32x1xi32>
    %38 = arith.cmpi ne, %36, %37 : vector<32x1xi32>
    %c0_i32_17 = arith.constant 0 : i32
    %39 = vector.broadcast %c0_i32_17 : i32 to vector<32x1xi32>
    %40 = arith.cmpi slt, %36, %39 : vector<32x1xi32>
    %c0_i32_18 = arith.constant 0 : i32
    %41 = arith.cmpi slt, %34, %c0_i32_18 : i32
    %42 = vector.broadcast %41 : i1 to vector<32x1xi1>
    %43 = vector.broadcast %42 : vector<32x1xi1> to vector<32x1xi1>
    %44 = arith.xori %40, %43 : vector<32x1xi1>
    %45 = arith.andi %44, %38 : vector<32x1xi1>
    %46 = vector.broadcast %34 : i32 to vector<32x1xi32>
    %47 = arith.addi %36, %46 : vector<32x1xi32>
    %48 = arith.select %45, %47, %36 : vector<32x1xi1>, vector<32x1xi32>
    %c0_19 = arith.constant 0 : index
    %c0_20 = arith.constant 0 : index
    %49 = vector.load %arg36[%c0_19, %c0_20] : memref<38x128xf32, #tpu.memory_space<vmem>>, vector<32x128xf32>
    %50 = arith.truncf %49 : vector<32x128xf32> to vector<32x128xbf16>
    %c0_21 = arith.constant 0 : index
    %c0_22 = arith.constant 0 : index
    %c0_23 = arith.constant 0 : index
    %51 = vector.load %arg6[%c0_21, %c0_22, %c0_23] : memref<7x128x128xbf16, #tpu.memory_space<vmem>>, vector<1x128x128xbf16>
    %52 = vector.shape_cast %51 : vector<1x128x128xbf16> to vector<128x128xbf16>
    %cst_24 = arith.constant dense<0.000000e+00> : vector<32x128xf32>
    %53 = tpu.matmul %50, %52, %cst_24 {dimension_numbers = #tpu.dot_dimension_numbers<[1], [0], [0], [1], [0, 0, 1, 1], [], []>} : vector<32x128xbf16>, vector<128x128xbf16>, vector<32x128xf32> -> vector<32x128xf32>
    %c-3_i32 = arith.constant -3 : i32
    %54 = vector.broadcast %c-3_i32 : i32 to vector<32x1xi32>
    %55 = arith.addi %48, %54 : vector<32x1xi32>
    %c0_i32_25 = arith.constant 0 : i32
    %56 = vector.broadcast %c0_i32_25 : i32 to vector<32x1xi32>
    %57 = arith.cmpi sge, %55, %56 : vector<32x1xi32>
    %c-3_i32_26 = arith.constant -3 : i32
    %58 = vector.broadcast %c-3_i32_26 : i32 to vector<32x1xi32>
    %59 = arith.addi %48, %58 : vector<32x1xi32>
    %c16_i32_27 = arith.constant 16 : i32
    %60 = vector.broadcast %c16_i32_27 : i32 to vector<32x1xi32>
    %61 = arith.cmpi slt, %59, %60 : vector<32x1xi32>
    %62 = arith.andi %57, %61 : vector<32x1xi1>
    %cst_28 = arith.constant 0.000000e+00 : f32
    %63 = vector.shape_cast %62 : vector<32x1xi1> to vector<32x1xi1>
    %64 = vector.broadcast %63 : vector<32x1xi1> to vector<32x128xi1>
    %65 = vector.broadcast %cst_28 : f32 to vector<32x128xf32>
    %66 = arith.select %64, %53, %65 : vector<32x128xi1>, vector<32x128xf32>
    %67 = arith.addf %31, %66 : vector<32x128xf32>
    %c1 = arith.constant 1 : index
    %c0_29 = arith.constant 0 : index
    %68 = vector.load %arg36[%c1, %c0_29] : memref<38x128xf32, #tpu.memory_space<vmem>>, vector<32x128xf32>
    %69 = arith.truncf %68 : vector<32x128xf32> to vector<32x128xbf16>
    %c1_30 = arith.constant 1 : index
    %c0_31 = arith.constant 0 : index
    %c0_32 = arith.constant 0 : index
    %70 = vector.load %arg6[%c1_30, %c0_31, %c0_32] : memref<7x128x128xbf16, #tpu.memory_space<vmem>>, vector<1x128x128xbf16>
    %71 = vector.shape_cast %70 : vector<1x128x128xbf16> to vector<128x128xbf16>
    %cst_33 = arith.constant dense<0.000000e+00> : vector<32x128xf32>
    %72 = tpu.matmul %69, %71, %cst_33 {dimension_numbers = #tpu.dot_dimension_numbers<[1], [0], [0], [1], [0, 0, 1, 1], [], []>} : vector<32x128xbf16>, vector<128x128xbf16>, vector<32x128xf32> -> vector<32x128xf32>
    %c-2_i32 = arith.constant -2 : i32
    %73 = vector.broadcast %c-2_i32 : i32 to vector<32x1xi32>
    %74 = arith.addi %48, %73 : vector<32x1xi32>
    %c0_i32_34 = arith.constant 0 : i32
    %75 = vector.broadcast %c0_i32_34 : i32 to vector<32x1xi32>
    %76 = arith.cmpi sge, %74, %75 : vector<32x1xi32>
    %c-2_i32_35 = arith.constant -2 : i32
    %77 = vector.broadcast %c-2_i32_35 : i32 to vector<32x1xi32>
    %78 = arith.addi %48, %77 : vector<32x1xi32>
    %c16_i32_36 = arith.constant 16 : i32
    %79 = vector.broadcast %c16_i32_36 : i32 to vector<32x1xi32>
    %80 = arith.cmpi slt, %78, %79 : vector<32x1xi32>
    %81 = arith.andi %76, %80 : vector<32x1xi1>
    %cst_37 = arith.constant 0.000000e+00 : f32
    %82 = vector.shape_cast %81 : vector<32x1xi1> to vector<32x1xi1>
    %83 = vector.broadcast %82 : vector<32x1xi1> to vector<32x128xi1>
    %84 = vector.broadcast %cst_37 : f32 to vector<32x128xf32>
    %85 = arith.select %83, %72, %84 : vector<32x128xi1>, vector<32x128xf32>
    %86 = arith.addf %67, %85 : vector<32x128xf32>
    %c2 = arith.constant 2 : index
    %c0_38 = arith.constant 0 : index
    %87 = vector.load %arg36[%c2, %c0_38] : memref<38x128xf32, #tpu.memory_space<vmem>>, vector<32x128xf32>
    %88 = arith.truncf %87 : vector<32x128xf32> to vector<32x128xbf16>
    %c2_39 = arith.constant 2 : index
    %c0_40 = arith.constant 0 : index
    %c0_41 = arith.constant 0 : index
    %89 = vector.load %arg6[%c2_39, %c0_40, %c0_41] : memref<7x128x128xbf16, #tpu.memory_space<vmem>>, vector<1x128x128xbf16>
    %90 = vector.shape_cast %89 : vector<1x128x128xbf16> to vector<128x128xbf16>
    %cst_42 = arith.constant dense<0.000000e+00> : vector<32x128xf32>
    %91 = tpu.matmul %88, %90, %cst_42 {dimension_numbers = #tpu.dot_dimension_numbers<[1], [0], [0], [1], [0, 0, 1, 1], [], []>} : vector<32x128xbf16>, vector<128x128xbf16>, vector<32x128xf32> -> vector<32x128xf32>
    %c-1_i32 = arith.constant -1 : i32
    %92 = vector.broadcast %c-1_i32 : i32 to vector<32x1xi32>
    %93 = arith.addi %48, %92 : vector<32x1xi32>
    %c0_i32_43 = arith.constant 0 : i32
    %94 = vector.broadcast %c0_i32_43 : i32 to vector<32x1xi32>
    %95 = arith.cmpi sge, %93, %94 : vector<32x1xi32>
    %c-1_i32_44 = arith.constant -1 : i32
    %96 = vector.broadcast %c-1_i32_44 : i32 to vector<32x1xi32>
    %97 = arith.addi %48, %96 : vector<32x1xi32>
    %c16_i32_45 = arith.constant 16 : i32
    %98 = vector.broadcast %c16_i32_45 : i32 to vector<32x1xi32>
    %99 = arith.cmpi slt, %97, %98 : vector<32x1xi32>
    %100 = arith.andi %95, %99 : vector<32x1xi1>
    %cst_46 = arith.constant 0.000000e+00 : f32
    %101 = vector.shape_cast %100 : vector<32x1xi1> to vector<32x1xi1>
    %102 = vector.broadcast %101 : vector<32x1xi1> to vector<32x128xi1>
    %103 = vector.broadcast %cst_46 : f32 to vector<32x128xf32>
    %104 = arith.select %102, %91, %103 : vector<32x128xi1>, vector<32x128xf32>
    %105 = arith.addf %86, %104 : vector<32x128xf32>
    %c4 = arith.constant 4 : index
    %c0_47 = arith.constant 0 : index
    %106 = vector.load %arg36[%c4, %c0_47] : memref<38x128xf32, #tpu.memory_space<vmem>>, vector<32x128xf32>
    %107 = arith.truncf %106 : vector<32x128xf32> to vector<32x128xbf16>
    %c4_48 = arith.constant 4 : index
    %c0_49 = arith.constant 0 : index
    %c0_50 = arith.constant 0 : index
    %108 = vector.load %arg6[%c4_48, %c0_49, %c0_50] : memref<7x128x128xbf16, #tpu.memory_space<vmem>>, vector<1x128x128xbf16>
    %109 = vector.shape_cast %108 : vector<1x128x128xbf16> to vector<128x128xbf16>
    %cst_51 = arith.constant dense<0.000000e+00> : vector<32x128xf32>
    %110 = tpu.matmul %107, %109, %cst_51 {dimension_numbers = #tpu.dot_dimension_numbers<[1], [0], [0], [1], [0, 0, 1, 1], [], []>} : vector<32x128xbf16>, vector<128x128xbf16>, vector<32x128xf32> -> vector<32x128xf32>
    %c1_i32_52 = arith.constant 1 : i32
    %111 = vector.broadcast %c1_i32_52 : i32 to vector<32x1xi32>
    %112 = arith.addi %48, %111 : vector<32x1xi32>
    %c0_i32_53 = arith.constant 0 : i32
    %113 = vector.broadcast %c0_i32_53 : i32 to vector<32x1xi32>
    %114 = arith.cmpi sge, %112, %113 : vector<32x1xi32>
    %c1_i32_54 = arith.constant 1 : i32
    %115 = vector.broadcast %c1_i32_54 : i32 to vector<32x1xi32>
    %116 = arith.addi %48, %115 : vector<32x1xi32>
    %c16_i32_55 = arith.constant 16 : i32
    %117 = vector.broadcast %c16_i32_55 : i32 to vector<32x1xi32>
    %118 = arith.cmpi slt, %116, %117 : vector<32x1xi32>
    %119 = arith.andi %114, %118 : vector<32x1xi1>
    %cst_56 = arith.constant 0.000000e+00 : f32
    %120 = vector.shape_cast %119 : vector<32x1xi1> to vector<32x1xi1>
    %121 = vector.broadcast %120 : vector<32x1xi1> to vector<32x128xi1>
    %122 = vector.broadcast %cst_56 : f32 to vector<32x128xf32>
    %123 = arith.select %121, %110, %122 : vector<32x128xi1>, vector<32x128xf32>
    %124 = arith.addf %105, %123 : vector<32x128xf32>
    %c5 = arith.constant 5 : index
    %c0_57 = arith.constant 0 : index
    %125 = vector.load %arg36[%c5, %c0_57] : memref<38x128xf32, #tpu.memory_space<vmem>>, vector<32x128xf32>
    %126 = arith.truncf %125 : vector<32x128xf32> to vector<32x128xbf16>
    %c5_58 = arith.constant 5 : index
    %c0_59 = arith.constant 0 : index
    %c0_60 = arith.constant 0 : index
    %127 = vector.load %arg6[%c5_58, %c0_59, %c0_60] : memref<7x128x128xbf16, #tpu.memory_space<vmem>>, vector<1x128x128xbf16>
    %128 = vector.shape_cast %127 : vector<1x128x128xbf16> to vector<128x128xbf16>
    %cst_61 = arith.constant dense<0.000000e+00> : vector<32x128xf32>
    %129 = tpu.matmul %126, %128, %cst_61 {dimension_numbers = #tpu.dot_dimension_numbers<[1], [0], [0], [1], [0, 0, 1, 1], [], []>} : vector<32x128xbf16>, vector<128x128xbf16>, vector<32x128xf32> -> vector<32x128xf32>
    %c2_i32 = arith.constant 2 : i32
    %130 = vector.broadcast %c2_i32 : i32 to vector<32x1xi32>
    %131 = arith.addi %48, %130 : vector<32x1xi32>
    %c0_i32_62 = arith.constant 0 : i32
    %132 = vector.broadcast %c0_i32_62 : i32 to vector<32x1xi32>
    %133 = arith.cmpi sge, %131, %132 : vector<32x1xi32>
    %c2_i32_63 = arith.constant 2 : i32
    %134 = vector.broadcast %c2_i32_63 : i32 to vector<32x1xi32>
    %135 = arith.addi %48, %134 : vector<32x1xi32>
    %c16_i32_64 = arith.constant 16 : i32
    %136 = vector.broadcast %c16_i32_64 : i32 to vector<32x1xi32>
    %137 = arith.cmpi slt, %135, %136 : vector<32x1xi32>
    %138 = arith.andi %133, %137 : vector<32x1xi1>
    %cst_65 = arith.constant 0.000000e+00 : f32
    %139 = vector.shape_cast %138 : vector<32x1xi1> to vector<32x1xi1>
    %140 = vector.broadcast %139 : vector<32x1xi1> to vector<32x128xi1>
    %141 = vector.broadcast %cst_65 : f32 to vector<32x128xf32>
    %142 = arith.select %140, %129, %141 : vector<32x128xi1>, vector<32x128xf32>
    %143 = arith.addf %124, %142 : vector<32x128xf32>
    %c6 = arith.constant 6 : index
    %c0_66 = arith.constant 0 : index
    %144 = vector.load %arg36[%c6, %c0_66] : memref<38x128xf32, #tpu.memory_space<vmem>>, vector<32x128xf32>
    %145 = arith.truncf %144 : vector<32x128xf32> to vector<32x128xbf16>
    %c6_67 = arith.constant 6 : index
    %c0_68 = arith.constant 0 : index
    %c0_69 = arith.constant 0 : index
    %146 = vector.load %arg6[%c6_67, %c0_68, %c0_69] : memref<7x128x128xbf16, #tpu.memory_space<vmem>>, vector<1x128x128xbf16>
    %147 = vector.shape_cast %146 : vector<1x128x128xbf16> to vector<128x128xbf16>
    %cst_70 = arith.constant dense<0.000000e+00> : vector<32x128xf32>
    %148 = tpu.matmul %145, %147, %cst_70 {dimension_numbers = #tpu.dot_dimension_numbers<[1], [0], [0], [1], [0, 0, 1, 1], [], []>} : vector<32x128xbf16>, vector<128x128xbf16>, vector<32x128xf32> -> vector<32x128xf32>
    %c3_i32 = arith.constant 3 : i32
    %149 = vector.broadcast %c3_i32 : i32 to vector<32x1xi32>
    %150 = arith.addi %48, %149 : vector<32x1xi32>
    %c0_i32_71 = arith.constant 0 : i32
    %151 = vector.broadcast %c0_i32_71 : i32 to vector<32x1xi32>
    %152 = arith.cmpi sge, %150, %151 : vector<32x1xi32>
    %c3_i32_72 = arith.constant 3 : i32
    %153 = vector.broadcast %c3_i32_72 : i32 to vector<32x1xi32>
    %154 = arith.addi %48, %153 : vector<32x1xi32>
    %c16_i32_73 = arith.constant 16 : i32
    %155 = vector.broadcast %c16_i32_73 : i32 to vector<32x1xi32>
    %156 = arith.cmpi slt, %154, %155 : vector<32x1xi32>
    %157 = arith.andi %152, %156 : vector<32x1xi1>
    %cst_74 = arith.constant 0.000000e+00 : f32
    %158 = vector.shape_cast %157 : vector<32x1xi1> to vector<32x1xi1>
    %159 = vector.broadcast %158 : vector<32x1xi1> to vector<32x128xi1>
    %160 = vector.broadcast %cst_74 : f32 to vector<32x128xf32>
    %161 = arith.select %159, %148, %160 : vector<32x128xi1>, vector<32x128xf32>
    %162 = arith.addf %143, %161 : vector<32x128xf32>
    %c0_75 = arith.constant 0 : index
    %c0_76 = arith.constant 0 : index
    %163 = vector.load %arg7[%c0_75, %c0_76] : memref<1x128xf32, #tpu.memory_space<vmem>>, vector<1x128xf32>
    %164 = vector.broadcast %163 : vector<1x128xf32> to vector<32x128xf32>
    %165 = arith.addf %162, %164 : vector<32x128xf32>
    %166 = arith.truncf %165 : vector<32x128xf32> to vector<32x128xbf16>
    %c0_77 = arith.constant 0 : index
    %c0_78 = arith.constant 0 : index
    %167 = vector.load %arg8[%c0_77, %c0_78] : memref<16x32xbf16, #tpu.memory_space<vmem>>, vector<16x32xbf16>
    %cst_79 = arith.constant dense<0.000000e+00> : vector<16x128xf32>
    %168 = tpu.matmul %167, %166, %cst_79 {dimension_numbers = #tpu.dot_dimension_numbers<[1], [0], [0], [1], [0, 0, 1, 1], [], []>} : vector<16x32xbf16>, vector<32x128xbf16>, vector<16x128xf32> -> vector<16x128xf32>
    %169 = arith.truncf %168 : vector<16x128xf32> to vector<16x128xbf16>
    %c0_80 = arith.constant 0 : index
    %c0_81 = arith.constant 0 : index
    %170 = vector.load %arg9[%c0_80, %c0_81] : memref<128x128xbf16, #tpu.memory_space<vmem>>, vector<128x128xbf16>
    %cst_82 = arith.constant dense<0.000000e+00> : vector<16x128xf32>
    %171 = tpu.matmul %169, %170, %cst_82 {dimension_numbers = #tpu.dot_dimension_numbers<[1], [0], [0], [1], [0, 0, 1, 1], [], []>} : vector<16x128xbf16>, vector<128x128xbf16>, vector<16x128xf32> -> vector<16x128xf32>
    %c0_83 = arith.constant 0 : index
    %c0_84 = arith.constant 0 : index
    %172 = vector.load %arg10[%c0_83, %c0_84] : memref<1x128xf32, #tpu.memory_space<vmem>>, vector<1x128xf32>
    %173 = vector.broadcast %172 : vector<1x128xf32> to vector<16x128xf32>
    %174 = arith.addf %171, %173 : vector<16x128xf32>
    %c0_85 = arith.constant 0 : index
    %c0_86 = arith.constant 0 : index
    %175 = vector.load %arg11[%c0_85, %c0_86] : memref<3x128xf32, #tpu.memory_space<vmem>>, vector<3x128xf32>
    %176 = vector.extract_strided_slice %175 {offsets = [0, 0], sizes = [1, 128], strides = [1, 1]} : vector<3x128xf32> to vector<1x128xf32>
    %177 = vector.broadcast %176 : vector<1x128xf32> to vector<16x128xf32>
    %178 = arith.mulf %177, %174 : vector<16x128xf32>
    %179 = vector.extract_strided_slice %175 {offsets = [1, 0], sizes = [1, 128], strides = [1, 1]} : vector<3x128xf32> to vector<1x128xf32>
    %180 = vector.broadcast %179 : vector<1x128xf32> to vector<16x128xf32>
    %181 = arith.addf %178, %180 : vector<16x128xf32>
    %182 = arith.mulf %181, %174 : vector<16x128xf32>
    %183 = vector.extract_strided_slice %175 {offsets = [2, 0], sizes = [1, 128], strides = [1, 1]} : vector<3x128xf32> to vector<1x128xf32>
    %184 = vector.broadcast %183 : vector<1x128xf32> to vector<16x128xf32>
    %185 = arith.addf %182, %184 : vector<16x128xf32>
    %cst_87 = arith.constant 0.000000e+00 : f32
    %186 = vector.broadcast %cst_87 : f32 to vector<16x128xf32>
    %187 = arith.maximumf %174, %186 : vector<16x128xf32>
    %188 = vector.broadcast %0 : f32 to vector<16x128xf32>
    %189 = arith.mulf %188, %187 : vector<16x128xf32>
    %cst_88 = arith.constant 1.000000e+00 : f32
    %190 = arith.subf %cst_88, %0 : f32
    %191 = vector.broadcast %190 : f32 to vector<16x128xf32>
    %192 = arith.mulf %191, %185 : vector<16x128xf32>
    %193 = arith.addf %189, %192 : vector<16x128xf32>
    %c3_89 = arith.constant 3 : index
    %c0_90 = arith.constant 0 : index
    %194 = vector.load %arg37[%c3_89, %c0_90] : memref<22x128xf32, #tpu.memory_space<vmem>>, vector<16x128xf32>
    tpu.vector_store %arg37[%c3_89, %c0_90], %193 {strides = array<i32>} : memref<22x128xf32, #tpu.memory_space<vmem>>, vector<16x128xf32>,
    %195 = arith.truncf %193 : vector<16x128xf32> to vector<16x128xbf16>
    %c3_91 = arith.constant 3 : index
    %c0_92 = arith.constant 0 : index
    %c0_93 = arith.constant 0 : index
    %196 = vector.load %arg12[%c3_91, %c0_92, %c0_93] : memref<7x128x128xbf16, #tpu.memory_space<vmem>>, vector<1x128x128xbf16>
    %197 = vector.shape_cast %196 : vector<1x128x128xbf16> to vector<128x128xbf16>
    %cst_94 = arith.constant dense<0.000000e+00> : vector<16x128xf32>
    %198 = tpu.matmul %195, %197, %cst_94 {dimension_numbers = #tpu.dot_dimension_numbers<[1], [0], [0], [1], [0, 0, 1, 1], [], []>} : vector<16x128xbf16>, vector<128x128xbf16>, vector<16x128xf32> -> vector<16x128xf32>
    %199 = tpu.iota {dimensions = array<i32: 0>} : vector<16x1xi32>
    %c8_i32 = arith.constant 8 : i32
    %c0_i32_95 = arith.constant 0 : i32
    %200 = arith.cmpi eq, %c8_i32, %c0_i32_95 : i32
    %c1_i32_96 = arith.constant 1 : i32
    %201 = arith.select %200, %c1_i32_96, %c8_i32 : i32
    %202 = vector.broadcast %201 : i32 to vector<16x1xi32>
    %203 = arith.remsi %199, %202 : vector<16x1xi32>
    %c0_i32_97 = arith.constant 0 : i32
    %204 = vector.broadcast %c0_i32_97 : i32 to vector<16x1xi32>
    %205 = arith.cmpi ne, %203, %204 : vector<16x1xi32>
    %c0_i32_98 = arith.constant 0 : i32
    %206 = vector.broadcast %c0_i32_98 : i32 to vector<16x1xi32>
    %207 = arith.cmpi slt, %203, %206 : vector<16x1xi32>
    %c0_i32_99 = arith.constant 0 : i32
    %208 = arith.cmpi slt, %201, %c0_i32_99 : i32
    %209 = vector.broadcast %208 : i1 to vector<16x1xi1>
    %210 = vector.broadcast %209 : vector<16x1xi1> to vector<16x1xi1>
    %211 = arith.xori %207, %210 : vector<16x1xi1>
    %212 = arith.andi %211, %205 : vector<16x1xi1>
    %213 = vector.broadcast %201 : i32 to vector<16x1xi32>
    %214 = arith.addi %203, %213 : vector<16x1xi32>
    %215 = arith.select %212, %214, %203 : vector<16x1xi1>, vector<16x1xi32>
    %c0_100 = arith.constant 0 : index
    %c0_101 = arith.constant 0 : index
    %216 = vector.load %arg37[%c0_100, %c0_101] : memref<22x128xf32, #tpu.memory_space<vmem>>, vector<16x128xf32>
    %217 = arith.truncf %216 : vector<16x128xf32> to vector<16x128xbf16>
    %c0_102 = arith.constant 0 : index
    %c0_103 = arith.constant 0 : index
    %c0_104 = arith.constant 0 : index
    %218 = vector.load %arg12[%c0_102, %c0_103, %c0_104] : memref<7x128x128xbf16, #tpu.memory_space<vmem>>, vector<1x128x128xbf16>
    %219 = vector.shape_cast %218 : vector<1x128x128xbf16> to vector<128x128xbf16>
    %cst_105 = arith.constant dense<0.000000e+00> : vector<16x128xf32>
    %220 = tpu.matmul %217, %219, %cst_105 {dimension_numbers = #tpu.dot_dimension_numbers<[1], [0], [0], [1], [0, 0, 1, 1], [], []>} : vector<16x128xbf16>, vector<128x128xbf16>, vector<16x128xf32> -> vector<16x128xf32>
    %c-3_i32_106 = arith.constant -3 : i32
    %221 = vector.broadcast %c-3_i32_106 : i32 to vector<16x1xi32>
    %222 = arith.addi %215, %221 : vector<16x1xi32>
    %c0_i32_107 = arith.constant 0 : i32
    %223 = vector.broadcast %c0_i32_107 : i32 to vector<16x1xi32>
    %224 = arith.cmpi sge, %222, %223 : vector<16x1xi32>
    %c-3_i32_108 = arith.constant -3 : i32
    %225 = vector.broadcast %c-3_i32_108 : i32 to vector<16x1xi32>
    %226 = arith.addi %215, %225 : vector<16x1xi32>
    %c8_i32_109 = arith.constant 8 : i32
    %227 = vector.broadcast %c8_i32_109 : i32 to vector<16x1xi32>
    %228 = arith.cmpi slt, %226, %227 : vector<16x1xi32>
    %229 = arith.andi %224, %228 : vector<16x1xi1>
    %cst_110 = arith.constant 0.000000e+00 : f32
    %230 = vector.shape_cast %229 : vector<16x1xi1> to vector<16x1xi1>
    %231 = vector.broadcast %230 : vector<16x1xi1> to vector<16x128xi1>
    %232 = vector.broadcast %cst_110 : f32 to vector<16x128xf32>
    %233 = arith.select %231, %220, %232 : vector<16x128xi1>, vector<16x128xf32>
    %234 = arith.addf %198, %233 : vector<16x128xf32>
    %c1_111 = arith.constant 1 : index
    %c0_112 = arith.constant 0 : index
    %235 = vector.load %arg37[%c1_111, %c0_112] : memref<22x128xf32, #tpu.memory_space<vmem>>, vector<16x128xf32>
    %236 = arith.truncf %235 : vector<16x128xf32> to vector<16x128xbf16>
    %c1_113 = arith.constant 1 : index
    %c0_114 = arith.constant 0 : index
    %c0_115 = arith.constant 0 : index
    %237 = vector.load %arg12[%c1_113, %c0_114, %c0_115] : memref<7x128x128xbf16, #tpu.memory_space<vmem>>, vector<1x128x128xbf16>
    %238 = vector.shape_cast %237 : vector<1x128x128xbf16> to vector<128x128xbf16>
    %cst_116 = arith.constant dense<0.000000e+00> : vector<16x128xf32>
    %239 = tpu.matmul %236, %238, %cst_116 {dimension_numbers = #tpu.dot_dimension_numbers<[1], [0], [0], [1], [0, 0, 1, 1], [], []>} : vector<16x128xbf16>, vector<128x128xbf16>, vector<16x128xf32> -> vector<16x128xf32>
    %c-2_i32_117 = arith.constant -2 : i32
    %240 = vector.broadcast %c-2_i32_117 : i32 to vector<16x1xi32>
    %241 = arith.addi %215, %240 : vector<16x1xi32>
    %c0_i32_118 = arith.constant 0 : i32
    %242 = vector.broadcast %c0_i32_118 : i32 to vector<16x1xi32>
    %243 = arith.cmpi sge, %241, %242 : vector<16x1xi32>
    %c-2_i32_119 = arith.constant -2 : i32
    %244 = vector.broadcast %c-2_i32_119 : i32 to vector<16x1xi32>
    %245 = arith.addi %215, %244 : vector<16x1xi32>
    %c8_i32_120 = arith.constant 8 : i32
    %246 = vector.broadcast %c8_i32_120 : i32 to vector<16x1xi32>
    %247 = arith.cmpi slt, %245, %246 : vector<16x1xi32>
    %248 = arith.andi %243, %247 : vector<16x1xi1>
    %cst_121 = arith.constant 0.000000e+00 : f32
    %249 = vector.shape_cast %248 : vector<16x1xi1> to vector<16x1xi1>
    %250 = vector.broadcast %249 : vector<16x1xi1> to vector<16x128xi1>
    %251 = vector.broadcast %cst_121 : f32 to vector<16x128xf32>
    %252 = arith.select %250, %239, %251 : vector<16x128xi1>, vector<16x128xf32>
    %253 = arith.addf %234, %252 : vector<16x128xf32>
    %c2_122 = arith.constant 2 : index
    %c0_123 = arith.constant 0 : index
    %254 = vector.load %arg37[%c2_122, %c0_123] : memref<22x128xf32, #tpu.memory_space<vmem>>, vector<16x128xf32>
    %255 = arith.truncf %254 : vector<16x128xf32> to vector<16x128xbf16>
    %c2_124 = arith.constant 2 : index
    %c0_125 = arith.constant 0 : index
    %c0_126 = arith.constant 0 : index
    %256 = vector.load %arg12[%c2_124, %c0_125, %c0_126] : memref<7x128x128xbf16, #tpu.memory_space<vmem>>, vector<1x128x128xbf16>
    %257 = vector.shape_cast %256 : vector<1x128x128xbf16> to vector<128x128xbf16>
    %cst_127 = arith.constant dense<0.000000e+00> : vector<16x128xf32>
    %258 = tpu.matmul %255, %257, %cst_127 {dimension_numbers = #tpu.dot_dimension_numbers<[1], [0], [0], [1], [0, 0, 1, 1], [], []>} : vector<16x128xbf16>, vector<128x128xbf16>, vector<16x128xf32> -> vector<16x128xf32>
    %c-1_i32_128 = arith.constant -1 : i32
    %259 = vector.broadcast %c-1_i32_128 : i32 to vector<16x1xi32>
    %260 = arith.addi %215, %259 : vector<16x1xi32>
    %c0_i32_129 = arith.constant 0 : i32
    %261 = vector.broadcast %c0_i32_129 : i32 to vector<16x1xi32>
    %262 = arith.cmpi sge, %260, %261 : vector<16x1xi32>
    %c-1_i32_130 = arith.constant -1 : i32
    %263 = vector.broadcast %c-1_i32_130 : i32 to vector<16x1xi32>
    %264 = arith.addi %215, %263 : vector<16x1xi32>
    %c8_i32_131 = arith.constant 8 : i32
    %265 = vector.broadcast %c8_i32_131 : i32 to vector<16x1xi32>
    %266 = arith.cmpi slt, %264, %265 : vector<16x1xi32>
    %267 = arith.andi %262, %266 : vector<16x1xi1>
    %cst_132 = arith.constant 0.000000e+00 : f32
    %268 = vector.shape_cast %267 : vector<16x1xi1> to vector<16x1xi1>
    %269 = vector.broadcast %268 : vector<16x1xi1> to vector<16x128xi1>
    %270 = vector.broadcast %cst_132 : f32 to vector<16x128xf32>
    %271 = arith.select %269, %258, %270 : vector<16x128xi1>, vector<16x128xf32>
    %272 = arith.addf %253, %271 : vector<16x128xf32>
    %c4_133 = arith.constant 4 : index
    %c0_134 = arith.constant 0 : index
    %273 = vector.load %arg37[%c4_133, %c0_134] : memref<22x128xf32, #tpu.memory_space<vmem>>, vector<16x128xf32>
    %274 = arith.truncf %273 : vector<16x128xf32> to vector<16x128xbf16>
    %c4_135 = arith.constant 4 : index
    %c0_136 = arith.constant 0 : index
    %c0_137 = arith.constant 0 : index
    %275 = vector.load %arg12[%c4_135, %c0_136, %c0_137] : memref<7x128x128xbf16, #tpu.memory_space<vmem>>, vector<1x128x128xbf16>
    %276 = vector.shape_cast %275 : vector<1x128x128xbf16> to vector<128x128xbf16>
    %cst_138 = arith.constant dense<0.000000e+00> : vector<16x128xf32>
    %277 = tpu.matmul %274, %276, %cst_138 {dimension_numbers = #tpu.dot_dimension_numbers<[1], [0], [0], [1], [0, 0, 1, 1], [], []>} : vector<16x128xbf16>, vector<128x128xbf16>, vector<16x128xf32> -> vector<16x128xf32>
    %c1_i32_139 = arith.constant 1 : i32
    %278 = vector.broadcast %c1_i32_139 : i32 to vector<16x1xi32>
    %279 = arith.addi %215, %278 : vector<16x1xi32>
    %c0_i32_140 = arith.constant 0 : i32
    %280 = vector.broadcast %c0_i32_140 : i32 to vector<16x1xi32>
    %281 = arith.cmpi sge, %279, %280 : vector<16x1xi32>
    %c1_i32_141 = arith.constant 1 : i32
    %282 = vector.broadcast %c1_i32_141 : i32 to vector<16x1xi32>
    %283 = arith.addi %215, %282 : vector<16x1xi32>
    %c8_i32_142 = arith.constant 8 : i32
    %284 = vector.broadcast %c8_i32_142 : i32 to vector<16x1xi32>
    %285 = arith.cmpi slt, %283, %284 : vector<16x1xi32>
    %286 = arith.andi %281, %285 : vector<16x1xi1>
    %cst_143 = arith.constant 0.000000e+00 : f32
    %287 = vector.shape_cast %286 : vector<16x1xi1> to vector<16x1xi1>
    %288 = vector.broadcast %287 : vector<16x1xi1> to vector<16x128xi1>
    %289 = vector.broadcast %cst_143 : f32 to vector<16x128xf32>
    %290 = arith.select %288, %277, %289 : vector<16x128xi1>, vector<16x128xf32>
    %291 = arith.addf %272, %290 : vector<16x128xf32>
    %c5_144 = arith.constant 5 : index
    %c0_145 = arith.constant 0 : index
    %292 = vector.load %arg37[%c5_144, %c0_145] : memref<22x128xf32, #tpu.memory_space<vmem>>, vector<16x128xf32>
    %293 = arith.truncf %292 : vector<16x128xf32> to vector<16x128xbf16>
    %c5_146 = arith.constant 5 : index
    %c0_147 = arith.constant 0 : index
    %c0_148 = arith.constant 0 : index
    %294 = vector.load %arg12[%c5_146, %c0_147, %c0_148] : memref<7x128x128xbf16, #tpu.memory_space<vmem>>, vector<1x128x128xbf16>
    %295 = vector.shape_cast %294 : vector<1x128x128xbf16> to vector<128x128xbf16>
    %cst_149 = arith.constant dense<0.000000e+00> : vector<16x128xf32>
    %296 = tpu.matmul %293, %295, %cst_149 {dimension_numbers = #tpu.dot_dimension_numbers<[1], [0], [0], [1], [0, 0, 1, 1], [], []>} : vector<16x128xbf16>, vector<128x128xbf16>, vector<16x128xf32> -> vector<16x128xf32>
    %c2_i32_150 = arith.constant 2 : i32
    %297 = vector.broadcast %c2_i32_150 : i32 to vector<16x1xi32>
    %298 = arith.addi %215, %297 : vector<16x1xi32>
    %c0_i32_151 = arith.constant 0 : i32
    %299 = vector.broadcast %c0_i32_151 : i32 to vector<16x1xi32>
    %300 = arith.cmpi sge, %298, %299 : vector<16x1xi32>
    %c2_i32_152 = arith.constant 2 : i32
    %301 = vector.broadcast %c2_i32_152 : i32 to vector<16x1xi32>
    %302 = arith.addi %215, %301 : vector<16x1xi32>
    %c8_i32_153 = arith.constant 8 : i32
    %303 = vector.broadcast %c8_i32_153 : i32 to vector<16x1xi32>
    %304 = arith.cmpi slt, %302, %303 : vector<16x1xi32>
    %305 = arith.andi %300, %304 : vector<16x1xi1>
    %cst_154 = arith.constant 0.000000e+00 : f32
    %306 = vector.shape_cast %305 : vector<16x1xi1> to vector<16x1xi1>
    %307 = vector.broadcast %306 : vector<16x1xi1> to vector<16x128xi1>
    %308 = vector.broadcast %cst_154 : f32 to vector<16x128xf32>
    %309 = arith.select %307, %296, %308 : vector<16x128xi1>, vector<16x128xf32>
    %310 = arith.addf %291, %309 : vector<16x128xf32>
    %c6_155 = arith.constant 6 : index
    %c0_156 = arith.constant 0 : index
    %311 = vector.load %arg37[%c6_155, %c0_156] : memref<22x128xf32, #tpu.memory_space<vmem>>, vector<16x128xf32>
    %312 = arith.truncf %311 : vector<16x128xf32> to vector<16x128xbf16>
    %c6_157 = arith.constant 6 : index
    %c0_158 = arith.constant 0 : index
    %c0_159 = arith.constant 0 : index
    %313 = vector.load %arg12[%c6_157, %c0_158, %c0_159] : memref<7x128x128xbf16, #tpu.memory_space<vmem>>, vector<1x128x128xbf16>
    %314 = vector.shape_cast %313 : vector<1x128x128xbf16> to vector<128x128xbf16>
    %cst_160 = arith.constant dense<0.000000e+00> : vector<16x128xf32>
    %315 = tpu.matmul %312, %314, %cst_160 {dimension_numbers = #tpu.dot_dimension_numbers<[1], [0], [0], [1], [0, 0, 1, 1], [], []>} : vector<16x128xbf16>, vector<128x128xbf16>, vector<16x128xf32> -> vector<16x128xf32>
    %c3_i32_161 = arith.constant 3 : i32
    %316 = vector.broadcast %c3_i32_161 : i32 to vector<16x1xi32>
    %317 = arith.addi %215, %316 : vector<16x1xi32>
    %c0_i32_162 = arith.constant 0 : i32
    %318 = vector.broadcast %c0_i32_162 : i32 to vector<16x1xi32>
    %319 = arith.cmpi sge, %317, %318 : vector<16x1xi32>
    %c3_i32_163 = arith.constant 3 : i32
    %320 = vector.broadcast %c3_i32_163 : i32 to vector<16x1xi32>
    %321 = arith.addi %215, %320 : vector<16x1xi32>
    %c8_i32_164 = arith.constant 8 : i32
    %322 = vector.broadcast %c8_i32_164 : i32 to vector<16x1xi32>
    %323 = arith.cmpi slt, %321, %322 : vector<16x1xi32>
    %324 = arith.andi %319, %323 : vector<16x1xi1>
    %cst_165 = arith.constant 0.000000e+00 : f32
    %325 = vector.shape_cast %324 : vector<16x1xi1> to vector<16x1xi1>
    %326 = vector.broadcast %325 : vector<16x1xi1> to vector<16x128xi1>
    %327 = vector.broadcast %cst_165 : f32 to vector<16x128xf32>
    %328 = arith.select %326, %315, %327 : vector<16x128xi1>, vector<16x128xf32>
    %329 = arith.addf %310, %328 : vector<16x128xf32>
    %c0_166 = arith.constant 0 : index
    %c0_167 = arith.constant 0 : index
    %330 = vector.load %arg13[%c0_166, %c0_167] : memref<1x128xf32, #tpu.memory_space<vmem>>, vector<1x128xf32>
    %331 = vector.broadcast %330 : vector<1x128xf32> to vector<16x128xf32>
    %332 = arith.addf %329, %331 : vector<16x128xf32>
    %333 = arith.truncf %332 : vector<16x128xf32> to vector<16x128xbf16>
    %c0_168 = arith.constant 0 : index
    %c0_169 = arith.constant 0 : index
    %334 = vector.load %arg14[%c0_168, %c0_169] : memref<8x16xbf16, #tpu.memory_space<vmem>>, vector<8x16xbf16>
    %cst_170 = arith.constant dense<0.000000e+00> : vector<8x128xf32>
    %335 = tpu.matmul %334, %333, %cst_170 {dimension_numbers = #tpu.dot_dimension_numbers<[1], [0], [0], [1], [0, 0, 1, 1], [], []>} : vector<8x16xbf16>, vector<16x128xbf16>, vector<8x128xf32> -> vector<8x128xf32>
    %336 = arith.truncf %335 : vector<8x128xf32> to vector<8x128xbf16>
    %c0_171 = arith.constant 0 : index
    %c0_172 = arith.constant 0 : index
    %337 = vector.load %arg15[%c0_171, %c0_172] : memref<128x128xbf16, #tpu.memory_space<vmem>>, vector<128x128xbf16>
    %cst_173 = arith.constant dense<0.000000e+00> : vector<8x128xf32>
    %338 = tpu.matmul %336, %337, %cst_173 {dimension_numbers = #tpu.dot_dimension_numbers<[1], [0], [0], [1], [0, 0, 1, 1], [], []>} : vector<8x128xbf16>, vector<128x128xbf16>, vector<8x128xf32> -> vector<8x128xf32>
    %c0_174 = arith.constant 0 : index
    %c0_175 = arith.constant 0 : index
    %339 = vector.load %arg16[%c0_174, %c0_175] : memref<1x128xf32, #tpu.memory_space<vmem>>, vector<1x128xf32>
    %340 = vector.broadcast %339 : vector<1x128xf32> to vector<8x128xf32>
    %341 = arith.addf %338, %340 : vector<8x128xf32>
    %c0_176 = arith.constant 0 : index
    %c0_177 = arith.constant 0 : index
    %342 = vector.load %arg17[%c0_176, %c0_177] : memref<3x128xf32, #tpu.memory_space<vmem>>, vector<3x128xf32>
    %343 = vector.extract_strided_slice %342 {offsets = [0, 0], sizes = [1, 128], strides = [1, 1]} : vector<3x128xf32> to vector<1x128xf32>
    %344 = vector.broadcast %343 : vector<1x128xf32> to vector<8x128xf32>
    %345 = arith.mulf %344, %341 : vector<8x128xf32>
    %346 = vector.extract_strided_slice %342 {offsets = [1, 0], sizes = [1, 128], strides = [1, 1]} : vector<3x128xf32> to vector<1x128xf32>
    %347 = vector.broadcast %346 : vector<1x128xf32> to vector<8x128xf32>
    %348 = arith.addf %345, %347 : vector<8x128xf32>
    %349 = arith.mulf %348, %341 : vector<8x128xf32>
    %350 = vector.extract_strided_slice %342 {offsets = [2, 0], sizes = [1, 128], strides = [1, 1]} : vector<3x128xf32> to vector<1x128xf32>
    %351 = vector.broadcast %350 : vector<1x128xf32> to vector<8x128xf32>
    %352 = arith.addf %349, %351 : vector<8x128xf32>
    %cst_178 = arith.constant 0.000000e+00 : f32
    %353 = vector.broadcast %cst_178 : f32 to vector<8x128xf32>
    %354 = arith.maximumf %341, %353 : vector<8x128xf32>
    %355 = vector.broadcast %0 : f32 to vector<8x128xf32>
    %356 = arith.mulf %355, %354 : vector<8x128xf32>
    %cst_179 = arith.constant 1.000000e+00 : f32
    %357 = arith.subf %cst_179, %0 : f32
    %358 = vector.broadcast %357 : f32 to vector<8x128xf32>
    %359 = arith.mulf %358, %352 : vector<8x128xf32>
    %360 = arith.addf %356, %359 : vector<8x128xf32>
    %c3_180 = arith.constant 3 : index
    %c0_181 = arith.constant 0 : index
    %361 = vector.load %arg38[%c3_180, %c0_181] : memref<14x128xf32, #tpu.memory_space<vmem>>, vector<8x128xf32>
    tpu.vector_store %arg38[%c3_180, %c0_181], %360 {strides = array<i32>} : memref<14x128xf32, #tpu.memory_space<vmem>>, vector<8x128xf32>,
    %362 = arith.truncf %360 : vector<8x128xf32> to vector<8x128xbf16>
    %c3_182 = arith.constant 3 : index
    %c0_183 = arith.constant 0 : index
    %c0_184 = arith.constant 0 : index
    %363 = vector.load %arg18[%c3_182, %c0_183, %c0_184] : memref<7x128x128xbf16, #tpu.memory_space<vmem>>, vector<1x128x128xbf16>
    %364 = vector.shape_cast %363 : vector<1x128x128xbf16> to vector<128x128xbf16>
    %cst_185 = arith.constant dense<0.000000e+00> : vector<8x128xf32>
    %365 = tpu.matmul %362, %364, %cst_185 {dimension_numbers = #tpu.dot_dimension_numbers<[1], [0], [0], [1], [0, 0, 1, 1], [], []>} : vector<8x128xbf16>, vector<128x128xbf16>, vector<8x128xf32> -> vector<8x128xf32>
    %366 = tpu.iota {dimensions = array<i32: 0>} : vector<8x1xi32>
    %c4_i32 = arith.constant 4 : i32
    %c0_i32_186 = arith.constant 0 : i32
    %367 = arith.cmpi eq, %c4_i32, %c0_i32_186 : i32
    %c1_i32_187 = arith.constant 1 : i32
    %368 = arith.select %367, %c1_i32_187, %c4_i32 : i32
    %369 = vector.broadcast %368 : i32 to vector<8x1xi32>
    %370 = arith.remsi %366, %369 : vector<8x1xi32>
    %c0_i32_188 = arith.constant 0 : i32
    %371 = vector.broadcast %c0_i32_188 : i32 to vector<8x1xi32>
    %372 = arith.cmpi ne, %370, %371 : vector<8x1xi32>
    %c0_i32_189 = arith.constant 0 : i32
    %373 = vector.broadcast %c0_i32_189 : i32 to vector<8x1xi32>
    %374 = arith.cmpi slt, %370, %373 : vector<8x1xi32>
    %c0_i32_190 = arith.constant 0 : i32
    %375 = arith.cmpi slt, %368, %c0_i32_190 : i32
    %376 = vector.broadcast %375 : i1 to vector<8x1xi1>
    %377 = vector.broadcast %376 : vector<8x1xi1> to vector<8x1xi1>
    %378 = arith.xori %374, %377 : vector<8x1xi1>
    %379 = arith.andi %378, %372 : vector<8x1xi1>
    %380 = vector.broadcast %368 : i32 to vector<8x1xi32>
    %381 = arith.addi %370, %380 : vector<8x1xi32>
    %382 = arith.select %379, %381, %370 : vector<8x1xi1>, vector<8x1xi32>
    %c0_191 = arith.constant 0 : index
    %c0_192 = arith.constant 0 : index
    %383 = vector.load %arg38[%c0_191, %c0_192] : memref<14x128xf32, #tpu.memory_space<vmem>>, vector<8x128xf32>
    %384 = arith.truncf %383 : vector<8x128xf32> to vector<8x128xbf16>
    %c0_193 = arith.constant 0 : index
    %c0_194 = arith.constant 0 : index
    %c0_195 = arith.constant 0 : index
    %385 = vector.load %arg18[%c0_193, %c0_194, %c0_195] : memref<7x128x128xbf16, #tpu.memory_space<vmem>>, vector<1x128x128xbf16>
    %386 = vector.shape_cast %385 : vector<1x128x128xbf16> to vector<128x128xbf16>
    %cst_196 = arith.constant dense<0.000000e+00> : vector<8x128xf32>
    %387 = tpu.matmul %384, %386, %cst_196 {dimension_numbers = #tpu.dot_dimension_numbers<[1], [0], [0], [1], [0, 0, 1, 1], [], []>} : vector<8x128xbf16>, vector<128x128xbf16>, vector<8x128xf32> -> vector<8x128xf32>
    %c-3_i32_197 = arith.constant -3 : i32
    %388 = vector.broadcast %c-3_i32_197 : i32 to vector<8x1xi32>
    %389 = arith.addi %382, %388 : vector<8x1xi32>
    %c0_i32_198 = arith.constant 0 : i32
    %390 = vector.broadcast %c0_i32_198 : i32 to vector<8x1xi32>
    %391 = arith.cmpi sge, %389, %390 : vector<8x1xi32>
    %c-3_i32_199 = arith.constant -3 : i32
    %392 = vector.broadcast %c-3_i32_199 : i32 to vector<8x1xi32>
    %393 = arith.addi %382, %392 : vector<8x1xi32>
    %c4_i32_200 = arith.constant 4 : i32
    %394 = vector.broadcast %c4_i32_200 : i32 to vector<8x1xi32>
    %395 = arith.cmpi slt, %393, %394 : vector<8x1xi32>
    %396 = arith.andi %391, %395 : vector<8x1xi1>
    %cst_201 = arith.constant 0.000000e+00 : f32
    %397 = vector.shape_cast %396 : vector<8x1xi1> to vector<8x1xi1>
    %398 = vector.broadcast %397 : vector<8x1xi1> to vector<8x128xi1>
    %399 = vector.broadcast %cst_201 : f32 to vector<8x128xf32>
    %400 = arith.select %398, %387, %399 : vector<8x128xi1>, vector<8x128xf32>
    %401 = arith.addf %365, %400 : vector<8x128xf32>
    %c1_202 = arith.constant 1 : index
    %c0_203 = arith.constant 0 : index
    %402 = vector.load %arg38[%c1_202, %c0_203] : memref<14x128xf32, #tpu.memory_space<vmem>>, vector<8x128xf32>
    %403 = arith.truncf %402 : vector<8x128xf32> to vector<8x128xbf16>
    %c1_204 = arith.constant 1 : index
    %c0_205 = arith.constant 0 : index
    %c0_206 = arith.constant 0 : index
    %404 = vector.load %arg18[%c1_204, %c0_205, %c0_206] : memref<7x128x128xbf16, #tpu.memory_space<vmem>>, vector<1x128x128xbf16>
    %405 = vector.shape_cast %404 : vector<1x128x128xbf16> to vector<128x128xbf16>
    %cst_207 = arith.constant dense<0.000000e+00> : vector<8x128xf32>
    %406 = tpu.matmul %403, %405, %cst_207 {dimension_numbers = #tpu.dot_dimension_numbers<[1], [0], [0], [1], [0, 0, 1, 1], [], []>} : vector<8x128xbf16>, vector<128x128xbf16>, vector<8x128xf32> -> vector<8x128xf32>
    %c-2_i32_208 = arith.constant -2 : i32
    %407 = vector.broadcast %c-2_i32_208 : i32 to vector<8x1xi32>
    %408 = arith.addi %382, %407 : vector<8x1xi32>
    %c0_i32_209 = arith.constant 0 : i32
    %409 = vector.broadcast %c0_i32_209 : i32 to vector<8x1xi32>
    %410 = arith.cmpi sge, %408, %409 : vector<8x1xi32>
    %c-2_i32_210 = arith.constant -2 : i32
    %411 = vector.broadcast %c-2_i32_210 : i32 to vector<8x1xi32>
    %412 = arith.addi %382, %411 : vector<8x1xi32>
    %c4_i32_211 = arith.constant 4 : i32
    %413 = vector.broadcast %c4_i32_211 : i32 to vector<8x1xi32>
    %414 = arith.cmpi slt, %412, %413 : vector<8x1xi32>
    %415 = arith.andi %410, %414 : vector<8x1xi1>
    %cst_212 = arith.constant 0.000000e+00 : f32
    %416 = vector.shape_cast %415 : vector<8x1xi1> to vector<8x1xi1>
    %417 = vector.broadcast %416 : vector<8x1xi1> to vector<8x128xi1>
    %418 = vector.broadcast %cst_212 : f32 to vector<8x128xf32>
    %419 = arith.select %417, %406, %418 : vector<8x128xi1>, vector<8x128xf32>
    %420 = arith.addf %401, %419 : vector<8x128xf32>
    %c2_213 = arith.constant 2 : index
    %c0_214 = arith.constant 0 : index
    %421 = vector.load %arg38[%c2_213, %c0_214] : memref<14x128xf32, #tpu.memory_space<vmem>>, vector<8x128xf32>
    %422 = arith.truncf %421 : vector<8x128xf32> to vector<8x128xbf16>
    %c2_215 = arith.constant 2 : index
    %c0_216 = arith.constant 0 : index
    %c0_217 = arith.constant 0 : index
    %423 = vector.load %arg18[%c2_215, %c0_216, %c0_217] : memref<7x128x128xbf16, #tpu.memory_space<vmem>>, vector<1x128x128xbf16>
    %424 = vector.shape_cast %423 : vector<1x128x128xbf16> to vector<128x128xbf16>
    %cst_218 = arith.constant dense<0.000000e+00> : vector<8x128xf32>
    %425 = tpu.matmul %422, %424, %cst_218 {dimension_numbers = #tpu.dot_dimension_numbers<[1], [0], [0], [1], [0, 0, 1, 1], [], []>} : vector<8x128xbf16>, vector<128x128xbf16>, vector<8x128xf32> -> vector<8x128xf32>
    %c-1_i32_219 = arith.constant -1 : i32
    %426 = vector.broadcast %c-1_i32_219 : i32 to vector<8x1xi32>
    %427 = arith.addi %382, %426 : vector<8x1xi32>
    %c0_i32_220 = arith.constant 0 : i32
    %428 = vector.broadcast %c0_i32_220 : i32 to vector<8x1xi32>
    %429 = arith.cmpi sge, %427, %428 : vector<8x1xi32>
    %c-1_i32_221 = arith.constant -1 : i32
    %430 = vector.broadcast %c-1_i32_221 : i32 to vector<8x1xi32>
    %431 = arith.addi %382, %430 : vector<8x1xi32>
    %c4_i32_222 = arith.constant 4 : i32
    %432 = vector.broadcast %c4_i32_222 : i32 to vector<8x1xi32>
    %433 = arith.cmpi slt, %431, %432 : vector<8x1xi32>
    %434 = arith.andi %429, %433 : vector<8x1xi1>
    %cst_223 = arith.constant 0.000000e+00 : f32
    %435 = vector.shape_cast %434 : vector<8x1xi1> to vector<8x1xi1>
    %436 = vector.broadcast %435 : vector<8x1xi1> to vector<8x128xi1>
    %437 = vector.broadcast %cst_223 : f32 to vector<8x128xf32>
    %438 = arith.select %436, %425, %437 : vector<8x128xi1>, vector<8x128xf32>
    %439 = arith.addf %420, %438 : vector<8x128xf32>
    %c4_224 = arith.constant 4 : index
    %c0_225 = arith.constant 0 : index
    %440 = vector.load %arg38[%c4_224, %c0_225] : memref<14x128xf32, #tpu.memory_space<vmem>>, vector<8x128xf32>
    %441 = arith.truncf %440 : vector<8x128xf32> to vector<8x128xbf16>
    %c4_226 = arith.constant 4 : index
    %c0_227 = arith.constant 0 : index
    %c0_228 = arith.constant 0 : index
    %442 = vector.load %arg18[%c4_226, %c0_227, %c0_228] : memref<7x128x128xbf16, #tpu.memory_space<vmem>>, vector<1x128x128xbf16>
    %443 = vector.shape_cast %442 : vector<1x128x128xbf16> to vector<128x128xbf16>
    %cst_229 = arith.constant dense<0.000000e+00> : vector<8x128xf32>
    %444 = tpu.matmul %441, %443, %cst_229 {dimension_numbers = #tpu.dot_dimension_numbers<[1], [0], [0], [1], [0, 0, 1, 1], [], []>} : vector<8x128xbf16>, vector<128x128xbf16>, vector<8x128xf32> -> vector<8x128xf32>
    %c1_i32_230 = arith.constant 1 : i32
    %445 = vector.broadcast %c1_i32_230 : i32 to vector<8x1xi32>
    %446 = arith.addi %382, %445 : vector<8x1xi32>
    %c0_i32_231 = arith.constant 0 : i32
    %447 = vector.broadcast %c0_i32_231 : i32 to vector<8x1xi32>
    %448 = arith.cmpi sge, %446, %447 : vector<8x1xi32>
    %c1_i32_232 = arith.constant 1 : i32
    %449 = vector.broadcast %c1_i32_232 : i32 to vector<8x1xi32>
    %450 = arith.addi %382, %449 : vector<8x1xi32>
    %c4_i32_233 = arith.constant 4 : i32
    %451 = vector.broadcast %c4_i32_233 : i32 to vector<8x1xi32>
    %452 = arith.cmpi slt, %450, %451 : vector<8x1xi32>
    %453 = arith.andi %448, %452 : vector<8x1xi1>
    %cst_234 = arith.constant 0.000000e+00 : f32
    %454 = vector.shape_cast %453 : vector<8x1xi1> to vector<8x1xi1>
    %455 = vector.broadcast %454 : vector<8x1xi1> to vector<8x128xi1>
    %456 = vector.broadcast %cst_234 : f32 to vector<8x128xf32>
    %457 = arith.select %455, %444, %456 : vector<8x128xi1>, vector<8x128xf32>
    %458 = arith.addf %439, %457 : vector<8x128xf32>
    %c5_235 = arith.constant 5 : index
    %c0_236 = arith.constant 0 : index
    %459 = vector.load %arg38[%c5_235, %c0_236] : memref<14x128xf32, #tpu.memory_space<vmem>>, vector<8x128xf32>
    %460 = arith.truncf %459 : vector<8x128xf32> to vector<8x128xbf16>
    %c5_237 = arith.constant 5 : index
    %c0_238 = arith.constant 0 : index
    %c0_239 = arith.constant 0 : index
    %461 = vector.load %arg18[%c5_237, %c0_238, %c0_239] : memref<7x128x128xbf16, #tpu.memory_space<vmem>>, vector<1x128x128xbf16>
    %462 = vector.shape_cast %461 : vector<1x128x128xbf16> to vector<128x128xbf16>
    %cst_240 = arith.constant dense<0.000000e+00> : vector<8x128xf32>
    %463 = tpu.matmul %460, %462, %cst_240 {dimension_numbers = #tpu.dot_dimension_numbers<[1], [0], [0], [1], [0, 0, 1, 1], [], []>} : vector<8x128xbf16>, vector<128x128xbf16>, vector<8x128xf32> -> vector<8x128xf32>
    %c2_i32_241 = arith.constant 2 : i32
    %464 = vector.broadcast %c2_i32_241 : i32 to vector<8x1xi32>
    %465 = arith.addi %382, %464 : vector<8x1xi32>
    %c0_i32_242 = arith.constant 0 : i32
    %466 = vector.broadcast %c0_i32_242 : i32 to vector<8x1xi32>
    %467 = arith.cmpi sge, %465, %466 : vector<8x1xi32>
    %c2_i32_243 = arith.constant 2 : i32
    %468 = vector.broadcast %c2_i32_243 : i32 to vector<8x1xi32>
    %469 = arith.addi %382, %468 : vector<8x1xi32>
    %c4_i32_244 = arith.constant 4 : i32
    %470 = vector.broadcast %c4_i32_244 : i32 to vector<8x1xi32>
    %471 = arith.cmpi slt, %469, %470 : vector<8x1xi32>
    %472 = arith.andi %467, %471 : vector<8x1xi1>
    %cst_245 = arith.constant 0.000000e+00 : f32
    %473 = vector.shape_cast %472 : vector<8x1xi1> to vector<8x1xi1>
    %474 = vector.broadcast %473 : vector<8x1xi1> to vector<8x128xi1>
    %475 = vector.broadcast %cst_245 : f32 to vector<8x128xf32>
    %476 = arith.select %474, %463, %475 : vector<8x128xi1>, vector<8x128xf32>
    %477 = arith.addf %458, %476 : vector<8x128xf32>
    %c6_246 = arith.constant 6 : index
    %c0_247 = arith.constant 0 : index
    %478 = vector.load %arg38[%c6_246, %c0_247] : memref<14x128xf32, #tpu.memory_space<vmem>>, vector<8x128xf32>
    %479 = arith.truncf %478 : vector<8x128xf32> to vector<8x128xbf16>
    %c6_248 = arith.constant 6 : index
    %c0_249 = arith.constant 0 : index
    %c0_250 = arith.constant 0 : index
    %480 = vector.load %arg18[%c6_248, %c0_249, %c0_250] : memref<7x128x128xbf16, #tpu.memory_space<vmem>>, vector<1x128x128xbf16>
    %481 = vector.shape_cast %480 : vector<1x128x128xbf16> to vector<128x128xbf16>
    %cst_251 = arith.constant dense<0.000000e+00> : vector<8x128xf32>
    %482 = tpu.matmul %479, %481, %cst_251 {dimension_numbers = #tpu.dot_dimension_numbers<[1], [0], [0], [1], [0, 0, 1, 1], [], []>} : vector<8x128xbf16>, vector<128x128xbf16>, vector<8x128xf32> -> vector<8x128xf32>
    %c3_i32_252 = arith.constant 3 : i32
    %483 = vector.broadcast %c3_i32_252 : i32 to vector<8x1xi32>
    %484 = arith.addi %382, %483 : vector<8x1xi32>
    %c0_i32_253 = arith.constant 0 : i32
    %485 = vector.broadcast %c0_i32_253 : i32 to vector<8x1xi32>
    %486 = arith.cmpi sge, %484, %485 : vector<8x1xi32>
    %c3_i32_254 = arith.constant 3 : i32
    %487 = vector.broadcast %c3_i32_254 : i32 to vector<8x1xi32>
    %488 = arith.addi %382, %487 : vector<8x1xi32>
    %c4_i32_255 = arith.constant 4 : i32
    %489 = vector.broadcast %c4_i32_255 : i32 to vector<8x1xi32>
    %490 = arith.cmpi slt, %488, %489 : vector<8x1xi32>
    %491 = arith.andi %486, %490 : vector<8x1xi1>
    %cst_256 = arith.constant 0.000000e+00 : f32
    %492 = vector.shape_cast %491 : vector<8x1xi1> to vector<8x1xi1>
    %493 = vector.broadcast %492 : vector<8x1xi1> to vector<8x128xi1>
    %494 = vector.broadcast %cst_256 : f32 to vector<8x128xf32>
    %495 = arith.select %493, %482, %494 : vector<8x128xi1>, vector<8x128xf32>
    %496 = arith.addf %477, %495 : vector<8x128xf32>
    %c0_257 = arith.constant 0 : index
    %c0_258 = arith.constant 0 : index
    %497 = vector.load %arg19[%c0_257, %c0_258] : memref<1x128xf32, #tpu.memory_space<vmem>>, vector<1x128xf32>
    %498 = vector.broadcast %497 : vector<1x128xf32> to vector<8x128xf32>
    %499 = arith.addf %496, %498 : vector<8x128xf32>
    %500 = arith.truncf %499 : vector<8x128xf32> to vector<8x128xbf16>
    %c0_259 = arith.constant 0 : index
    %c0_260 = arith.constant 0 : index
    %501 = vector.load %arg20[%c0_259, %c0_260] : memref<4x8xbf16, #tpu.memory_space<vmem>>, vector<4x8xbf16>
    %cst_261 = arith.constant dense<0.000000e+00> : vector<4x128xf32>
    %502 = tpu.matmul %501, %500, %cst_261 {dimension_numbers = #tpu.dot_dimension_numbers<[1], [0], [0], [1], [0, 0, 1, 1], [], []>} : vector<4x8xbf16>, vector<8x128xbf16>, vector<4x128xf32> -> vector<4x128xf32>
    %503 = arith.truncf %502 : vector<4x128xf32> to vector<4x128xbf16>
    %c0_262 = arith.constant 0 : index
    %c0_263 = arith.constant 0 : index
    %504 = vector.load %arg21[%c0_262, %c0_263] : memref<128x64xbf16, #tpu.memory_space<vmem>>, vector<128x64xbf16>
    %cst_264 = arith.constant dense<0.000000e+00> : vector<4x64xf32>
    %505 = tpu.matmul %503, %504, %cst_264 {dimension_numbers = #tpu.dot_dimension_numbers<[1], [0], [0], [1], [0, 0, 1, 1], [], []>} : vector<4x128xbf16>, vector<128x64xbf16>, vector<4x64xf32> -> vector<4x64xf32>
    %c0_265 = arith.constant 0 : index
    %c0_266 = arith.constant 0 : index
    %506 = vector.load %arg22[%c0_265, %c0_266] : memref<1x64xf32, #tpu.memory_space<vmem>>, vector<1x64xf32>
    %507 = vector.broadcast %506 : vector<1x64xf32> to vector<4x64xf32>
    %508 = arith.addf %505, %507 : vector<4x64xf32>
    %c0_267 = arith.constant 0 : index
    %c0_268 = arith.constant 0 : index
    %509 = vector.load %arg23[%c0_267, %c0_268] : memref<3x64xf32, #tpu.memory_space<vmem>>, vector<3x64xf32>
    %510 = vector.extract_strided_slice %509 {offsets = [0, 0], sizes = [1, 64], strides = [1, 1]} : vector<3x64xf32> to vector<1x64xf32>
    %511 = vector.broadcast %510 : vector<1x64xf32> to vector<4x64xf32>
    %512 = arith.mulf %511, %508 : vector<4x64xf32>
    %513 = vector.extract_strided_slice %509 {offsets = [1, 0], sizes = [1, 64], strides = [1, 1]} : vector<3x64xf32> to vector<1x64xf32>
    %514 = vector.broadcast %513 : vector<1x64xf32> to vector<4x64xf32>
    %515 = arith.addf %512, %514 : vector<4x64xf32>
    %516 = arith.mulf %515, %508 : vector<4x64xf32>
    %517 = vector.extract_strided_slice %509 {offsets = [2, 0], sizes = [1, 64], strides = [1, 1]} : vector<3x64xf32> to vector<1x64xf32>
    %518 = vector.broadcast %517 : vector<1x64xf32> to vector<4x64xf32>
    %519 = arith.addf %516, %518 : vector<4x64xf32>
    %cst_269 = arith.constant 0.000000e+00 : f32
    %520 = vector.broadcast %cst_269 : f32 to vector<4x64xf32>
    %521 = arith.maximumf %508, %520 : vector<4x64xf32>
    %522 = vector.broadcast %0 : f32 to vector<4x64xf32>
    %523 = arith.mulf %522, %521 : vector<4x64xf32>
    %cst_270 = arith.constant 1.000000e+00 : f32
    %524 = arith.subf %cst_270, %0 : f32
    %525 = vector.broadcast %524 : f32 to vector<4x64xf32>
    %526 = arith.mulf %525, %519 : vector<4x64xf32>
    %527 = arith.addf %523, %526 : vector<4x64xf32>
    %c3_271 = arith.constant 3 : index
    %c0_272 = arith.constant 0 : index
    %528 = vector.load %arg39[%c3_271, %c0_272] : memref<10x64xf32, #tpu.memory_space<vmem>>, vector<4x64xf32>
    tpu.vector_store %arg39[%c3_271, %c0_272], %527 {strides = array<i32>} : memref<10x64xf32, #tpu.memory_space<vmem>>, vector<4x64xf32>,
    %529 = arith.truncf %527 : vector<4x64xf32> to vector<4x64xbf16>
    %c3_273 = arith.constant 3 : index
    %c0_274 = arith.constant 0 : index
    %c0_275 = arith.constant 0 : index
    %530 = vector.load %arg24[%c3_273, %c0_274, %c0_275] : memref<7x64x64xbf16, #tpu.memory_space<vmem>>, vector<1x64x64xbf16>
    %531 = vector.shape_cast %530 : vector<1x64x64xbf16> to vector<64x64xbf16>
    %cst_276 = arith.constant dense<0.000000e+00> : vector<4x64xf32>
    %532 = tpu.matmul %529, %531, %cst_276 {dimension_numbers = #tpu.dot_dimension_numbers<[1], [0], [0], [1], [0, 0, 1, 1], [], []>} : vector<4x64xbf16>, vector<64x64xbf16>, vector<4x64xf32> -> vector<4x64xf32>
    %533 = tpu.iota {dimensions = array<i32: 0>} : vector<4x1xi32>
    %c2_i32_277 = arith.constant 2 : i32
    %c0_i32_278 = arith.constant 0 : i32
    %534 = arith.cmpi eq, %c2_i32_277, %c0_i32_278 : i32
    %c1_i32_279 = arith.constant 1 : i32
    %535 = arith.select %534, %c1_i32_279, %c2_i32_277 : i32
    %536 = vector.broadcast %535 : i32 to vector<4x1xi32>
    %537 = arith.remsi %533, %536 : vector<4x1xi32>
    %c0_i32_280 = arith.constant 0 : i32
    %538 = vector.broadcast %c0_i32_280 : i32 to vector<4x1xi32>
    %539 = arith.cmpi ne, %537, %538 : vector<4x1xi32>
    %c0_i32_281 = arith.constant 0 : i32
    %540 = vector.broadcast %c0_i32_281 : i32 to vector<4x1xi32>
    %541 = arith.cmpi slt, %537, %540 : vector<4x1xi32>
    %c0_i32_282 = arith.constant 0 : i32
    %542 = arith.cmpi slt, %535, %c0_i32_282 : i32
    %543 = vector.broadcast %542 : i1 to vector<4x1xi1>
    %544 = vector.broadcast %543 : vector<4x1xi1> to vector<4x1xi1>
    %545 = arith.xori %541, %544 : vector<4x1xi1>
    %546 = arith.andi %545, %539 : vector<4x1xi1>
    %547 = vector.broadcast %535 : i32 to vector<4x1xi32>
    %548 = arith.addi %537, %547 : vector<4x1xi32>
    %549 = arith.select %546, %548, %537 : vector<4x1xi1>, vector<4x1xi32>
    %c2_283 = arith.constant 2 : index
    %c0_284 = arith.constant 0 : index
    %550 = vector.load %arg39[%c2_283, %c0_284] : memref<10x64xf32, #tpu.memory_space<vmem>>, vector<4x64xf32>
    %551 = arith.truncf %550 : vector<4x64xf32> to vector<4x64xbf16>
    %c2_285 = arith.constant 2 : index
    %c0_286 = arith.constant 0 : index
    %c0_287 = arith.constant 0 : index
    %552 = vector.load %arg24[%c2_285, %c0_286, %c0_287] : memref<7x64x64xbf16, #tpu.memory_space<vmem>>, vector<1x64x64xbf16>
    %553 = vector.shape_cast %552 : vector<1x64x64xbf16> to vector<64x64xbf16>
    %cst_288 = arith.constant dense<0.000000e+00> : vector<4x64xf32>
    %554 = tpu.matmul %551, %553, %cst_288 {dimension_numbers = #tpu.dot_dimension_numbers<[1], [0], [0], [1], [0, 0, 1, 1], [], []>} : vector<4x64xbf16>, vector<64x64xbf16>, vector<4x64xf32> -> vector<4x64xf32>
    %c-1_i32_289 = arith.constant -1 : i32
    %555 = vector.broadcast %c-1_i32_289 : i32 to vector<4x1xi32>
    %556 = arith.addi %549, %555 : vector<4x1xi32>
    %c0_i32_290 = arith.constant 0 : i32
    %557 = vector.broadcast %c0_i32_290 : i32 to vector<4x1xi32>
    %558 = arith.cmpi sge, %556, %557 : vector<4x1xi32>
    %c-1_i32_291 = arith.constant -1 : i32
    %559 = vector.broadcast %c-1_i32_291 : i32 to vector<4x1xi32>
    %560 = arith.addi %549, %559 : vector<4x1xi32>
    %c2_i32_292 = arith.constant 2 : i32
    %561 = vector.broadcast %c2_i32_292 : i32 to vector<4x1xi32>
    %562 = arith.cmpi slt, %560, %561 : vector<4x1xi32>
    %563 = arith.andi %558, %562 : vector<4x1xi1>
    %cst_293 = arith.constant 0.000000e+00 : f32
    %564 = vector.shape_cast %563 : vector<4x1xi1> to vector<4x1xi1>
    %565 = vector.broadcast %564 : vector<4x1xi1> to vector<4x64xi1>
    %566 = vector.broadcast %cst_293 : f32 to vector<4x64xf32>
    %567 = arith.select %565, %554, %566 : vector<4x64xi1>, vector<4x64xf32>
    %568 = arith.addf %532, %567 : vector<4x64xf32>
    %c4_294 = arith.constant 4 : index
    %c0_295 = arith.constant 0 : index
    %569 = vector.load %arg39[%c4_294, %c0_295] : memref<10x64xf32, #tpu.memory_space<vmem>>, vector<4x64xf32>
    %570 = arith.truncf %569 : vector<4x64xf32> to vector<4x64xbf16>
    %c4_296 = arith.constant 4 : index
    %c0_297 = arith.constant 0 : index
    %c0_298 = arith.constant 0 : index
    %571 = vector.load %arg24[%c4_296, %c0_297, %c0_298] : memref<7x64x64xbf16, #tpu.memory_space<vmem>>, vector<1x64x64xbf16>
    %572 = vector.shape_cast %571 : vector<1x64x64xbf16> to vector<64x64xbf16>
    %cst_299 = arith.constant dense<0.000000e+00> : vector<4x64xf32>
    %573 = tpu.matmul %570, %572, %cst_299 {dimension_numbers = #tpu.dot_dimension_numbers<[1], [0], [0], [1], [0, 0, 1, 1], [], []>} : vector<4x64xbf16>, vector<64x64xbf16>, vector<4x64xf32> -> vector<4x64xf32>
    %c1_i32_300 = arith.constant 1 : i32
    %574 = vector.broadcast %c1_i32_300 : i32 to vector<4x1xi32>
    %575 = arith.addi %549, %574 : vector<4x1xi32>
    %c0_i32_301 = arith.constant 0 : i32
    %576 = vector.broadcast %c0_i32_301 : i32 to vector<4x1xi32>
    %577 = arith.cmpi sge, %575, %576 : vector<4x1xi32>
    %c1_i32_302 = arith.constant 1 : i32
    %578 = vector.broadcast %c1_i32_302 : i32 to vector<4x1xi32>
    %579 = arith.addi %549, %578 : vector<4x1xi32>
    %c2_i32_303 = arith.constant 2 : i32
    %580 = vector.broadcast %c2_i32_303 : i32 to vector<4x1xi32>
    %581 = arith.cmpi slt, %579, %580 : vector<4x1xi32>
    %582 = arith.andi %577, %581 : vector<4x1xi1>
    %cst_304 = arith.constant 0.000000e+00 : f32
    %583 = vector.shape_cast %582 : vector<4x1xi1> to vector<4x1xi1>
    %584 = vector.broadcast %583 : vector<4x1xi1> to vector<4x64xi1>
    %585 = vector.broadcast %cst_304 : f32 to vector<4x64xf32>
    %586 = arith.select %584, %573, %585 : vector<4x64xi1>, vector<4x64xf32>
    %587 = arith.addf %568, %586 : vector<4x64xf32>
    %c0_305 = arith.constant 0 : index
    %c0_306 = arith.constant 0 : index
    %588 = vector.load %arg25[%c0_305, %c0_306] : memref<1x64xf32, #tpu.memory_space<vmem>>, vector<1x64xf32>
    %589 = vector.broadcast %588 : vector<1x64xf32> to vector<4x64xf32>
    %590 = arith.addf %587, %589 : vector<4x64xf32>
    %591 = arith.truncf %590 : vector<4x64xf32> to vector<4x64xbf16>
    %c0_307 = arith.constant 0 : index
    %c0_308 = arith.constant 0 : index
    %592 = vector.load %arg27[%c0_307, %c0_308] : memref<64x128xbf16, #tpu.memory_space<vmem>>, vector<64x128xbf16>
    %cst_309 = arith.constant dense<0.000000e+00> : vector<4x128xf32>
    %593 = tpu.matmul %591, %592, %cst_309 {dimension_numbers = #tpu.dot_dimension_numbers<[1], [0], [0], [1], [0, 0, 1, 1], [], []>} : vector<4x64xbf16>, vector<64x128xbf16>, vector<4x128xf32> -> vector<4x128xf32>
    %c0_310 = arith.constant 0 : index
    %c0_311 = arith.constant 0 : index
    %594 = vector.load %arg28[%c0_310, %c0_311] : memref<1x128xf32, #tpu.memory_space<vmem>>, vector<1x128xf32>
    %595 = vector.broadcast %594 : vector<1x128xf32> to vector<4x128xf32>
    %596 = arith.addf %593, %595 : vector<4x128xf32>
    %c0_312 = arith.constant 0 : index
    %c0_313 = arith.constant 0 : index
    %597 = vector.load %arg29[%c0_312, %c0_313] : memref<3x128xf32, #tpu.memory_space<vmem>>, vector<3x128xf32>
    %598 = vector.extract_strided_slice %597 {offsets = [0, 0], sizes = [1, 128], strides = [1, 1]} : vector<3x128xf32> to vector<1x128xf32>
    %599 = vector.broadcast %598 : vector<1x128xf32> to vector<4x128xf32>
    %600 = arith.mulf %599, %596 : vector<4x128xf32>
    %601 = vector.extract_strided_slice %597 {offsets = [1, 0], sizes = [1, 128], strides = [1, 1]} : vector<3x128xf32> to vector<1x128xf32>
    %602 = vector.broadcast %601 : vector<1x128xf32> to vector<4x128xf32>
    %603 = arith.addf %600, %602 : vector<4x128xf32>
    %604 = arith.mulf %603, %596 : vector<4x128xf32>
    %605 = vector.extract_strided_slice %597 {offsets = [2, 0], sizes = [1, 128], strides = [1, 1]} : vector<3x128xf32> to vector<1x128xf32>
    %606 = vector.broadcast %605 : vector<1x128xf32> to vector<4x128xf32>
    %607 = arith.addf %604, %606 : vector<4x128xf32>
    %cst_314 = arith.constant 0.000000e+00 : f32
    %608 = vector.broadcast %cst_314 : f32 to vector<4x128xf32>
    %609 = arith.maximumf %596, %608 : vector<4x128xf32>
    %610 = vector.broadcast %0 : f32 to vector<4x128xf32>
    %611 = arith.mulf %610, %609 : vector<4x128xf32>
    %cst_315 = arith.constant 1.000000e+00 : f32
    %612 = arith.subf %cst_315, %0 : f32
    %613 = vector.broadcast %612 : f32 to vector<4x128xf32>
    %614 = arith.mulf %613, %607 : vector<4x128xf32>
    %615 = arith.addf %611, %614 : vector<4x128xf32>
    %c3_316 = arith.constant 3 : index
    %c0_317 = arith.constant 0 : index
    %616 = vector.load %arg40[%c3_316, %c0_317] : memref<10x128xf32, #tpu.memory_space<vmem>>, vector<4x128xf32>
    tpu.vector_store %arg40[%c3_316, %c0_317], %615 {strides = array<i32>} : memref<10x128xf32, #tpu.memory_space<vmem>>, vector<4x128xf32>,
    %617 = arith.truncf %615 : vector<4x128xf32> to vector<4x128xbf16>
    %c3_318 = arith.constant 3 : index
    %c0_319 = arith.constant 0 : index
    %c0_320 = arith.constant 0 : index
    %618 = vector.load %arg30[%c3_318, %c0_319, %c0_320] : memref<7x128x128xbf16, #tpu.memory_space<vmem>>, vector<1x128x128xbf16>
    %619 = vector.shape_cast %618 : vector<1x128x128xbf16> to vector<128x128xbf16>
    %cst_321 = arith.constant dense<0.000000e+00> : vector<4x128xf32>
    %620 = tpu.matmul %617, %619, %cst_321 {dimension_numbers = #tpu.dot_dimension_numbers<[1], [0], [0], [1], [0, 0, 1, 1], [], []>} : vector<4x128xbf16>, vector<128x128xbf16>, vector<4x128xf32> -> vector<4x128xf32>
    %621 = tpu.iota {dimensions = array<i32: 0>} : vector<4x1xi32>
    %c2_i32_322 = arith.constant 2 : i32
    %c0_i32_323 = arith.constant 0 : i32
    %622 = arith.cmpi eq, %c2_i32_322, %c0_i32_323 : i32
    %c1_i32_324 = arith.constant 1 : i32
    %623 = arith.select %622, %c1_i32_324, %c2_i32_322 : i32
    %624 = vector.broadcast %623 : i32 to vector<4x1xi32>
    %625 = arith.remsi %621, %624 : vector<4x1xi32>
    %c0_i32_325 = arith.constant 0 : i32
    %626 = vector.broadcast %c0_i32_325 : i32 to vector<4x1xi32>
    %627 = arith.cmpi ne, %625, %626 : vector<4x1xi32>
    %c0_i32_326 = arith.constant 0 : i32
    %628 = vector.broadcast %c0_i32_326 : i32 to vector<4x1xi32>
    %629 = arith.cmpi slt, %625, %628 : vector<4x1xi32>
    %c0_i32_327 = arith.constant 0 : i32
    %630 = arith.cmpi slt, %623, %c0_i32_327 : i32
    %631 = vector.broadcast %630 : i1 to vector<4x1xi1>
    %632 = vector.broadcast %631 : vector<4x1xi1> to vector<4x1xi1>
    %633 = arith.xori %629, %632 : vector<4x1xi1>
    %634 = arith.andi %633, %627 : vector<4x1xi1>
    %635 = vector.broadcast %623 : i32 to vector<4x1xi32>
    %636 = arith.addi %625, %635 : vector<4x1xi32>
    %637 = arith.select %634, %636, %625 : vector<4x1xi1>, vector<4x1xi32>
    %c2_328 = arith.constant 2 : index
    %c0_329 = arith.constant 0 : index
    %638 = vector.load %arg40[%c2_328, %c0_329] : memref<10x128xf32, #tpu.memory_space<vmem>>, vector<4x128xf32>
    %639 = arith.truncf %638 : vector<4x128xf32> to vector<4x128xbf16>
    %c2_330 = arith.constant 2 : index
    %c0_331 = arith.constant 0 : index
    %c0_332 = arith.constant 0 : index
    %640 = vector.load %arg30[%c2_330, %c0_331, %c0_332] : memref<7x128x128xbf16, #tpu.memory_space<vmem>>, vector<1x128x128xbf16>
    %641 = vector.shape_cast %640 : vector<1x128x128xbf16> to vector<128x128xbf16>
    %cst_333 = arith.constant dense<0.000000e+00> : vector<4x128xf32>
    %642 = tpu.matmul %639, %641, %cst_333 {dimension_numbers = #tpu.dot_dimension_numbers<[1], [0], [0], [1], [0, 0, 1, 1], [], []>} : vector<4x128xbf16>, vector<128x128xbf16>, vector<4x128xf32> -> vector<4x128xf32>
    %c-1_i32_334 = arith.constant -1 : i32
    %643 = vector.broadcast %c-1_i32_334 : i32 to vector<4x1xi32>
    %644 = arith.addi %637, %643 : vector<4x1xi32>
    %c0_i32_335 = arith.constant 0 : i32
    %645 = vector.broadcast %c0_i32_335 : i32 to vector<4x1xi32>
    %646 = arith.cmpi sge, %644, %645 : vector<4x1xi32>
    %c-1_i32_336 = arith.constant -1 : i32
    %647 = vector.broadcast %c-1_i32_336 : i32 to vector<4x1xi32>
    %648 = arith.addi %637, %647 : vector<4x1xi32>
    %c2_i32_337 = arith.constant 2 : i32
    %649 = vector.broadcast %c2_i32_337 : i32 to vector<4x1xi32>
    %650 = arith.cmpi slt, %648, %649 : vector<4x1xi32>
    %651 = arith.andi %646, %650 : vector<4x1xi1>
    %cst_338 = arith.constant 0.000000e+00 : f32
    %652 = vector.shape_cast %651 : vector<4x1xi1> to vector<4x1xi1>
    %653 = vector.broadcast %652 : vector<4x1xi1> to vector<4x128xi1>
    %654 = vector.broadcast %cst_338 : f32 to vector<4x128xf32>
    %655 = arith.select %653, %642, %654 : vector<4x128xi1>, vector<4x128xf32>
    %656 = arith.addf %620, %655 : vector<4x128xf32>
    %c4_339 = arith.constant 4 : index
    %c0_340 = arith.constant 0 : index
    %657 = vector.load %arg40[%c4_339, %c0_340] : memref<10x128xf32, #tpu.memory_space<vmem>>, vector<4x128xf32>
    %658 = arith.truncf %657 : vector<4x128xf32> to vector<4x128xbf16>
    %c4_341 = arith.constant 4 : index
    %c0_342 = arith.constant 0 : index
    %c0_343 = arith.constant 0 : index
    %659 = vector.load %arg30[%c4_341, %c0_342, %c0_343] : memref<7x128x128xbf16, #tpu.memory_space<vmem>>, vector<1x128x128xbf16>
    %660 = vector.shape_cast %659 : vector<1x128x128xbf16> to vector<128x128xbf16>
    %cst_344 = arith.constant dense<0.000000e+00> : vector<4x128xf32>
    %661 = tpu.matmul %658, %660, %cst_344 {dimension_numbers = #tpu.dot_dimension_numbers<[1], [0], [0], [1], [0, 0, 1, 1], [], []>} : vector<4x128xbf16>, vector<128x128xbf16>, vector<4x128xf32> -> vector<4x128xf32>
    %c1_i32_345 = arith.constant 1 : i32
    %662 = vector.broadcast %c1_i32_345 : i32 to vector<4x1xi32>
    %663 = arith.addi %637, %662 : vector<4x1xi32>
    %c0_i32_346 = arith.constant 0 : i32
    %664 = vector.broadcast %c0_i32_346 : i32 to vector<4x1xi32>
    %665 = arith.cmpi sge, %663, %664 : vector<4x1xi32>
    %c1_i32_347 = arith.constant 1 : i32
    %666 = vector.broadcast %c1_i32_347 : i32 to vector<4x1xi32>
    %667 = arith.addi %637, %666 : vector<4x1xi32>
    %c2_i32_348 = arith.constant 2 : i32
    %668 = vector.broadcast %c2_i32_348 : i32 to vector<4x1xi32>
    %669 = arith.cmpi slt, %667, %668 : vector<4x1xi32>
    %670 = arith.andi %665, %669 : vector<4x1xi1>
    %cst_349 = arith.constant 0.000000e+00 : f32
    %671 = vector.shape_cast %670 : vector<4x1xi1> to vector<4x1xi1>
    %672 = vector.broadcast %671 : vector<4x1xi1> to vector<4x128xi1>
    %673 = vector.broadcast %cst_349 : f32 to vector<4x128xf32>
    %674 = arith.select %672, %661, %673 : vector<4x128xi1>, vector<4x128xf32>
    %675 = arith.addf %656, %674 : vector<4x128xf32>
    %c0_350 = arith.constant 0 : index
    %c0_351 = arith.constant 0 : index
    %676 = vector.load %arg31[%c0_350, %c0_351] : memref<1x128xf32, #tpu.memory_space<vmem>>, vector<1x128xf32>
    %677 = vector.broadcast %676 : vector<1x128xf32> to vector<4x128xf32>
    %678 = arith.addf %675, %677 : vector<4x128xf32>
    %c0_352 = arith.constant 0 : index
    %c0_353 = arith.constant 0 : index
    %679 = vector.load %arg32[%c0_352, %c0_353] : memref<2x4xbf16, #tpu.memory_space<vmem>>, vector<2x4xbf16>
    %680 = arith.truncf %678 : vector<4x128xf32> to vector<4x128xbf16>
    %cst_354 = arith.constant dense<0.000000e+00> : vector<2x128xf32>
    %681 = tpu.matmul %679, %680, %cst_354 {dimension_numbers = #tpu.dot_dimension_numbers<[1], [0], [0], [1], [0, 0, 1, 1], [], []>} : vector<2x4xbf16>, vector<4x128xbf16>, vector<2x128xf32> -> vector<2x128xf32>
    %682 = arith.truncf %681 : vector<2x128xf32> to vector<2x128xbf16>
    %c0_355 = arith.constant 0 : index
    %c0_356 = arith.constant 0 : index
    %683 = vector.load %arg33[%c0_355, %c0_356] : memref<128x128xbf16, #tpu.memory_space<vmem>>, vector<128x128xbf16>
    %cst_357 = arith.constant dense<0.000000e+00> : vector<2x128xf32>
    %684 = tpu.matmul %682, %683, %cst_357 {dimension_numbers = #tpu.dot_dimension_numbers<[1], [0], [0], [1], [0, 0, 1, 1], [], []>} : vector<2x128xbf16>, vector<128x128xbf16>, vector<2x128xf32> -> vector<2x128xf32>
    %c0_358 = arith.constant 0 : index
    %c0_359 = arith.constant 0 : index
    %685 = vector.load %arg34[%c0_358, %c0_359] : memref<1x128xf32, #tpu.memory_space<vmem>>, vector<1x128xf32>
    %686 = vector.broadcast %685 : vector<1x128xf32> to vector<2x128xf32>
    %687 = arith.addf %684, %686 : vector<2x128xf32>
    %c0_360 = arith.constant 0 : index
    %c0_361 = arith.constant 0 : index
    %c0_362 = arith.constant 0 : index
    %688 = vector.load %arg35[%c0_360, %c0_361, %c0_362] : memref<1x2x128xf32, #tpu.memory_space<vmem>>, vector<1x2x128xf32>
    %689 = vector.shape_cast %688 : vector<1x2x128xf32> to vector<2x128xf32>
    %690 = vector.shape_cast %687 : vector<2x128xf32> to vector<1x2x128xf32>
    tpu.vector_store %arg35[%c0_360, %c0_361, %c0_362], %690 {strides = array<i32>} : memref<1x2x128xf32, #tpu.memory_space<vmem>>, vector<1x2x128xf32>,
    return
  }
  func.func @transform_0(%arg0: i32) -> i32 {
    %c0_i32 = arith.constant 0 : i32
    %c0_i32_0 = arith.constant 0 : i32
    return %c0_i32 : i32
  }
  func.func @transform_1(%arg0: i32) -> (i32, i32, i32) {
    %c0_i32 = arith.constant 0 : i32
    %c0_i32_0 = arith.constant 0 : i32
    %c0_i32_1 = arith.constant 0 : i32
    return %arg0, %c0_i32, %c0_i32_0 : i32, i32, i32
  }
  func.func @transform_2(%arg0: i32) -> (i32, i32) {
    %c0_i32 = arith.constant 0 : i32
    %c0_i32_0 = arith.constant 0 : i32
    %c0_i32_1 = arith.constant 0 : i32
    return %c0_i32, %c0_i32_0 : i32, i32
  }
  func.func @transform_3(%arg0: i32) -> (i32, i32) {
    %c0_i32 = arith.constant 0 : i32
    %c0_i32_0 = arith.constant 0 : i32
    %c0_i32_1 = arith.constant 0 : i32
    return %c0_i32, %c0_i32_0 : i32, i32
  }
  func.func @transform_4(%arg0: i32) -> (i32, i32) {
    %c0_i32 = arith.constant 0 : i32
    %c0_i32_0 = arith.constant 0 : i32
    %c0_i32_1 = arith.constant 0 : i32
    return %c0_i32, %c0_i32_0 : i32, i32
  }
  func.func @transform_5(%arg0: i32) -> (i32, i32, i32) {
    %c0_i32 = arith.constant 0 : i32
    %c0_i32_0 = arith.constant 0 : i32
    %c0_i32_1 = arith.constant 0 : i32
    %c0_i32_2 = arith.constant 0 : i32
    return %c0_i32, %c0_i32_0, %c0_i32_1 : i32, i32, i32
  }
  func.func @transform_6(%arg0: i32) -> (i32, i32) {
    %c0_i32 = arith.constant 0 : i32
    %c0_i32_0 = arith.constant 0 : i32
    %c0_i32_1 = arith.constant 0 : i32
    return %c0_i32, %c0_i32_0 : i32, i32
  }
  func.func @transform_7(%arg0: i32) -> (i32, i32) {
    %c0_i32 = arith.constant 0 : i32
    %c0_i32_0 = arith.constant 0 : i32
    %c0_i32_1 = arith.constant 0 : i32
    return %c0_i32, %c0_i32_0 : i32, i32
  }
  func.func @transform_8(%arg0: i32) -> (i32, i32) {
    %c0_i32 = arith.constant 0 : i32
    %c0_i32_0 = arith.constant 0 : i32
    %c0_i32_1 = arith.constant 0 : i32
    return %c0_i32, %c0_i32_0 : i32, i32
  }
  func.func @transform_9(%arg0: i32) -> (i32, i32) {
    %c0_i32 = arith.constant 0 : i32
    %c0_i32_0 = arith.constant 0 : i32
    %c0_i32_1 = arith.constant 0 : i32
    return %c0_i32, %c0_i32_0 : i32, i32
  }
  func.func @transform_10(%arg0: i32) -> (i32, i32) {
    %c0_i32 = arith.constant 0 : i32
    %c0_i32_0 = arith.constant 0 : i32
    %c0_i32_1 = arith.constant 0 : i32
    return %c0_i32, %c0_i32_0 : i32, i32
  }
  func.func @transform_11(%arg0: i32) -> (i32, i32, i32) {
    %c0_i32 = arith.constant 0 : i32
    %c0_i32_0 = arith.constant 0 : i32
    %c0_i32_1 = arith.constant 0 : i32
    %c0_i32_2 = arith.constant 0 : i32
    return %c0_i32, %c0_i32_0, %c0_i32_1 : i32, i32, i32
  }
  func.func @transform_12(%arg0: i32) -> (i32, i32) {
    %c0_i32 = arith.constant 0 : i32
    %c0_i32_0 = arith.constant 0 : i32
    %c0_i32_1 = arith.constant 0 : i32
    return %c0_i32, %c0_i32_0 : i32, i32
  }
  func.func @transform_13(%arg0: i32) -> (i32, i32) {
    %c0_i32 = arith.constant 0 : i32
    %c0_i32_0 = arith.constant 0 : i32
    %c0_i32_1 = arith.constant 0 : i32
    return %c0_i32, %c0_i32_0 : i32, i32
  }
  func.func @transform_14(%arg0: i32) -> (i32, i32) {
    %c0_i32 = arith.constant 0 : i32
    %c0_i32_0 = arith.constant 0 : i32
    %c0_i32_1 = arith.constant 0 : i32
    return %c0_i32, %c0_i32_0 : i32, i32
  }
  func.func @transform_15(%arg0: i32) -> (i32, i32) {
    %c0_i32 = arith.constant 0 : i32
    %c0_i32_0 = arith.constant 0 : i32
    %c0_i32_1 = arith.constant 0 : i32
    return %c0_i32, %c0_i32_0 : i32, i32
  }
  func.func @transform_16(%arg0: i32) -> (i32, i32) {
    %c0_i32 = arith.constant 0 : i32
    %c0_i32_0 = arith.constant 0 : i32
    %c0_i32_1 = arith.constant 0 : i32
    return %c0_i32, %c0_i32_0 : i32, i32
  }
  func.func @transform_17(%arg0: i32) -> (i32, i32, i32) {
    %c0_i32 = arith.constant 0 : i32
    %c0_i32_0 = arith.constant 0 : i32
    %c0_i32_1 = arith.constant 0 : i32
    %c0_i32_2 = arith.constant 0 : i32
    return %c0_i32, %c0_i32_0, %c0_i32_1 : i32, i32, i32
  }
  func.func @transform_18(%arg0: i32) -> (i32, i32) {
    %c0_i32 = arith.constant 0 : i32
    %c0_i32_0 = arith.constant 0 : i32
    %c0_i32_1 = arith.constant 0 : i32
    return %c0_i32, %c0_i32_0 : i32, i32
  }
  func.func @transform_19(%arg0: i32) -> (i32, i32) {
    %c0_i32 = arith.constant 0 : i32
    %c0_i32_0 = arith.constant 0 : i32
    %c0_i32_1 = arith.constant 0 : i32
    return %c0_i32, %c0_i32_0 : i32, i32
  }
  func.func @transform_20(%arg0: i32) -> (i32, i32) {
    %c0_i32 = arith.constant 0 : i32
    %c0_i32_0 = arith.constant 0 : i32
    %c0_i32_1 = arith.constant 0 : i32
    return %c0_i32, %c0_i32_0 : i32, i32
  }
  func.func @transform_21(%arg0: i32) -> (i32, i32) {
    %c0_i32 = arith.constant 0 : i32
    %c0_i32_0 = arith.constant 0 : i32
    %c0_i32_1 = arith.constant 0 : i32
    return %c0_i32, %c0_i32_0 : i32, i32
  }
  func.func @transform_22(%arg0: i32) -> (i32, i32) {
    %c0_i32 = arith.constant 0 : i32
    %c0_i32_0 = arith.constant 0 : i32
    %c0_i32_1 = arith.constant 0 : i32
    return %c0_i32, %c0_i32_0 : i32, i32
  }
  func.func @transform_23(%arg0: i32) -> (i32, i32, i32) {
    %c0_i32 = arith.constant 0 : i32
    %c0_i32_0 = arith.constant 0 : i32
    %c0_i32_1 = arith.constant 0 : i32
    %c0_i32_2 = arith.constant 0 : i32
    return %c0_i32, %c0_i32_0, %c0_i32_1 : i32, i32, i32
  }
  func.func @transform_24(%arg0: i32) -> (i32, i32) {
    %c0_i32 = arith.constant 0 : i32
    %c0_i32_0 = arith.constant 0 : i32
    %c0_i32_1 = arith.constant 0 : i32
    return %c0_i32, %c0_i32_0 : i32, i32
  }
  func.func @transform_25(%arg0: i32) -> (i32, i32) {
    %c0_i32 = arith.constant 0 : i32
    %c0_i32_0 = arith.constant 0 : i32
    %c0_i32_1 = arith.constant 0 : i32
    return %c0_i32, %c0_i32_0 : i32, i32
  }
  func.func @transform_26(%arg0: i32) -> (i32, i32) {
    %c0_i32 = arith.constant 0 : i32
    %c0_i32_0 = arith.constant 0 : i32
    %c0_i32_1 = arith.constant 0 : i32
    return %c0_i32, %c0_i32_0 : i32, i32
  }
  func.func @transform_27(%arg0: i32) -> (i32, i32) {
    %c0_i32 = arith.constant 0 : i32
    %c0_i32_0 = arith.constant 0 : i32
    %c0_i32_1 = arith.constant 0 : i32
    return %c0_i32, %c0_i32_0 : i32, i32
  }
  func.func @transform_28(%arg0: i32) -> (i32, i32) {
    %c0_i32 = arith.constant 0 : i32
    %c0_i32_0 = arith.constant 0 : i32
    %c0_i32_1 = arith.constant 0 : i32
    return %c0_i32, %c0_i32_0 : i32, i32
  }
  func.func @transform_29(%arg0: i32) -> (i32, i32, i32) {
    %c0_i32 = arith.constant 0 : i32
    %c0_i32_0 = arith.constant 0 : i32
    %c0_i32_1 = arith.constant 0 : i32
    %c0_i32_2 = arith.constant 0 : i32
    return %c0_i32, %c0_i32_0, %c0_i32_1 : i32, i32, i32
  }
  func.func @transform_30(%arg0: i32) -> (i32, i32) {
    %c0_i32 = arith.constant 0 : i32
    %c0_i32_0 = arith.constant 0 : i32
    %c0_i32_1 = arith.constant 0 : i32
    return %c0_i32, %c0_i32_0 : i32, i32
  }
  func.func @transform_31(%arg0: i32) -> (i32, i32) {
    %c0_i32 = arith.constant 0 : i32
    %c0_i32_0 = arith.constant 0 : i32
    %c0_i32_1 = arith.constant 0 : i32
    return %c0_i32, %c0_i32_0 : i32, i32
  }
  func.func @transform_32(%arg0: i32) -> (i32, i32) {
    %c0_i32 = arith.constant 0 : i32
    %c0_i32_0 = arith.constant 0 : i32
    %c0_i32_1 = arith.constant 0 : i32
    return %c0_i32, %c0_i32_0 : i32, i32
  }
  func.func @transform_33(%arg0: i32) -> (i32, i32) {
    %c0_i32 = arith.constant 0 : i32
    %c0_i32_0 = arith.constant 0 : i32
    %c0_i32_1 = arith.constant 0 : i32
    return %c0_i32, %c0_i32_0 : i32, i32
  }
  func.func @transform_34(%arg0: i32) -> (i32, i32, i32) {
    %c0_i32 = arith.constant 0 : i32
    %c0_i32_0 = arith.constant 0 : i32
    %c0_i32_1 = arith.constant 0 : i32
    return %arg0, %c0_i32, %c0_i32_0 : i32, i32, i32
  }
}

</mosaic_0001>

<bundles_post_ra>
// kernel: vanillanet_forward.1
= control target key start
LH: loop header
LB: loop body
LE: loop exit
PB: predicated region body
PF: predicated region fallthrough
CT: control target
= control target key end

     0   :  { %s8173_s6 = smov 1   ;;  %s8174_s10 = smov 2   ;;  %s9147_s0 = inlined_call_operand.smem [shape: u32[35], index: -1, kind: input, shape index: {}] }
   0x1   :  { %s8217_s5 = sld [smem:[%s9147_s0]]   ;;  %s8175_s14 = smov 3  }
   0x2   :  { %s8222_s9 = sld [smem:[%s9147_s0 + %s8173_s6]]   ;;  %s8176_s18 = smov 4  }
   0x3   :  { %s8227_s13 = sld [smem:[%s9147_s0 + %s8174_s10]]   ;;  %s8177_s22 = smov 5  }
   0x4   :  { %s8232_s17 = sld [smem:[%s9147_s0 + %s8175_s14]]   ;;  %s8178_s26 = smov 6  }
   0x5   :  { %s8237_s21 = sld [smem:[%s9147_s0 + %s8176_s18]]   ;;  %s8179_s30 = smov 7  }
   0x6   :  { %s8242_s25 = sld [smem:[%s9147_s0 + %s8177_s22]]   ;;  %s8180_s4 = smov 8  }
   0x7   :  { %s8247_s29 = sld [smem:[%s9147_s0 + %s8178_s26]]   ;;  %s8181_s10 = smov 9  }
   0x8   :  { %9158 = sst [smem:[#allocation11_spill]] %s8222_s9  ;;  %s8182_s15 = smov 10  }
   0x9   :  { %9159 = sst [smem:[#allocation12_spill]] %s8227_s13  ;;  %s8183_s20 = smov 11  }
   0xa   :  { %s8252_s3 = sld [smem:[%s9147_s0 + %s8179_s30]]   ;;  %s8184_s26 = smov 12  }
   0xb   :  { %s8257_s8 = sld [smem:[%s9147_s0 + %s8180_s4]]   ;;  %s8185_s1 = smov 13  }
   0xc   :  { %s8262_s14 = sld [smem:[%s9147_s0 + %s8181_s10]]   ;;  %s8186_s7 = smov 14  }
   0xd   :  { %s8267_s19 = sld [smem:[%s9147_s0 + %s8182_s15]]   ;;  %s8187_s15 = smov 15  }
   0xe   :  { %s8272_s24 = sld [smem:[%s9147_s0 + %s8183_s20]]   ;;  %s8188_s22 = smov 16  }
   0xf   :  { %s8277_s30 = sld [smem:[%s9147_s0 + %s8184_s26]]   ;;  %s8189_s28 = smov 17  }
  0x10   :  { %9160 = sst [smem:[#allocation13_spill]] %s8252_s3 }
  0x11   :  { %9161 = sst [smem:[#allocation14_spill]] %s8257_s8 }
  0x12   :  { %9162 = sst [smem:[#allocation15_spill]] %s8262_s14 }
  0x13   :  { %s8282_s6 = sld [smem:[%s9147_s0 + %s8185_s1]]  }
  0x14   :  { %s8287_s12 = sld [smem:[%s9147_s0 + %s8186_s7]]   ;;  %s8190_s7 = smov 18  }
  0x15   :  { %s8292_s20 = sld [smem:[%s9147_s0 + %s8187_s15]]   ;;  %s8191_s15 = smov 19  }
  0x16   :  { %s8297_s27 = sld [smem:[%s9147_s0 + %s8188_s22]]   ;;  %s8192_s22 = smov 20  }
  0x17   :  { %s8302_s4 = sld [smem:[%s9147_s0 + %s8189_s28]]   ;;  %s8193_s28 = smov 21  }
  0x18   :  { %74 = sst [smem:[#allocation7]] %s8217_s5 }
  0x19   :  { %9163 = sst [smem:[#allocation16_spill]] %s8282_s6 }
  0x1a   :  { %9164 = sst [smem:[#allocation17_spill]] %s8287_s12 }
  0x1b   :  { %9165 = sst [smem:[#allocation18_spill]] %s8292_s20 }
  0x1c   :  { %9166 = sst [smem:[#allocation19_spill]] %s8297_s27 }
  0x1d   :  { %9167 = sst [smem:[#allocation20_spill]] %s8302_s4 }
  0x1e   :  { %s8307_s6 = sld [smem:[%s9147_s0 + %s8190_s7]]   ;;  %s8194_s7 = smov 22  }
  0x1f   :  { %s8312_s20 = sld [smem:[%s9147_s0 + %s8191_s15]]   ;;  %s8195_s15 = smov 23  }
  0x20   :  { %s8317_s27 = sld [smem:[%s9147_s0 + %s8192_s22]]   ;;  %s8196_s22 = smov 24  }
  0x21   :  { %s8322_s4 = sld [smem:[%s9147_s0 + %s8193_s28]]   ;;  %s8197_s28 = smov 26  }
  0x24   :  { %9168 = sst [smem:[#allocation21_spill]] %s8307_s6 }
  0x25   :  { %9169 = sst [smem:[#allocation22_spill]] %s8312_s20 }
  0x26   :  { %9170 = sst [smem:[#allocation23_spill]] %s8317_s27 }
  0x27   :  { %9171 = sst [smem:[#allocation24_spill]] %s8322_s4 }
  0x28   :  { %s8327_s6 = sld [smem:[%s9147_s0 + %s8194_s7]]   ;;  %s8198_s7 = smov 27  }
  0x29   :  { %s8332_s20 = sld [smem:[%s9147_s0 + %s8195_s15]]   ;;  %s8199_s15 = smov 28  }
  0x2a   :  { %s8337_s27 = sld [smem:[%s9147_s0 + %s8196_s22]]   ;;  %s8200_s22 = smov 29  }
  0x2b   :  { %s8342_s4 = sld [smem:[%s9147_s0 + %s8197_s28]]   ;;  %s8201_s28 = smov 30  }
  0x2c   :  { %s8347_s16 = sld [smem:[%s9147_s0 + %s8198_s7]]   ;;  %s8202_s7 = smov 31  }
  0x2d   :  { %s8352_s23 = sld [smem:[%s9147_s0 + %s8199_s15]]  }
  0x2e   :  { %9172 = sst [smem:[#allocation25_spill]] %s8327_s6  ;;  %s8203_s6 = smov 32  }
  0x2f   :  { %9173 = sst [smem:[#allocation26_spill]] %s8332_s20 }
  0x30   :  { %9174 = sst [smem:[#allocation27_spill]] %s8337_s27  ;;  %s8204_s27 = smov 33  }
  0x31   :  { %9175 = sst [smem:[#allocation28_spill]] %s8342_s4  ;;  %s8205_s4 = smov 34  }
  0x32   :  { %9176 = sst [smem:[#allocation29_spill]] %s8347_s16 }
  0x33   :  { %9177 = sst [smem:[#allocation30_spill]] %s8352_s23 }
  0x34   :  { %s8357_s1 = sld [smem:[%s9147_s0 + %s8200_s22]]  }
  0x35   :  { %s8362_s10 = sld [smem:[%s9147_s0 + %s8201_s28]]  }
  0x36   :  { %s8367_s20 = sld [smem:[%s9147_s0 + %s8202_s7]]  }
  0x37   :  { %s8372_s23 = sld [smem:[%s9147_s0 + %s8203_s6]]  }
  0x3a   :  { %9178 = sst [smem:[#allocation31_spill]] %s8357_s1 }
  0x3b   :  { %9179 = sst [smem:[#allocation32_spill]] %s8362_s10 }
  0x3c   :  { %s8377_s1 = sld [smem:[%s9147_s0 + %s8204_s27]]  }
  0x3d   :  { %s8382_s10 = sld [smem:[%s9147_s0 + %s8205_s4]]  }
  0x42   :  { %9180 = sst [smem:[#allocation33_spill]] %s8377_s1 }
  0x43   :  { %75 = vsyncpa [#allocation9], 0 }
  0x44   :  { %77 = vsyncpa [#allocation9 + $0x1], 0  ;;  %s8385_s16 = smov 0   ;;  %s8387_s7 = smov 0  }
  0x45   :  { %s8389_s11 = smov 0   ;;  %s8391_s6 = smov 0  }
  0x46 LB: > { %s9181_s13 = sld [smem:[#allocation12_spill]]  ;;  %s9182_s12 = sld [smem:[#allocation17_spill]]  ;;  %s8167_s11 = sphi %s8389_s11, %s9208_s11   ;;  %s8163_s7 = sphi %s8387_s7, %s9207_s7   ;;  %s8159_s16 = sphi %s8385_s16, %s9206_s16   ;;  %s8171_s6 = sphi %s8391_s6, %s9209_s6  }
  0x47   : > { %s9183_s8 = sld [smem:[#allocation14_spill]]  ;;  %s8406_s0 = sadd.s32 4294967295, %s8171_s6  }
  0x48   : > { %s6031_s5 = sadd.s32 4294967294, %s8171_s6   ;;  %s8410_s15 = sadd.s32 1, %s8171_s6  }
  0x49   : > { %s809_s18 = sadd.s32 1, %s8167_s11  ;;  %s806_s27 = ssub.s32 %s8171_s6, %s8410_s15 }
  0x4a   : > { %p819_p0 = scmp.ne.s32.totalorder %s8167_s11, %s8163_s7  ;;  %p807_p1 = scmp.eq.s32.totalorder %s806_s27, 0 }
  0x4b   : > { %p820_p2 = scmp.eq.s32.totalorder %s8406_s0, 1  ;;  %p825_p3 = scmp.ne.s32.totalorder %s8163_s7, %s8159_s16 }
  0x4c   : > { %p826_p4 = scmp.eq.s32.totalorder %s6031_s5, 1  ;;  %p6034_p7 = scmp.ge.s32.totalorder %s8171_s6, 1 }
  0x4d   : > { %s8421_s22 = scalar_select %p807_p1, %s8167_s11, %s809_s18  }
  0x4e   : > { %p8423_p5 = por %p820_p2, %p819_p0  ;;  %p8427_p6 = por %p826_p4, %p825_p3 }
  0x4f   : > { %p951_p8 = scmp.lt.s32.totalorder %s8171_s6, 3 }
  0x51   : > { %p952_p9 = pnand %p6034_p7, %p951_p8 }
  0x52   : > { %v7802_v0 = vld [vmem:[%s9181_s13 + $0x40] sm:$0xff] (!%p952_p9)   ;;  %v7806_v4 = vld [vmem:[%s9181_s13 + $0x48] sm:$0xff] (!%p952_p9)   ;;  %v7810_v8 = vld [vmem:[%s9181_s13 + $0x50] sm:$0xff] (!%p952_p9)   ;;  %p1037_p10 = scmp.lt.s32.totalorder (!%p952_p9), %s8406_s0, 1  ;;  %s9186_s9 = sld [smem:[#allocation11_spill]] (!%p952_p9)  ;;  %vm8207_vm0 = vmmov (!%p952_p9), 0  }
  0x53   : > { %955 = sbr.rel (%p952_p9) target bundleno = 3883 (0xf2b), region = 156  ;;  %v7803_v1 = vld [vmem:[%s9181_s13] sm:$0xff] (!%p952_p9)   ;;  %6721 = vmatprep.subr.bf16.mxu0 (!%p952_p9), %v7802_v0  ;;  %v7807_v5 = vld [vmem:[%s9181_s13 + $0x8] sm:$0xff] (!%p952_p9)   ;;  %v7811_v9 = vld [vmem:[%s9181_s13 + $0x10] sm:$0xff] (!%p952_p9)   ;;  %s1043_s18 = sld [smem:[#allocation7]] (!%p952_p9)  ;;  %vm2802_vm13 = vcmask (!%p952_p9), 261120  }
  0x54   : > { %v7804_v2 = vld [vmem:[%s9181_s13 + $0xc0] sm:$0xff] (!%p952_p9)   ;;  %6722 = vmatpush3.bf16.msra.mxu0 (!%p952_p9), %v7803_v1  ;;  %v7808_v6 = vld [vmem:[%s9181_s13 + $0xc8] sm:$0xff] (!%p952_p9)   ;;  %v7812_v10 = vld [vmem:[%s9181_s13 + $0xd0] sm:$0xff] (!%p952_p9)   ;;  %s9187_s3 = sld [smem:[#allocation13_spill]] (!%p952_p9)  ;;  %s9188_s14 = sld [smem:[#allocation15_spill]] (!%p952_p9) }
  0x55   : > { %v7805_v3 = vld [vmem:[%s9181_s13 + $0x80] sm:$0xff] (!%p952_p9)   ;;  %6749 = vmatprep.subr.bf16.mxu1 (!%p952_p9), %v7804_v2  ;;  %6723 = vmatprep.subr.bf16.mxu0 (!%p952_p9), %v7806_v4  ;;  %v7809_v7 = vld [vmem:[%s9181_s13 + $0x88] sm:$0xff] (!%p952_p9)   ;;  %v7813_v11 = vld [vmem:[%s9181_s13 + $0x90] sm:$0xff] (!%p952_p9)   ;;  %s9205_s1 = sld [smem:[#allocation33_spill]] (!%p952_p9) }
  0x56   : > { %6750 = vmatpush3.bf16.msra.mxu1 (!%p952_p9), %v7805_v3  ;;  %v7814_v12 = vld [vmem:[%s9181_s13 + $0x58] sm:$0xff] (!%p952_p9)   ;;  %v7818_v16 = vld [vmem:[%s9181_s13 + $0x60] sm:$0xff] (!%p952_p9)   ;;  %v7822_v20 = vld [vmem:[%s9181_s13 + $0x68] sm:$0xff] (!%p952_p9)  }
  0x57   : > { %6751 = vmatprep.subr.bf16.mxu1 (!%p952_p9), %v7808_v6  ;;  %v7815_v13 = vld [vmem:[%s9181_s13 + $0x18] sm:$0xff] (!%p952_p9)   ;;  %v7819_v17 = vld [vmem:[%s9181_s13 + $0x20] sm:$0xff] (!%p952_p9)   ;;  %v7823_v21 = vld [vmem:[%s9181_s13 + $0x28] sm:$0xff] (!%p952_p9)  }
  0x58   : > { %6724 = vmatpush3.bf16.msra.mxu0 (!%p952_p9), %v7807_v5  ;;  %v7816_v14 = vld [vmem:[%s9181_s13 + $0xd8] sm:$0xff] (!%p952_p9)   ;;  %v7820_v18 = vld [vmem:[%s9181_s13 + $0xe0] sm:$0xff] (!%p952_p9)   ;;  %v7824_v22 = vld [vmem:[%s9181_s13 + $0xe8] sm:$0xff] (!%p952_p9)  }
  0x59   : > { %6725 = vmatprep.subr.bf16.mxu0 (!%p952_p9), %v7810_v8  ;;  %v7817_v15 = vld [vmem:[%s9181_s13 + $0x98] sm:$0xff] (!%p952_p9)   ;;  %v7821_v19 = vld [vmem:[%s9181_s13 + $0xa0] sm:$0xff] (!%p952_p9)   ;;  %v7825_v23 = vld [vmem:[%s9181_s13 + $0xa8] sm:$0xff] (!%p952_p9)   ;;  %s1692_s27 = ssub.f32 (!%p952_p9), 1.0, %s1043_s18 }
  0x5a   : > { %6752 = vmatpush3.bf16.msra.mxu1 %v7809_v7  ;;  %s1038_s28 = scalar_select %p1037_p10, %s8406_s0, 1  ;;  %v7826_v24 = vld [vmem:[%s9181_s13 + $0x70] sm:$0xff]   ;;  %v7830_v28 = vld [vmem:[%s9181_s13 + $0x78] sm:$0xff]   ;;  %v7837_v34 = vld [vmem:[%s9181_s13 + $0x140] sm:$0xff]  }
  0x5b   : > { %6753 = vmatprep.subr.bf16.mxu1 %v7812_v10  ;;  %v7827_v25 = vld [vmem:[%s9181_s13 + $0x30] sm:$0xff]   ;;  %v7831_v29 = vld [vmem:[%s9181_s13 + $0x38] sm:$0xff]   ;;  %v7841_v37 = vld [vmem:[%s9181_s13 + $0x100] sm:$0xff]  }
  0x5c   : > { %6726 = vmatpush3.bf16.msra.mxu0 %v7811_v9  ;;  %s7727_s2 = smul.u32 96, %s1038_s28  ;;  %v7828_v26 = vld [vmem:[%s9181_s13 + $0xf0] sm:$0xff]   ;;  %v7832_v30 = vld [vmem:[%s9181_s13 + $0xf8] sm:$0xff]   ;;  %v7842_v38 = vld [vmem:[%s9181_s13 + $0x148] sm:$0xff]   ;;  %s9189_s28 = sld [smem:[#allocation16_spill]] }
  0x5d   : > { %6727 = vmatprep.subr.bf16.mxu0 %v7814_v12  ;;  %v7829_v27 = vld [vmem:[%s9181_s13 + $0xb0] sm:$0xff]   ;;  %v7836_v33 = vld [vmem:[%s9181_s13 + $0xb8] sm:$0xff]   ;;  %v7843_v39 = vld [vmem:[%s9181_s13 + $0x108] sm:$0xff]  }
  0x5e   : > { %6754 = vmatpush3.bf16.msra.mxu1 %v7813_v11  ;;  %s8465_s5 = scalar_lea.vmem %s9186_s9, %s7727_s2  ;;  %v7844_v40 = vld [vmem:[%s9181_s13 + $0x150] sm:$0xff]   ;;  %v7846_v42 = vld [vmem:[%s9181_s13 + $0x158] sm:$0xff]   ;;  %v7848_v46 = vld [vmem:[%s9181_s13 + $0x160] sm:$0xff]   ;;  %s9190_s2 = sld [smem:[#allocation20_spill]] }
  0x5f   : > { %6755 = vmatprep.subr.bf16.mxu1 %v7816_v14  ;;  %v7833_v31 = vld [vmem:[%s8465_s5] ss:$24 sps:$4 sm:$0xff]   ;;  %v7835_v32 = vld [vmem:[%s8465_s5 + $0x4] ss:$24 sps:$4 sm:$0xff]   ;;  %v7845_v41 = vld [vmem:[%s9181_s13 + $0x110] sm:$0xff]  }
  0x60   : > { %6728 = vmatpush3.bf16.msra.mxu0 %v7815_v13  ;;  %1539 = vmatprep.mubr.bf16.mxu0 %v7835_v32  ;;  %v7838_v35 = vld [vmem:[%s8465_s5 + $0x8] ss:$24 sps:$4 sm:$0xff]   ;;  %v7840_v36 = vld [vmem:[%s8465_s5 + $0xc] ss:$24 sps:$4 sm:$0xff]   ;;  %v7847_v44 = vld [vmem:[%s9181_s13 + $0x118] sm:$0xff]  }
  0x61   : > { %6729 = vmatprep.subr.bf16.mxu0 %v7818_v16  ;;  %1588 = vmatprep.mubr.bf16.mxu1 %v7840_v36  ;;  %v7850_v43 = vld [vmem:[%s8465_s5 + $0x34] ss:$24 sps:$4 sm:$0xff]   ;;  %v7853_v45 = vld [vmem:[%s8465_s5 + $0x30] ss:$24 sps:$4 sm:$0xff]   ;;  %v7849_v49 = vld [vmem:[%s9181_s13 + $0x120] sm:$0xff]  }
  0x62   : > { %6756 = vmatpush3.bf16.msra.mxu1 %v7817_v15  ;;  %v7855_v47 = vld [vmem:[%s8465_s5 + $0x3c] ss:$24 sps:$4 sm:$0xff]   ;;  %v7857_v48 = vld [vmem:[%s8465_s5 + $0x38] ss:$24 sps:$4 sm:$0xff]   ;;  %v7852_v50 = vld [vmem:[%s9181_s13 + $0x168] sm:$0xff]  }
  0x63   : > { %6757 = vmatprep.subr.bf16.mxu1 %v7820_v18  ;;  %v7854_v51 = vld [vmem:[%s9181_s13 + $0x128] sm:$0xff]   ;;  %v7858_v53 = vld [vmem:[%s9181_s13 + $0x170] sm:$0xff]   ;;  %v7860_v55 = vld [vmem:[%s9181_s13 + $0x178] sm:$0xff]  }
  0x64   : > { %6730 = vmatpush3.bf16.msra.mxu0 %v7819_v17  ;;  %v7864_v52 = vld [vmem:[%s8465_s5 + $0x14] ss:$24 sps:$4 sm:$0xff]   ;;  %v7861_v56 = vld [vmem:[%s9181_s13 + $0x138] sm:$0xff]   ;;  %v7862_v57 = vld [vmem:[%s8465_s5 + $0x10] ss:$24 sps:$4 sm:$0xff]  }
  0x65   : > { %6731 = vmatprep.subr.bf16.mxu0 %v7822_v20  ;;  %v7859_v54 = vld [vmem:[%s9181_s13 + $0x130] sm:$0xff]   ;;  %v7865_v58 = vld [vmem:[%s8465_s5 + $0x44] ss:$24 sps:$4 sm:$0xff]   ;;  %v7867_v59 = vld [vmem:[%s8465_s5 + $0x40] ss:$24 sps:$4 sm:$0xff]   ;;  %s9191_s5 = sld [smem:[#allocation19_spill]] }
  0x66   : > { %6758 = vmatpush3.bf16.msra.mxu1 %v7821_v19  ;;  %v7868_v60 = vld [vmem:[%s8242_s25 + $0xc0] sm:$0xff]   ;;  %v7869_v61 = vld [vmem:[%s8242_s25 + $0xc8] sm:$0xff]   ;;  %v7871_v63 = vld [vmem:[%s8242_s25 + $0xd0] sm:$0xff]  }
  0x67   : > { %6759 = vmatprep.subr.bf16.mxu1 %v7824_v22  ;;  %v7870_v62 = vld [vmem:[%s8242_s25] sm:$0xff]   ;;  %v7872_v0 = vld [vmem:[%s8242_s25 + $0x8] sm:$0xff]   ;;  %v7873_v1 = vld [vmem:[%s8242_s25 + $0xd8] sm:$0xff]  }
  0x68   : > { %6732 = vmatpush3.bf16.msra.mxu0 %v7823_v21  ;;  %v7874_v2 = vld [vmem:[%s8242_s25 + $0x10] sm:$0xff]   ;;  %v7875_v3 = vld [vmem:[%s8242_s25 + $0xe0] sm:$0xff]   ;;  %v7876_v4 = vld [vmem:[%s8242_s25 + $0x18] sm:$0xff]  }
  0x69   : > { %6733 = vmatprep.subr.bf16.mxu0 %v7826_v24  ;;  %v7877_v5 = vld [vmem:[%s8242_s25 + $0xe8] sm:$0xff]   ;;  %v7878_v6 = vld [vmem:[%s8242_s25 + $0x20] sm:$0xff]   ;;  %v7879_v7 = vld [vmem:[%s8242_s25 + $0xf0] sm:$0xff]  }
  0x6a   : > { %6760 = vmatpush3.bf16.msra.mxu1 %v7825_v23  ;;  %v7880_v8 = vld [vmem:[%s8242_s25 + $0x28] sm:$0xff]   ;;  %v7881_v9 = vld [vmem:[%s8242_s25 + $0xf8] sm:$0xff]   ;;  %v7882_v10 = vld [vmem:[%s8242_s25 + $0x30] sm:$0xff]  }
  0x6b   : > { %6761 = vmatprep.subr.bf16.mxu1 %v7828_v26  ;;  %v8514_v11 = vld [vmem:[%s8242_s25 + $0x80] sm:$0xff]   ;;  %v7884_v12 = vld [vmem:[%s8242_s25 + $0x38] sm:$0xff]  }
  0x6c   : > { %6734 = vmatpush3.bf16.msra.mxu0 %v7827_v25  ;;  %v8519_v13 = vld [vmem:[%s8242_s25 + $0x40] sm:$0xff]  }
  0x6d   : > { %6735 = vmatprep.subr.bf16.mxu0 %v7830_v28  ;;  %v6037_v15 = vld [vmem:[%s8232_s17] ss:$0 sm:$0xff] }
  0x6e   : > { %6762 = vmatpush3.bf16.msra.mxu1 %v7829_v27 }
  0x6f   : > { %6763 = vmatprep.subr.bf16.mxu1 %v7832_v30 }
  0x70   : > { %6736 = vmatpush3.bf16.msra.mxu0 %v7831_v29 }
  0x71   : > { %6777 = vmatprep.subr.bf16.mxu0 %v7837_v34 }
  0x72   : > { %6764 = vmatpush3.bf16.msra.mxu1 %v7836_v33 }
  0x73   : > { %1540 = vmatmul.mubr.bf16.vlgmr.msra.gmra.mrb[0].mxu0 %v7833_v31  ;;  %7093 = vmatprep.subr.bf16.mxu1 %v7870_v62 }
  0x74   : > { %6778 = vmatpush3.bf16.msra.mxu0 %v7841_v37  ;;  %1547 = vmatprep.mubr.bf16.mxu0 %v7850_v43 }
  0x75   : > { %1589 = vmatmul.mubr.bf16.vlgmr.msra.gmra.mrb[0].mxu1 %v7838_v35  ;;  %6779 = vmatprep.subr.bf16.mxu0 %v7842_v38 }
  0x76   : > { %1596 = vmatprep.mubr.bf16.mxu1 %v7855_v47  ;;  %7094 = vmatpush3.bf16.msra.mxu1 %v7870_v62  ;;  %v1655_v47 = vlaneseq }
  0x77   : > { %7095 = vmatprep.subr.bf16.mxu1 %v7872_v0 }
  0x78   : > { %6780 = vmatpush3.bf16.msra.mxu0 %v7843_v39 }
  0x79   : > { %6781 = vmatprep.subr.bf16.mxu0 %v7844_v40 }
  0x7a   : > { %7096 = vmatpush3.bf16.msra.mxu1 %v7872_v0 }
  0x7b   : > { %1548 = vmatmul.mubr.bf16.gmra.mrb[4].mxu0 %v7853_v45  ;;  %7097 = vmatprep.subr.bf16.mxu1 %v7874_v2 }
  0x7c   : > { %6782 = vmatpush3.bf16.msra.mxu0 %v7845_v41  ;;  %1637 = vmatprep.mubr.bf16.mxu0 %v7864_v52 }
  0x7d   : > { %6783 = vmatprep.subr.bf16.mxu0 %v7846_v42  ;;  %1597 = vmatmul.mubr.bf16.gmra.mrb[4].mxu1 %v7857_v48  ;;  %v8523_v48 = vshrl.u32 %v1655_v47, 7 }
  0x7e   : > { %7098 = vmatpush3.bf16.msra.mxu1 %v7874_v2 }
  0x7f   : > { %7099 = vmatprep.subr.bf16.mxu1 %v7876_v4  ;;  %v8530_v52 = vsub.s32 1, %v8523_v48 }
  0x80   : > { %6784 = vmatpush3.bf16.msra.mxu0 %v7847_v44 }
  0x81   : > { %6785 = vmatprep.subr.bf16.mxu0 %v7848_v46 }
  0x82   : > { %7100 = vmatpush3.bf16.msra.mxu1 %v7876_v4 }
  0x83   : > { %7101 = vmatprep.subr.bf16.mxu1 %v7878_v6 }
  0x84   : > { %6786 = vmatpush3.bf16.msra.mxu0 %v7849_v49  ;;  %v8526_v49 = vsub.s32 0, %v8523_v48 }
  0x85   : > { %6787 = vmatprep.subr.bf16.mxu0 %v7852_v50  ;;  %v1654_v50 = vld [vmem:[%s8237_s21] sm:$0x7] }
  0x86   : > { %7102 = vmatpush3.bf16.msra.mxu1 %v7878_v6 }
  0x87   : > { %7103 = vmatprep.subr.bf16.mxu1 %v7880_v8 }
  0x88   : > { %6788 = vmatpush3.bf16.msra.mxu0 %v7854_v51 }
  0x89   : > { %6789 = vmatprep.subr.bf16.mxu0 %v7858_v53 }
  0x8a   : > { %7104 = vmatpush3.bf16.msra.mxu1 %v7880_v8 }
  0x8b   : > { %7105 = vmatprep.subr.bf16.mxu1 %v7882_v10 }
  0x8c   : > { %6790 = vmatpush3.bf16.msra.mxu0 %v7859_v54 }
  0x8d   : > { %6791 = vmatprep.subr.bf16.mxu0 %v7860_v55  ;;  %v1658_v55 = vrot.slane %v1654_v50, %v8526_v49 }
  0x8e   : > { %7106 = vmatpush3.bf16.msra.mxu1 %v7882_v10  ;;  %v8538_v10 = vstv %s1043_s18  ;;  %s9192_s18 = sld [smem:[#allocation18_spill]] }
  0x8f   : > { %7107 = vmatprep.subr.bf16.mxu1 %v7884_v12 }
  0x90   : > { %6792 = vmatpush3.bf16.msra.mxu0 %v7861_v56 }
  0x91   : > { %7113 = vmatprep.subr.bf16.mxu0 %v7868_v60 }
  0x92   : > { %7108 = vmatpush3.bf16.msra.mxu1 %v7884_v12  ;;  %v8540_v12 = vstv %s1692_s27  ;;  %s9193_s27 = sld [smem:[#allocation23_spill]] }
  0x93   : > { %1638 = vmatmul.mubr.bf16.vlgmr.msra.gmra.mrb[8].mxu0 %v7862_v57  ;;  %7133 = vmatprep.subr.bf16.mxu1 %v8519_v13 }
  0x94   : > { %1645 = vmatprep.mubr.bf16.mxu0 %v7865_v58  ;;  %7114 = vmatpush3.bf16.msra.mxu0 %v7868_v60  ;;  %v8535_v60 = vsub.s32 2, %v8523_v48 }
  0x95   : > { %7115 = vmatprep.subr.bf16.mxu0 %v7869_v61 }
  0x98   : > { %7116 = vmatpush3.bf16.msra.mxu0 %v7869_v61 }
  0x99   : > { %7117 = vmatprep.subr.bf16.mxu0 %v7871_v63 }
  0x9b   : > { %1646 = vmatmul.mubr.bf16.gmra.mrb[12].mxu0 %v7867_v59  ;;  %v1666_v59 = vrot.slane %v1654_v50, %v8530_v52 }
  0x9c   : > { %7118 = vmatpush3.bf16.msra.mxu0 %v7871_v63 }
  0x9d   : > { %7119 = vmatprep.subr.bf16.mxu0 %v7873_v1 }
  0xa0   : > { %7120 = vmatpush3.bf16.msra.mxu0 %v7873_v1  ;;  %v1678_v1 = vrot.slane %v1654_v50, %v8535_v60 }
  0xa1   : > { %7121 = vmatprep.subr.bf16.mxu0 %v7875_v3 }
  0xa4   : > { %7122 = vmatpush3.bf16.msra.mxu0 %v7875_v3 }
  0xa5   : > { %7123 = vmatprep.subr.bf16.mxu0 %v7877_v5 }
  0xa8   : > { %7124 = vmatpush3.bf16.msra.mxu0 %v7877_v5 }
  0xa9   : > { %7125 = vmatprep.subr.bf16.mxu0 %v7879_v7 }
  0xac   : > { %7126 = vmatpush3.bf16.msra.mxu0 %v7879_v7 }
  0xad   : > { %7127 = vmatprep.subr.bf16.mxu0 %v7881_v9 }
  0xb0   : > { %7128 = vmatpush3.bf16.msra.mxu0 %v7881_v9 }
  0xb1   : > { %7153 = vmatprep.subr.bf16.mxu0 %v8514_v11 }
 0x146   : > { %v6737_v14 = vpop.f32.mrb[0].mxu0 }
 0x147   : > { %v6738_v16 = vpop.f32.mrb[1].mxu0 }
 0x148   : > { %v6739_v17 = vadd.f32 %v6738_v16, %v6737_v14  ;;  %v6740_v18 = vpop.f32.mrb[2].mxu0  ;;  %v6765_v19 = vpop.f32.mrb[0].mxu1 }
 0x149   : > { %v6741_v20 = vpop.f32.mrb[3].mxu0  ;;  %v6766_v23 = vpop.f32.mrb[1].mxu1 }
 0x14a   : > { %v1542_v21 = vadd.f32 %v6739_v17, %v6037_v15  ;;  %v6742_v22 = vadd.f32 %v6741_v20, %v6740_v18  ;;  %v6767_v24 = vadd.f32 %v6766_v23, %v6765_v19  ;;  %v6768_v25 = vpop.f32.mrb[2].mxu1 }
 0x14b   : > { %v6769_v27 = vpop.f32.mrb[3].mxu1 }
 0x14c   : > { %v1545_v26 = vadd.f32 %v6742_v22, %v6037_v15  ;;  %v1591_v28 = vadd.f32 %v6767_v24, %v1542_v21  ;;  %v6770_v29 = vadd.f32 %v6769_v27, %v6768_v25 }
 0x14e   : > { %v1594_v30 = vadd.f32 %v6770_v29, %v1545_v26  ;;  %v6743_v31 = vpop.f32.mrb[4].mxu0 }
 0x14f   : > { %v6744_v32 = vpop.f32.mrb[5].mxu0 }
 0x150   : > { %v6745_v33 = vadd.f32 %v6744_v32, %v6743_v31  ;;  %v6746_v34 = vpop.f32.mrb[6].mxu0  ;;  %v6771_v35 = vpop.f32.mrb[4].mxu1 }
 0x151   : > { %v6747_v36 = vpop.f32.mrb[7].mxu0  ;;  %v6772_v39 = vpop.f32.mrb[5].mxu1 }
 0x152   : > { %v1550_v37 = vadd.f32 %v6745_v33, %v6037_v15  ;;  %v6748_v38 = vadd.f32 %v6747_v36, %v6746_v34  ;;  %v6773_v40 = vadd.f32 %v6772_v39, %v6771_v35  ;;  %v6774_v41 = vpop.f32.mrb[6].mxu1 }
 0x153   : > { %v6775_v43 = vpop.f32.mrb[7].mxu1 }
 0x154   : > { %v1553_v42 = vadd.f32 %v6748_v38, %v6037_v15  ;;  %v1599_v44 = vadd.f32 %v6773_v40, %v1550_v37  ;;  %v6776_v45 = vadd.f32 %v6775_v43, %v6774_v41 }
 0x156   : > { %v1602_v46 = vadd.f32 %v6776_v45, %v1553_v42 }
 0x166   : > { %v6793_v51 = vpop.f32.mrb[8].mxu0 }
 0x167   : > { %v6794_v53 = vpop.f32.mrb[9].mxu0 }
 0x168   : > { %v6795_v54 = vadd.f32 %v6794_v53, %v6793_v51  ;;  %v6796_v56 = vpop.f32.mrb[10].mxu0 }
 0x169   : > { %v6797_v57 = vpop.f32.mrb[11].mxu0 }
 0x16a   : > { %v1640_v58 = vadd.f32 %v6795_v54, %v1591_v28  ;;  %v6798_v61 = vadd.f32 %v6797_v57, %v6796_v56  ;;  %v7887_v56 = vld [vmem:[%s8242_s25 + $0x90] sm:$0xff]  }
 0x16c   : > { %v1659_v62 = vmul.f32 %v1658_v55, %v1640_v58  ;;  %v1643_v63 = vadd.f32 %v6798_v61, %v1594_v30  ;;  %v1683_v9 = vmax.f32 %v1640_v58, 0.0 }
 0x16e   : > { %v1667_v0 = vadd.f32 %v1666_v59, %v1659_v62  ;;  %v1660_v2 = vmul.f32 %v1658_v55, %v1643_v63  ;;  %v6799_v3 = vpop.f32.mrb[12].mxu0  ;;  %v1684_v19 = vmax.f32 %v1643_v63, 0.0  ;;  %v1688_v23 = vmul.f32 %v8538_v10, %v1683_v9  ;;  %v7888_v62 = vld [vmem:[%s8242_s25 + $0x48] sm:$0xff]   ;;  %v7899_v9 = vld [vmem:[%s8242_s25 + $0x140] sm:$0xff]  }
 0x16f   : > { %v6800_v4 = vpop.f32.mrb[13].mxu0 }
 0x170   : > { %v1671_v5 = vmul.f32 %v1667_v0, %v1640_v58  ;;  %v1668_v6 = vadd.f32 %v1666_v59, %v1660_v2  ;;  %v6801_v7 = vadd.f32 %v6800_v4, %v6799_v3  ;;  %v6802_v8 = vpop.f32.mrb[14].mxu0  ;;  %v1689_v27 = vmul.f32 %v8538_v10, %v1684_v19  ;;  %v7889_v0 = vld [vmem:[%s8242_s25 + $0x98] sm:$0xff]   ;;  %v7891_v2 = vld [vmem:[%s8242_s25 + $0xa0] sm:$0xff]   ;;  %v7893_v4 = vld [vmem:[%s8242_s25 + $0xa8] sm:$0xff]  }
 0x171   : > { %v6803_v14 = vpop.f32.mrb[15].mxu0  ;;  %v7892_v3 = vld [vmem:[%s8242_s25 + $0x58] sm:$0xff]  }
 0x172   : > { %v1679_v15 = vadd.f32 %v1678_v1, %v1671_v5  ;;  %v1672_v16 = vmul.f32 %v1668_v6, %v1643_v63  ;;  %v1648_v17 = vadd.f32 %v6801_v7, %v1599_v44  ;;  %v6804_v18 = vadd.f32 %v6803_v14, %v6802_v8  ;;  %v7895_v5 = vld [vmem:[%s8242_s25 + $0xb0] sm:$0xff]   ;;  %v7896_v6 = vld [vmem:[%s8242_s25 + $0x68] sm:$0xff]   ;;  %v7897_v7 = vld [vmem:[%s8242_s25 + $0xb8] sm:$0xff]  }
 0x173   : > { %v7898_v8 = vld [vmem:[%s8242_s25 + $0x70] sm:$0xff]  }
 0x174   : > { %v1680_v20 = vadd.f32 %v1678_v1, %v1672_v16  ;;  %v1661_v21 = vmul.f32 %v1658_v55, %v1648_v17  ;;  %v1651_v22 = vadd.f32 %v6804_v18, %v1602_v46  ;;  %v1694_v24 = vmul.f32 %v8540_v12, %v1679_v15  ;;  %v7885_v46 = vld [vmem:[%s8242_s25 + $0x88] sm:$0xff]   ;;  %v7900_v18 = vld [vmem:[%s8242_s25 + $0x78] sm:$0xff]  }
 0x175   : > { %v1685_v31 = vmax.f32 %v1648_v17, 0.0 }
 0x176   : > { %v1669_v25 = vadd.f32 %v1666_v59, %v1661_v21  ;;  %v1662_v26 = vmul.f32 %v1658_v55, %v1651_v22  ;;  %v1695_v28 = vmul.f32 %v8540_v12, %v1680_v20  ;;  %v1698_v29 = vadd.f32 %v1694_v24, %v1688_v23  ;;  %v7901_v20 = vld [vmem:[%s8242_s25 + $0x148] sm:$0xff]   ;;  %v7903_v23 = vld [vmem:[%s8242_s25 + $0x150] sm:$0xff]  }
 0x177   : > { %v1686_v36 = vmax.f32 %v1651_v22, 0.0  ;;  %v1690_v38 = vmul.f32 %v8538_v10, %v1685_v31  ;;  %v7905_v31 = vld [vmem:[%s8242_s25 + $0x158] sm:$0xff]  }
 0x178   : > { %v1673_v30 = vmul.f32 %v1669_v25, %v1648_v17  ;;  %v1670_v32 = vadd.f32 %v1666_v59, %v1662_v26  ;;  %v1699_v33 = vadd.f32 %v1695_v28, %v1689_v27  ;;  %1702 = vst [vmem:[#allocation2 + $0x3] sm:$0xff] %v1698_v29 }
 0x179   : > { %v1691_v42 = vmul.f32 %v8538_v10, %v1686_v36  ;;  %v7910_v36 = vld [vmem:[%s8242_s25 + $0x120] sm:$0xff]  }
 0x17a   : > { %v1681_v34 = vadd.f32 %v1678_v1, %v1673_v30  ;;  %v1674_v35 = vmul.f32 %v1670_v32, %v1651_v22  ;;  %1703 = vst [vmem:[#allocation2 + $0xb] sm:$0xff] %v1699_v33  ;;  %v1706_v37 = vpack.c.bf16 %v1699_v33, %v1698_v29  ;;  %v7902_v22 = vld [vmem:[%s8242_s25 + $0x100] sm:$0xff]   ;;  %v7904_v29 = vld [vmem:[%s8242_s25 + $0x108] sm:$0xff]   ;;  %v7906_v32 = vld [vmem:[%s8242_s25 + $0x110] sm:$0xff]  }
 0x17b   : > { %v7907_v33 = vld [vmem:[%s8242_s25 + $0x160] sm:$0xff]  }
 0x17c   : > { %v1696_v39 = vmul.f32 %v8540_v12, %v1681_v34  ;;  %v1682_v40 = vadd.f32 %v1678_v1, %v1674_v35  ;;  %7129 = vmatprep.mubr.bf16.mxu0 %v1706_v37  ;;  %v7908_v34 = vld [vmem:[%s8242_s25 + $0x118] sm:$0xff]   ;;  %v7909_v35 = vld [vmem:[%s8242_s25 + $0x168] sm:$0xff]   ;;  %v7911_v37 = vld [vmem:[%s8242_s25 + $0x170] sm:$0xff]  }
 0x17e   : > { %v1700_v41 = vadd.f32 %v1696_v39, %v1690_v38  ;;  %v1697_v43 = vmul.f32 %v8540_v12, %v1682_v40  ;;  %v7912_v38 = vld [vmem:[%s8242_s25 + $0x128] sm:$0xff]   ;;  %v7913_v39 = vld [vmem:[%s8242_s25 + $0x178] sm:$0xff]   ;;  %v7914_v40 = vld [vmem:[%s8242_s25 + $0x130] sm:$0xff]  }
 0x17f   : > { %v1778_v45 = vld [vmem:[#allocation2] sm:$0xff] }
 0x180   : > { %1704 = vst [vmem:[#allocation2 + $0x13] sm:$0xff] %v1700_v41  ;;  %v1701_v44 = vadd.f32 %v1697_v43, %v1691_v42  ;;  %v2174_v51 = vld [vmem:[#allocation2 + $0x2] sm:$0xff]  ;;  %v7915_v43 = vld [vmem:[%s8242_s25 + $0x138] sm:$0xff]  }
 0x181   : > { %v1779_v47 = vld [vmem:[#allocation2 + $0x8] sm:$0xff] }
 0x182   : > { %1705 = vst [vmem:[#allocation2 + $0x1b] sm:$0xff] %v1701_v44  ;;  %v1707_v50 = vpack.c.bf16 %v1701_v44, %v1700_v41  ;;  %v2175_v53 = vld [vmem:[#allocation2 + $0xa] sm:$0xff]  ;;  %v1782_v54 = vpack.c.bf16 %v1779_v47, %v1778_v45  ;;  %v2022_v63 = vld [vmem:[#allocation2 + $0x1] sm:$0xff] }
 0x183   : > { %v2178_v55 = vpack.c.bf16 %v2175_v53, %v2174_v51  ;;  %v2023_v59 = vld [vmem:[#allocation2 + $0x9] sm:$0xff]  ;;  %v7916_v45 = vld [vmem:[%s8242_s25 + $0x180] sm:$0xff]  }
 0x184   : > { %7130 = vmatmul.mubr.bf16.vlgmr.msra.gmra.mrb[16].mxu0 %v1707_v50  ;;  %7109 = vmatprep.mubr.bf16.mxu1 %v1782_v54  ;;  %v2026_v1 = vpack.c.bf16 %v2023_v59, %v2022_v63  ;;  %v2478_v19 = vld [vmem:[#allocation2 + $0x5] sm:$0xff] }
 0x185   : > { %7154 = vmatpush3.bf16.msra.mxu0 %v8514_v11  ;;  %7169 = vmatprep.mubr.bf16.mxu0 %v2178_v55  ;;  %v7890_v11 = vld [vmem:[%s8242_s25 + $0x50] sm:$0xff]   ;;  %v2326_v28 = vld [vmem:[#allocation2 + $0x4] sm:$0xff] }
 0x186   : > { %7155 = vmatprep.subr.bf16.mxu0 %v7885_v46  ;;  %v2630_v53 = vld [vmem:[#allocation2 + $0x6] sm:$0xff] }
 0x187   : > { %v1780_v57 = vld [vmem:[#allocation2 + $0x10] sm:$0xff]  ;;  %v7917_v54 = vld [vmem:[%s8242_s25 + $0x188] sm:$0xff]  }
 0x188   : > { %v2176_v15 = vld [vmem:[#allocation2 + $0x12] sm:$0xff]  ;;  %v7921_v59 = vld [vmem:[%s8242_s25 + $0x1a8] sm:$0xff]  }
 0x189   : > { %7156 = vmatpush3.bf16.msra.mxu0 %v7885_v46  ;;  %v1781_v58 = vld [vmem:[#allocation2 + $0x18] sm:$0xff]  ;;  %v2479_v16 = vld [vmem:[#allocation2 + $0xd] sm:$0xff] }
 0x18a   : > { %7157 = vmatprep.subr.bf16.mxu0 %v7887_v56  ;;  %v1783_v61 = vpack.c.bf16 %v1781_v58, %v1780_v57  ;;  %v2177_v14 = vld [vmem:[#allocation2 + $0x1a] sm:$0xff]  ;;  %v2482_v21 = vpack.c.bf16 %v2479_v16, %v2478_v19  ;;  %v2327_v25 = vld [vmem:[#allocation2 + $0xc] sm:$0xff] }
 0x18b   : > { %v2179_v17 = vpack.c.bf16 %v2177_v14, %v2176_v15  ;;  %v2025_v24 = vld [vmem:[#allocation2 + $0x19] sm:$0xff]  ;;  %v2024_v26 = vld [vmem:[#allocation2 + $0x11] sm:$0xff]  ;;  %v2330_v30 = vpack.c.bf16 %v2327_v25, %v2326_v28 }
 0x18c   : > { %7110 = vmatmul.mubr.bf16.vlgmr.msra.gmra.mrb[8].mxu1 %v1783_v61  ;;  %v2027_v27 = vpack.c.bf16 %v2025_v24, %v2024_v26  ;;  %v2480_v41 = vld [vmem:[#allocation2 + $0x15] sm:$0xff]  ;;  %v2481_v42 = vld [vmem:[#allocation2 + $0x1d] sm:$0xff] }
 0x18d   : > { %7134 = vmatpush3.bf16.msra.mxu1 %v8519_v13  ;;  %7158 = vmatpush3.bf16.msra.mxu0 %v7887_v56  ;;  %v7894_v13 = vld [vmem:[%s8242_s25 + $0x60] sm:$0xff]   ;;  %v2483_v44 = vpack.c.bf16 %v2481_v42, %v2480_v41  ;;  %v2328_v46 = vld [vmem:[#allocation2 + $0x14] sm:$0xff] }
 0x18e   : > { %7149 = vmatprep.mubr.bf16.mxu1 %v2026_v1  ;;  %7135 = vmatprep.subr.bf16.mxu1 %v7888_v62  ;;  %v2329_v47 = vld [vmem:[#allocation2 + $0x1c] sm:$0xff]  ;;  %v2631_v50 = vld [vmem:[#allocation2 + $0xe] sm:$0xff] }
 0x18f   : > { %7159 = vmatprep.subr.bf16.mxu0 %v7889_v0  ;;  %v2331_v51 = vpack.c.bf16 %v2329_v47, %v2328_v46  ;;  %v2634_v55 = vpack.c.bf16 %v2631_v50, %v2630_v53  ;;  %v7918_v56 = vld [vmem:[%s8242_s25 + $0x190] sm:$0xff]   ;;  %v7919_v57 = vld [vmem:[%s8242_s25 + $0x198] sm:$0xff]   ;;  %v7920_v58 = vld [vmem:[%s8242_s25 + $0x1a0] sm:$0xff]   ;;  %v1729_v50 = vadd.s32 24, %v8523_v48 }
 0x190   : > { %v7922_v61 = vld [vmem:[%s8242_s25 + $0x1b0] sm:$0xff]  }
 0x191   : > { %7136 = vmatpush3.bf16.msra.mxu1 %v7888_v62  ;;  %7160 = vmatpush3.bf16.msra.mxu0 %v7889_v0  ;;  %v7923_v62 = vld [vmem:[%s8242_s25 + $0x1b8] sm:$0xff]  }
 0x192   : > { %7137 = vmatprep.subr.bf16.mxu1 %v7890_v11  ;;  %7161 = vmatprep.subr.bf16.mxu0 %v7891_v2  ;;  %v2632_v63 = vld [vmem:[#allocation2 + $0x16] sm:$0xff]  ;;  %v2633_v0 = vld [vmem:[#allocation2 + $0x1e] sm:$0xff] }
 0x193   : > { %v2635_v1 = vpack.c.bf16 %v2633_v0, %v2632_v63 }
 0x195   : > { %7138 = vmatpush3.bf16.msra.mxu1 %v7890_v11  ;;  %7162 = vmatpush3.bf16.msra.mxu0 %v7891_v2  ;;  %v8206_v11 = vmov 0.0   ;;  %v1728_v2 = vadd.s32 16, %v8523_v48 }
 0x196   : > { %7139 = vmatprep.subr.bf16.mxu1 %v7892_v3  ;;  %7163 = vmatprep.subr.bf16.mxu0 %v7893_v4 }
 0x199   : > { %7140 = vmatpush3.bf16.msra.mxu1 %v7892_v3  ;;  %7164 = vmatpush3.bf16.msra.mxu0 %v7893_v4  ;;  %v1748_v3 = vand.u32 15, %v1728_v2  ;;  %v1734_v4 = vand.u32 15, %v8523_v48 }
 0x19a   : > { %7141 = vmatprep.subr.bf16.mxu1 %v7894_v13  ;;  %7165 = vmatprep.subr.bf16.mxu0 %v7895_v5 }
 0x19d   : > { %7142 = vmatpush3.bf16.msra.mxu1 %v7894_v13  ;;  %7166 = vmatpush3.bf16.msra.mxu0 %v7895_v5 }
 0x19e   : > { %7143 = vmatprep.subr.bf16.mxu1 %v7896_v6  ;;  %7167 = vmatprep.subr.bf16.mxu0 %v7897_v7 }
 0x1a1   : > { %7144 = vmatpush3.bf16.msra.mxu1 %v7896_v6  ;;  %7168 = vmatpush3.bf16.msra.mxu0 %v7897_v7  ;;  %v1899_v7 = vadd.s32 4294967293, %v1748_v3 }
 0x1a2   : > { %7145 = vmatprep.subr.bf16.mxu1 %v7898_v8  ;;  %7193 = vmatprep.subr.bf16.mxu0 %v7899_v9 }
 0x1a3   : > { %vm1903_vm1 = vcmp.ge.s32.totalorder %v1899_v7, 0 }
 0x1a4   : > { %7170 = vmatmul.mubr.bf16.vlgmr.msra.gmra.mrb[20].mxu0 %v2179_v17 }
 0x1a5   : > { %7146 = vmatpush3.bf16.msra.mxu1 %v7898_v8  ;;  %7194 = vmatpush3.bf16.msra.mxu0 %v7899_v9  ;;  %v1897_v9 = vadd.s32 4294967293, %v1734_v4 }
 0x1a6   : > { %7209 = vmatprep.mubr.bf16.mxu0 %v2482_v21  ;;  %7147 = vmatprep.subr.bf16.mxu1 %v7900_v18 }
 0x1a7   : > { %7195 = vmatprep.subr.bf16.mxu0 %v7901_v20  ;;  %vm1901_vm2 = vcmp.ge.s32.totalorder %v1897_v9, 0 }
 0x1a9   : > { %7148 = vmatpush3.bf16.msra.mxu1 %v7900_v18  ;;  %7196 = vmatpush3.bf16.msra.mxu0 %v7901_v20 }
 0x1aa   : > { %7173 = vmatprep.subr.bf16.mxu1 %v7902_v22  ;;  %7197 = vmatprep.subr.bf16.mxu0 %v7903_v23 }
 0x1ac   : > { %7150 = vmatmul.mubr.bf16.vlgmr.msra.gmra.mrb[12].mxu1 %v2027_v27  ;;  %v2144_v27 = vadd.s32 4294967294, %v1748_v3 }
 0x1ad   : > { %7174 = vmatpush3.bf16.msra.mxu1 %v7902_v22  ;;  %7189 = vmatprep.mubr.bf16.mxu1 %v2330_v30  ;;  %v2296_v30 = vadd.s32 4294967295, %v1748_v3 }
 0x1ae   : > { %7198 = vmatpush3.bf16.msra.mxu0 %v7903_v23  ;;  %7175 = vmatprep.subr.bf16.mxu1 %v7904_v29  ;;  %vm2148_vm3 = vcmp.ge.s32.totalorder %v2144_v27, 0 }
 0x1af   : > { %7199 = vmatprep.subr.bf16.mxu0 %v7905_v31  ;;  %vm2300_vm5 = vcmp.ge.s32.totalorder %v2296_v30, 0 }
 0x1b1   : > { %7176 = vmatpush3.bf16.msra.mxu1 %v7904_v29  ;;  %v2142_v29 = vadd.s32 4294967294, %v1734_v4 }
 0x1b2   : > { %7200 = vmatpush3.bf16.msra.mxu0 %v7905_v31  ;;  %7177 = vmatprep.subr.bf16.mxu1 %v7906_v32  ;;  %v2294_v31 = vadd.s32 4294967295, %v1734_v4 }
 0x1b3   : > { %7201 = vmatprep.subr.bf16.mxu0 %v7907_v33  ;;  %vm2146_vm4 = vcmp.ge.s32.totalorder %v2142_v29, 0 }
 0x1b4   : > { %vm2298_vm6 = vcmp.ge.s32.totalorder %v2294_v31, 0 }
 0x1b5   : > { %7178 = vmatpush3.bf16.msra.mxu1 %v7906_v32 }
 0x1b6   : > { %7202 = vmatpush3.bf16.msra.mxu0 %v7907_v33  ;;  %7179 = vmatprep.subr.bf16.mxu1 %v7908_v34 }
 0x1b7   : > { %7203 = vmatprep.subr.bf16.mxu0 %v7909_v35 }
 0x1b9   : > { %7180 = vmatpush3.bf16.msra.mxu1 %v7908_v34 }
 0x1ba   : > { %7204 = vmatpush3.bf16.msra.mxu0 %v7909_v35  ;;  %7181 = vmatprep.subr.bf16.mxu1 %v7910_v36 }
 0x1bb   : > { %7205 = vmatprep.subr.bf16.mxu0 %v7911_v37 }
 0x1bd   : > { %7182 = vmatpush3.bf16.msra.mxu1 %v7910_v36 }
 0x1be   : > { %7206 = vmatpush3.bf16.msra.mxu0 %v7911_v37  ;;  %7183 = vmatprep.subr.bf16.mxu1 %v7912_v38 }
 0x1bf   : > { %7207 = vmatprep.subr.bf16.mxu0 %v7913_v39 }
 0x1c1   : > { %7184 = vmatpush3.bf16.msra.mxu1 %v7912_v38 }
 0x1c2   : > { %7208 = vmatpush3.bf16.msra.mxu0 %v7913_v39  ;;  %7185 = vmatprep.subr.bf16.mxu1 %v7914_v40 }
 0x1c3   : > { %7261 = vmatprep.subr.bf16.mxu0 %v8206_v11 }
 0x1c5   : > { %7210 = vmatmul.mubr.bf16.vlgmr.msra.gmra.mrb[24].mxu0 %v2483_v44  ;;  %7186 = vmatpush3.bf16.msra.mxu1 %v7914_v40 }
 0x1c6   : > { %7187 = vmatprep.subr.bf16.mxu1 %v7915_v43  ;;  %7277 = vmatprep.mubr.msk.bf16.mxu0 %vm8207_vm0, %v8206_v11 }
 0x1c9   : > { %7188 = vmatpush3.bf16.msra.mxu1 %v7915_v43 }
 0x1ca   : > { %7213 = vmatprep.subr.bf16.mxu1 %v7916_v45 }
 0x1cc   : > { %7190 = vmatmul.mubr.bf16.vlgmr.msra.gmra.mrb[16].mxu1 %v2331_v51  ;;  %v8600_v51 = vadd.s32 8, %v8523_v48 }
 0x1cd   : > { %7214 = vmatpush3.bf16.msra.mxu1 %v7916_v45  ;;  %7229 = vmatprep.mubr.bf16.mxu1 %v2634_v55  ;;  %v1755_v55 = vand.u32 15, %v1729_v50  ;;  %v7937_v50 = vld [vmem:[%s8272_s24 + $0x8] sm:$0xff]  }
 0x1ce   : > { %7215 = vmatprep.subr.bf16.mxu1 %v7917_v54 }
 0x1d1   : > { %7216 = vmatpush3.bf16.msra.mxu1 %v7917_v54 }
 0x1d2   : > { %7217 = vmatprep.subr.bf16.mxu1 %v7918_v56 }
 0x1d5   : > { %7218 = vmatpush3.bf16.msra.mxu1 %v7918_v56 }
 0x1d6   : > { %7219 = vmatprep.subr.bf16.mxu1 %v7919_v57 }
 0x1d9   : > { %7220 = vmatpush3.bf16.msra.mxu1 %v7919_v57  ;;  %v1741_v57 = vand.u32 15, %v8600_v51 }
 0x1da   : > { %7221 = vmatprep.subr.bf16.mxu1 %v7920_v58 }
 0x1db   : > { %v2599_v63 = vadd.s32 2, %v1741_v57 }
 0x1dd   : > { %7222 = vmatpush3.bf16.msra.mxu1 %v7920_v58  ;;  %vm2607_vm10 = vcmp.lt.s32.totalorder %v2599_v63, 16  ;;  %v7939_v63 = vld [vmem:[%s8272_s24 + $0x10] sm:$0xff]  }
 0x1de   : > { %7223 = vmatprep.subr.bf16.mxu1 %v7921_v59 }
 0x1e1   : > { %7224 = vmatpush3.bf16.msra.mxu1 %v7921_v59  ;;  %v2449_v59 = vadd.s32 1, %v1755_v55 }
 0x1e2   : > { %7225 = vmatprep.subr.bf16.mxu1 %v7922_v61 }
 0x1e3   : > { %vm2457_vm7 = vcmp.lt.s32.totalorder %v2449_v59, 16  ;;  %v7934_v59 = vld [vmem:[%s8272_s24 + $0xc8] sm:$0xff]  }
 0x1e5   : > { %7226 = vmatpush3.bf16.msra.mxu1 %v7922_v61  ;;  %v2447_v61 = vadd.s32 1, %v1741_v57 }
 0x1e6   : > { %7227 = vmatprep.subr.bf16.mxu1 %v7923_v62 }
 0x1e7   : > { %vm2455_vm8 = vcmp.lt.s32.totalorder %v2447_v61, 16  ;;  %v7936_v61 = vld [vmem:[%s8272_s24 + $0xd0] sm:$0xff]  }
 0x1e9   : > { %7228 = vmatpush3.bf16.msra.mxu1 %v7923_v62  ;;  %v2601_v62 = vadd.s32 2, %v1755_v55 }
 0x1ea   : > { %7233 = vmatprep.subr.bf16.mxu1 %v8206_v11 }
 0x1eb   : > { %vm2609_vm9 = vcmp.lt.s32.totalorder %v2601_v62, 16  ;;  %v7938_v62 = vld [vmem:[%s8272_s24 + $0xd8] sm:$0xff]  }
 0x1ec   : > { %7230 = vmatmul.mubr.bf16.vlgmr.msra.gmra.mrb[20].mxu1 %v2635_v1 }
 0x1ed   : > { %7237 = vmatprep.mubr.msk.bf16.mxu1 %vm8207_vm0, %v8206_v11 }
 0x257   : > { %v7131_v13 = vpop.f32.mrb[16].mxu0 }
 0x258   : > { %v2007_v5 = vpop.f32.mrb[17].mxu0 }
 0x259   : > { %v7132_v6 = vpop.f32.mrb[18].mxu0 }
 0x25a   : > { %v2010_v8 = vpop.f32.mrb[19].mxu0 }
 0x25f   : > { %v7111_v14 = vpop.f32.mrb[8].mxu1 }
 0x260   : > { %v1923_v15 = vsel %vm1903_vm1, %v7111_v14, 0.0  ;;  %v1882_v16 = vpop.f32.mrb[9].mxu1 }
 0x261   : > { %v2016_v17 = vadd.f32 %v7131_v13, %v1923_v15  ;;  %v1921_v18 = vsel %vm1901_vm2, %v1882_v16, 0.0  ;;  %v7112_v19 = vpop.f32.mrb[10].mxu1 }
 0x262   : > { %v2008_v20 = vadd.f32 %v2007_v5, %v1921_v18  ;;  %v2019_v21 = vadd.f32 %v7132_v6, %v7112_v19  ;;  %v1885_v22 = vpop.f32.mrb[11].mxu1  ;;  %v2753_v19 = vadd.s32 3, %v1755_v55 }
 0x263   : > { %v2011_v23 = vadd.f32 %v2010_v8, %v1885_v22 }
 0x264   : > { %vm2761_vm11 = vcmp.lt.s32.totalorder %v2753_v19, 16 }
 0x277   : > { %v7171_v24 = vpop.f32.mrb[20].mxu0 }
 0x278   : > { %v2279_v25 = vpop.f32.mrb[21].mxu0  ;;  %v2320_v38 = vsel %vm2300_vm5, %v7171_v24, 0.0 }
 0x279   : > { %v7172_v26 = vpop.f32.mrb[22].mxu0  ;;  %v2318_v42 = vsel %vm2298_vm6, %v2279_v25, 0.0 }
 0x27a   : > { %v2282_v28 = vpop.f32.mrb[23].mxu0 }
 0x27f   : > { %v7151_v32 = vpop.f32.mrb[12].mxu1 }
 0x280   : > { %v2168_v33 = vsel %vm2148_vm3, %v7151_v32, 0.0  ;;  %v2127_v34 = vpop.f32.mrb[13].mxu1 }
 0x281   : > { %v2172_v35 = vadd.f32 %v2168_v33, %v2016_v17  ;;  %v2166_v36 = vsel %vm2146_vm4, %v2127_v34, 0.0  ;;  %v7152_v37 = vpop.f32.mrb[14].mxu1 }
 0x282   : > { %v2170_v39 = vadd.f32 %v2166_v36, %v2008_v20  ;;  %v2173_v40 = vadd.f32 %v7152_v37, %v2019_v21  ;;  %v2130_v41 = vpop.f32.mrb[15].mxu1  ;;  %v2751_v20 = vadd.s32 3, %v1741_v57 }
 0x283   : > { %v2171_v43 = vadd.f32 %v2130_v41, %v2011_v23  ;;  %v2324_v44 = vadd.f32 %v2320_v38, %v2172_v35  ;;  %v7924_v38 = vld [vmem:[%s9187_s3] sm:$0xff]   ;;  %v7927_v41 = vld [vmem:[%s9183_s8 + $0x10] sm:$0xff]   ;;  %s9203_s3 = sld [smem:[#allocation29_spill]] }
 0x284   : > { %v2325_v45 = vadd.f32 %v7172_v26, %v2173_v40  ;;  %v2322_v46 = vadd.f32 %v2318_v42, %v2170_v39  ;;  %vm2759_vm12 = vcmp.lt.s32.totalorder %v2751_v20, 16  ;;  %v6250_v26 = vld [vmem:[%s8247_s29] ss:$0 sm:$0xff]  ;;  %v7926_v40 = vld [vmem:[%s9183_s8 + $0x8] sm:$0xff]   ;;  %v7928_v42 = vld [vmem:[%s9183_s8 + $0x18] sm:$0xff]  }
 0x285   : > { %v2323_v47 = vadd.f32 %v2282_v28, %v2171_v43  ;;  %v7925_v39 = vld [vmem:[%s9183_s8] sm:$0xff]  }
 0x286   : > { %v7929_v43 = vld [vmem:[%s9183_s8 + $0x20] sm:$0xff]  }
 0x298   : > { %v7211_v53 = vpop.f32.mrb[24].mxu0 }
 0x299   : > { %v2583_v54 = vpop.f32.mrb[25].mxu0 }
 0x29a   : > { %v7212_v56 = vpop.f32.mrb[26].mxu0 }
 0x29b   : > { %v2586_v58 = vpop.f32.mrb[27].mxu0  ;;  %v2625_v14 = vsel %vm2609_vm9, %v7212_v56, 0.0  ;;  %v7933_v56 = vld [vmem:[%s8272_s24 + $0xc0] sm:$0xff]  }
 0x29c   : > { %v2623_v16 = vsel %vm2607_vm10, %v2586_v58, 0.0 }
 0x29f   : > { %v7191_v0 = vpop.f32.mrb[16].mxu1 }
 0x2a0   : > { %v2476_v1 = vadd.f32 %v7191_v0, %v2324_v44  ;;  %v2431_v2 = vpop.f32.mrb[17].mxu1  ;;  %v7930_v44 = vld [vmem:[%s9183_s8 + $0x28] sm:$0xff]   ;;  %v7940_v0 = vld [vmem:[%s8272_s24 + $0xe0] sm:$0xff]  }
 0x2a1   : > { %v2474_v3 = vadd.f32 %v2431_v2, %v2322_v46  ;;  %v7192_v4 = vpop.f32.mrb[18].mxu1  ;;  %v7932_v46 = vld [vmem:[%s9183_s8 + $0x38] sm:$0xff]   ;;  %v7942_v2 = vld [vmem:[%s8272_s24 + $0xe8] sm:$0xff]  }
 0x2a2   : > { %v2473_v13 = vsel %vm2457_vm7, %v7192_v4, 0.0  ;;  %v2434_v5 = vpop.f32.mrb[19].mxu1  ;;  %v2628_v6 = vadd.f32 %v7211_v53, %v2476_v1  ;;  %v7941_v1 = vld [vmem:[%s8272_s24 + $0x18] sm:$0xff]   ;;  %v7944_v4 = vld [vmem:[%s8272_s24 + $0xf0] sm:$0xff]  }
 0x2a3   : > { %v2477_v7 = vadd.f32 %v2473_v13, %v2325_v45  ;;  %v2471_v8 = vsel %vm2455_vm8, %v2434_v5, 0.0  ;;  %v2626_v9 = vadd.f32 %v2583_v54, %v2474_v3  ;;  %v7931_v45 = vld [vmem:[%s9183_s8 + $0x30] sm:$0xff]   ;;  %v7943_v3 = vld [vmem:[%s8272_s24 + $0x20] sm:$0xff]   ;;  %v7945_v13 = vld [vmem:[%s8272_s24 + $0x28] sm:$0xff]  }
 0x2a4   : > { %v2475_v15 = vadd.f32 %v2471_v8, %v2323_v47  ;;  %v7935_v47 = vld [vmem:[%s8272_s24] sm:$0xff]   ;;  %v7946_v5 = vld [vmem:[%s8272_s24 + $0xf8] sm:$0xff]  }
 0x2a5   : > { %v2629_v17 = vadd.f32 %v2625_v14, %v2477_v7  ;;  %7262 = vmatpush3.bf16.msra.mxu0 %v7935_v47  ;;  %v7949_v7 = vld [vmem:[%s8272_s24 + $0x38] sm:$0xff]   ;;  %v2960_v8 = vld [vmem:[%s8267_s19] sm:$0x7]  ;;  %v7953_v47 = vld [vmem:[%s8272_s24 + $0x48] sm:$0xff]  }
 0x2a6   : > { %v2627_v18 = vadd.f32 %v2623_v16, %v2475_v15  ;;  %7263 = vmatprep.subr.bf16.mxu0 %v8206_v11  ;;  %v2964_v14 = vrot.slane %v2960_v8, %v8526_v49 }
 0x2a9   : > { %7264 = vmatpush3.bf16.msra.mxu0 %v7937_v50  ;;  %v7954_v50 = vld [vmem:[%s8272_s24 + $0x98] sm:$0xff]  }
 0x2aa   : > { %7265 = vmatprep.subr.bf16.mxu0 %v8206_v11 }
 0x2ad   : > { %7266 = vmatpush3.bf16.msra.mxu0 %v7939_v63 }
 0x2ae   : > { %7267 = vmatprep.subr.bf16.mxu0 %v8206_v11 }
 0x2b1   : > { %7268 = vmatpush3.bf16.msra.mxu0 %v7941_v1  ;;  %v7964_v1 = vld [vmem:[%s8272_s24 + $0x140] sm:$0xff]  }
 0x2b2   : > { %7269 = vmatprep.subr.bf16.mxu0 %v8206_v11 }
 0x2b5   : > { %7270 = vmatpush3.bf16.msra.mxu0 %v7943_v3  ;;  %v7965_v3 = vld [vmem:[%s8272_s24 + $0x78] sm:$0xff]  }
 0x2b6   : > { %7271 = vmatprep.subr.bf16.mxu0 %v8206_v11 }
 0x2b9   : > { %7272 = vmatpush3.bf16.msra.mxu0 %v7945_v13 }
 0x2ba   : > { %7273 = vmatprep.subr.bf16.mxu0 %v8206_v11 }
 0x2bf   : > { %v7231_v21 = vpop.f32.mrb[20].mxu1 }
 0x2c0   : > { %v2780_v22 = vadd.f32 %v7231_v21, %v2628_v6  ;;  %v2735_v23 = vpop.f32.mrb[21].mxu1  ;;  %v7947_v6 = vld [vmem:[%s8272_s24 + $0x30] sm:$0xff]  }
 0x2c1   : > { %v2778_v24 = vadd.f32 %v2735_v23, %v2626_v9  ;;  %v7232_v25 = vpop.f32.mrb[22].mxu1  ;;  %7274 = vmatpush3.bf16.msra.mxu0 %v7947_v6  ;;  %v6253_v9 = vld [vmem:[%s9188_s14] ss:$0 sm:$0xff] }
 0x2c2   : > { %v2777_v27 = vsel %vm2761_vm11, %v7232_v25, 0.0  ;;  %v2738_v28 = vpop.f32.mrb[23].mxu1  ;;  %v2791_v32 = vadd.f32 %v6250_v26, %v2780_v22  ;;  %7275 = vmatprep.subr.bf16.mxu0 %v8206_v11  ;;  %v7967_v6 = vld [vmem:[%s8272_s24 + $0x100] sm:$0xff]   ;;  %vm3880_vm11 = vcmask 130048  }
 0x2c3   : > { %v2781_v29 = vadd.f32 %v2777_v27, %v2629_v17  ;;  %v2775_v30 = vsel %vm2759_vm12, %v2738_v28, 0.0  ;;  %v2789_v34 = vadd.f32 %v6250_v26, %v2778_v24  ;;  %v2970_v17 = vrot.slane %v2960_v8, %v8530_v52 }
 0x2c4   : > { %v2779_v31 = vadd.f32 %v2775_v30, %v2627_v18  ;;  %v2978_v24 = vrot.slane %v2960_v8, %v8535_v60 }
 0x2c5   : > { %v2792_v33 = vadd.f32 %v6250_v26, %v2781_v29  ;;  %7276 = vmatpush3.bf16.msra.mxu0 %v7949_v7  ;;  %v7968_v7 = vld [vmem:[%s8272_s24 + $0x150] sm:$0xff]  }
 0x2c6   : > { %v2790_v35 = vadd.f32 %v6250_v26, %v2779_v31  ;;  %7301 = vmatprep.subr.bf16.mxu0 %v8206_v11 }
 0x2c7   : > { %v2794_v36 = vpack.c.bf16 %v2792_v33, %v2791_v32 }
 0x2c8   : > { %v2793_v37 = vpack.c.bf16 %v2790_v35, %v2789_v34 }
 0x2ca   : > { %7234 = vmatpush3.bf16.msra.mxu1 %v2793_v37 }
 0x2cb   : > { %7235 = vmatprep.subr.bf16.mxu1 %v8206_v11 }
 0x2ce   : > { %7236 = vmatpush3.bf16.msra.mxu1 %v2794_v36 }
 0x2cf   : > { %7241 = vmatprep.subr.bf16.mxu1 %v8206_v11 }
 0x2d1   : > { %7238 = vmatmul.mubr.msk.bf16.vlgmr.msra.gmra.mrb[24].mxu1 %vm2802_vm13, %v7924_v38 }
 0x2d2   : > { %7242 = vmatpush3.bf16.msra.mxu1 %v7925_v39  ;;  %7257 = vmatprep.mubr.msk.bf16.mxu1 %vm8207_vm0, %v8206_v11  ;;  %v7948_v39 = vld [vmem:[%s8272_s24 + $0x80] sm:$0xff]  }
 0x2d3   : > { %7243 = vmatprep.subr.bf16.mxu1 %v8206_v11 }
 0x2d6   : > { %7244 = vmatpush3.bf16.msra.mxu1 %v7926_v40 }
 0x2d7   : > { %7245 = vmatprep.subr.bf16.mxu1 %v8206_v11 }
 0x2da   : > { %7246 = vmatpush3.bf16.msra.mxu1 %v7927_v41  ;;  %v7950_v41 = vld [vmem:[%s8272_s24 + $0x88] sm:$0xff]  }
 0x2db   : > { %7247 = vmatprep.subr.bf16.mxu1 %v8206_v11 }
 0x2de   : > { %7248 = vmatpush3.bf16.msra.mxu1 %v7928_v42  ;;  %v7951_v42 = vld [vmem:[%s8272_s24 + $0x40] sm:$0xff]  }
 0x2df   : > { %7249 = vmatprep.subr.bf16.mxu1 %v8206_v11 }
 0x2e2   : > { %7250 = vmatpush3.bf16.msra.mxu1 %v7929_v43 }
 0x2e3   : > { %7251 = vmatprep.subr.bf16.mxu1 %v8206_v11 }
 0x2e6   : > { %7252 = vmatpush3.bf16.msra.mxu1 %v7930_v44 }
 0x2e7   : > { %7253 = vmatprep.subr.bf16.mxu1 %v8206_v11 }
 0x2ea   : > { %7254 = vmatpush3.bf16.msra.mxu1 %v7931_v45  ;;  %v7952_v45 = vld [vmem:[%s8272_s24 + $0x90] sm:$0xff]  }
 0x2eb   : > { %7255 = vmatprep.subr.bf16.mxu1 %v8206_v11 }
 0x2ee   : > { %7256 = vmatpush3.bf16.msra.mxu1 %v7932_v46 }
 0x2ef   : > { %7281 = vmatprep.subr.bf16.mxu1 %v8206_v11 }
 0x3a4   : > { %v2840_v53 = vpop.f32.mrb[24].mxu1 }
 0x3a5   : > { %v7239_v54 = vpop.f32.mrb[25].mxu1 }
 0x3a6   : > { %v2843_v55 = vpop.f32.mrb[26].mxu1  ;;  %v7956_v54 = vld [vmem:[%s8272_s24 + $0xa0] sm:$0xff]  }
 0x3a7   : > { %v2847_v57 = vpack.c.bf16 %v2843_v55, %v2840_v53  ;;  %v7240_v58 = vpop.f32.mrb[27].mxu1  ;;  %v7955_v53 = vld [vmem:[%s8272_s24 + $0x50] sm:$0xff]   ;;  %v7957_v55 = vld [vmem:[%s8272_s24 + $0x58] sm:$0xff]  }
 0x3a8   : > { %v7960_v58 = vld [vmem:[%s8272_s24 + $0xb0] sm:$0xff]  }
 0x3a9   : > { %7258 = vmatmul.mubr.bf16.vlgmr.msra.gmra.mrb[28].mxu1 %v2847_v57  ;;  %v7959_v57 = vld [vmem:[%s8272_s24 + $0x60] sm:$0xff]  }
 0x3aa   : > { %7282 = vmatpush3.bf16.msra.mxu1 %v7933_v56  ;;  %7297 = vmatprep.mubr.msk.bf16.mxu1 %vm8207_vm0, %v8206_v11  ;;  %v7958_v56 = vld [vmem:[%s8272_s24 + $0xa8] sm:$0xff]  }
 0x3ab   : > { %7283 = vmatprep.subr.bf16.mxu1 %v8206_v11 }
 0x3ae   : > { %7284 = vmatpush3.bf16.msra.mxu1 %v7934_v59  ;;  %v7961_v59 = vld [vmem:[%s8272_s24 + $0x68] sm:$0xff]  }
 0x3af   : > { %7285 = vmatprep.subr.bf16.mxu1 %v8206_v11 }
 0x3b2   : > { %7286 = vmatpush3.bf16.msra.mxu1 %v7936_v61  ;;  %v7962_v61 = vld [vmem:[%s8272_s24 + $0xb8] sm:$0xff]  }
 0x3b3   : > { %7287 = vmatprep.subr.bf16.mxu1 %v8206_v11 }
 0x3b6   : > { %7288 = vmatpush3.bf16.msra.mxu1 %v7938_v62 }
 0x3b7   : > { %7289 = vmatprep.subr.bf16.mxu1 %v8206_v11 }
 0x3ba   : > { %7290 = vmatpush3.bf16.msra.mxu1 %v7940_v0  ;;  %v7963_v0 = vld [vmem:[%s8272_s24 + $0x70] sm:$0xff]  }
 0x3bb   : > { %7291 = vmatprep.subr.bf16.mxu1 %v8206_v11 }
 0x3be   : > { %7292 = vmatpush3.bf16.msra.mxu1 %v7942_v2 }
 0x3bf   : > { %7293 = vmatprep.subr.bf16.mxu1 %v8206_v11 }
 0x3c2   : > { %7294 = vmatpush3.bf16.msra.mxu1 %v7944_v4  ;;  %v7966_v4 = vld [vmem:[%s8272_s24 + $0x148] sm:$0xff]  }
 0x3c3   : > { %7295 = vmatprep.subr.bf16.mxu1 %v8206_v11 }
 0x3c6   : > { %7296 = vmatpush3.bf16.msra.mxu1 %v7946_v5 }
 0x3c7   : > { %7321 = vmatprep.subr.bf16.mxu1 %v8206_v11 }
 0x47c   : > { %v2953_v15 = vpop.f32.mrb[28].mxu1 }
 0x47d   : > { %v2954_v16 = vadd.f32 %v6253_v9, %v2953_v15  ;;  %v7259_v18 = vpop.f32.mrb[29].mxu1  ;;  %v7971_v15 = vld [vmem:[%s8272_s24 + $0x110] sm:$0xff]  }
 0x47e   : > { %v2956_v19 = vpop.f32.mrb[30].mxu1  ;;  %v7974_v18 = vld [vmem:[%s8272_s24 + $0x168] sm:$0xff]  }
 0x47f   : > { %v2965_v20 = vmul.f32 %v2964_v14, %v2954_v16  ;;  %v2957_v21 = vadd.f32 %v6253_v9, %v2956_v19  ;;  %v7260_v22 = vpop.f32.mrb[31].mxu1  ;;  %v2981_v27 = vmax.f32 %v2954_v16, 0.0  ;;  %v7969_v9 = vld [vmem:[%s8272_s24 + $0x108] sm:$0xff]   ;;  %v7975_v19 = vld [vmem:[%s8272_s24 + $0x120] sm:$0xff]  }
 0x480   : > { %v7978_v22 = vld [vmem:[%s8272_s24 + $0x178] sm:$0xff]  }
 0x481   : > { %v2971_v23 = vadd.f32 %v2970_v17, %v2965_v20  ;;  %v2966_v25 = vmul.f32 %v2964_v14, %v2957_v21  ;;  %v2982_v31 = vmax.f32 %v2957_v21, 0.0  ;;  %v2983_v32 = vmul.f32 %v2981_v27, %v8538_v10  ;;  %v7970_v14 = vld [vmem:[%s8272_s24 + $0x158] sm:$0xff]   ;;  %v7976_v20 = vld [vmem:[%s8272_s24 + $0x170] sm:$0xff]  }
 0x482   : > { %v7980_v27 = vld [vmem:[%s8272_s24 + $0x138] sm:$0xff]  }
 0x483   : > { %v2973_v26 = vmul.f32 %v2971_v23, %v2954_v16  ;;  %v2972_v28 = vadd.f32 %v2970_v17, %v2966_v25  ;;  %v2984_v36 = vmul.f32 %v2982_v31, %v8538_v10  ;;  %v7972_v16 = vld [vmem:[%s8272_s24 + $0x160] sm:$0xff]   ;;  %v7973_v17 = vld [vmem:[%s8272_s24 + $0x118] sm:$0xff]   ;;  %v7979_v25 = vld [vmem:[%s8272_s24 + $0x130] sm:$0xff]  }
 0x485   : > { %v2979_v29 = vadd.f32 %v2978_v24, %v2973_v26  ;;  %v2974_v30 = vmul.f32 %v2972_v28, %v2957_v21  ;;  %v7977_v21 = vld [vmem:[%s8272_s24 + $0x128] sm:$0xff]  }
 0x487   : > { %v2985_v33 = vmul.f32 %v2979_v29, %v8540_v12  ;;  %v2980_v34 = vadd.f32 %v2978_v24, %v2974_v30  ;;  %v7981_v30 = vld [vmem:[%s8272_s24 + $0x180] sm:$0xff]  }
 0x489   : > { %v2987_v35 = vadd.f32 %v2985_v33, %v2983_v32  ;;  %v2986_v37 = vmul.f32 %v2980_v34, %v8540_v12  ;;  %v7982_v32 = vld [vmem:[%s8272_s24 + $0x188] sm:$0xff]   ;;  %v7983_v33 = vld [vmem:[%s8272_s24 + $0x190] sm:$0xff]   ;;  %v7984_v34 = vld [vmem:[%s8272_s24 + $0x198] sm:$0xff]  }
 0x48b   : > { %2989 = vst [vmem:[#allocation3 + $0x3] sm:$0xff] %v2987_v35  ;;  %v2988_v38 = vadd.f32 %v2986_v37, %v2984_v36  ;;  %v7986_v36 = vld [vmem:[%s8272_s24 + $0x1a8] sm:$0xff]   ;;  %v7987_v37 = vld [vmem:[%s8272_s24 + $0x1b0] sm:$0xff]  }
 0x48d   : > { %2990 = vst [vmem:[#allocation3 + $0xb] sm:$0xff] %v2988_v38  ;;  %v2991_v40 = vpack.c.bf16 %v2988_v38, %v2987_v35  ;;  %v7985_v35 = vld [vmem:[%s8272_s24 + $0x1a0] sm:$0xff]   ;;  %v7988_v38 = vld [vmem:[%s8272_s24 + $0x1b8] sm:$0xff]  }
 0x48f   : > { %7298 = vmatmul.mubr.bf16.vlgmr.msra.gmra.mrb[32].mxu1 %v2991_v40 }
 0x490   : > { %7322 = vmatpush3.bf16.msra.mxu1 %v7948_v39  ;;  %7337 = vmatprep.mubr.msk.bf16.mxu1 %vm8207_vm0, %v8206_v11 }
 0x491   : > { %7323 = vmatprep.subr.bf16.mxu1 %v8206_v11 }
 0x492   : > { %v3033_v43 = vld [vmem:[#allocation3] sm:$0xff] }
 0x493   : > { %v3369_v63 = vld [vmem:[#allocation3 + $0x2] sm:$0xff] }
 0x494   : > { %7324 = vmatpush3.bf16.msra.mxu1 %v7950_v41  ;;  %v3034_v44 = vld [vmem:[#allocation3 + $0x8] sm:$0xff] }
 0x495   : > { %7325 = vmatprep.subr.bf16.mxu1 %v8206_v11  ;;  %v3035_v46 = vpack.c.bf16 %v3034_v44, %v3033_v43  ;;  %v3370_v62 = vld [vmem:[#allocation3 + $0xa] sm:$0xff]  ;;  %v3244_v5 = vld [vmem:[#allocation3 + $0x1] sm:$0xff] }
 0x496   : > { %v3371_v2 = vpack.c.bf16 %v3370_v62, %v3369_v63  ;;  %v3245_v13 = vld [vmem:[#allocation3 + $0x9] sm:$0xff]  ;;  %v7990_v43 = vld [vmem:[%s9182_s12 + $0x8] sm:$0xff]  }
 0x497   : > { %7278 = vmatmul.mubr.bf16.vlgmr.msra.gmra.mrb[28].mxu0 %v3035_v46  ;;  %v3246_v8 = vpack.c.bf16 %v3245_v13, %v3244_v5  ;;  %v3619_v23 = vld [vmem:[#allocation3 + $0x5] sm:$0xff]  ;;  %v3620_v24 = vld [vmem:[#allocation3 + $0xd] sm:$0xff] }
 0x498   : > { %7302 = vmatpush3.bf16.msra.mxu0 %v7951_v42  ;;  %7326 = vmatpush3.bf16.msra.mxu1 %v7952_v45  ;;  %v3621_v26 = vpack.c.bf16 %v3620_v24, %v3619_v23  ;;  %v3494_v28 = vld [vmem:[#allocation3 + $0x4] sm:$0xff]  ;;  %v3495_v29 = vld [vmem:[#allocation3 + $0xc] sm:$0xff]  ;;  %v7989_v42 = vld [vmem:[%s9182_s12] sm:$0xff]   ;;  %v8768_v45 = vand.u32 7, %v8523_v48 }
 0x499   : > { %7303 = vmatprep.subr.bf16.mxu0 %v8206_v11  ;;  %7327 = vmatprep.subr.bf16.mxu1 %v8206_v11  ;;  %v3496_v31 = vpack.c.bf16 %v3495_v29, %v3494_v28  ;;  %v3744_v39 = vld [vmem:[#allocation3 + $0x6] sm:$0xff]  ;;  %v3745_v40 = vld [vmem:[#allocation3 + $0xe] sm:$0xff] }
 0x49a   : > { %7317 = vmatprep.mubr.msk.bf16.mxu0 %vm8207_vm0, %v8206_v11  ;;  %v3746_v41 = vpack.c.bf16 %v3745_v40, %v3744_v39  ;;  %v7991_v44 = vld [vmem:[%s9182_s12 + $0x10] sm:$0xff]   ;;  %v7992_v46 = vld [vmem:[%s9182_s12 + $0x18] sm:$0xff]  }
 0x49c   : > { %7304 = vmatpush3.bf16.msra.mxu0 %v7953_v47  ;;  %7328 = vmatpush3.bf16.msra.mxu1 %v7954_v50  ;;  %v8772_v47 = vand.u32 7, %v8600_v51 }
 0x49d   : > { %7305 = vmatprep.subr.bf16.mxu0 %v8206_v11  ;;  %7329 = vmatprep.subr.bf16.mxu1 %v8206_v11 }
 0x49e   : > { %v3479_v13 = vadd.s32 4294967295, %v8772_v47  ;;  %v3729_v28 = vadd.s32 2, %v8772_v47 }
 0x4a0   : > { %7306 = vmatpush3.bf16.msra.mxu0 %v7955_v53  ;;  %7330 = vmatpush3.bf16.msra.mxu1 %v7956_v54  ;;  %vm3481_vm1 = vcmp.ge.s32.totalorder %v3479_v13, 0  ;;  %vm3733_vm5 = vcmp.lt.s32.totalorder %v3729_v28, 8  ;;  %v8001_v13 = vld [vmem:[%s9190_s2 + $0x8] sm:$0xff]   ;;  %v4036_v28 = vld [vmem:[%s9191_s5] sm:$0x7]  ;;  %s9195_s5 = sld [smem:[#allocation22_spill]] }
 0x4a1   : > { %7307 = vmatprep.subr.bf16.mxu0 %v8206_v11  ;;  %7331 = vmatprep.subr.bf16.mxu1 %v8206_v11 }
 0x4a4   : > { %7308 = vmatpush3.bf16.msra.mxu0 %v7957_v55  ;;  %7332 = vmatpush3.bf16.msra.mxu1 %v7958_v56  ;;  %v3141_v55 = vadd.s32 4294967293, %v8768_v45 }
 0x4a5   : > { %7309 = vmatprep.subr.bf16.mxu0 %v8206_v11  ;;  %7333 = vmatprep.subr.bf16.mxu1 %v8206_v11 }
 0x4a6   : > { %vm3143_vm14 = vcmp.ge.s32.totalorder %v3141_v55, 0  ;;  %v3854_v55 = vadd.s32 3, %v8772_v47 }
 0x4a8   : > { %7310 = vmatpush3.bf16.msra.mxu0 %v7959_v57  ;;  %7334 = vmatpush3.bf16.msra.mxu1 %v7960_v58  ;;  %v7993_v57 = vld [vmem:[%s9182_s12 + $0x20] sm:$0xff]   ;;  %v3142_v58 = vadd.s32 4294967293, %v8772_v47  ;;  %vm3858_vm10 = vcmp.lt.s32.totalorder %v3854_v55, 8 }
 0x4a9   : > { %7311 = vmatprep.subr.bf16.mxu0 %v8206_v11  ;;  %7335 = vmatprep.subr.bf16.mxu1 %v8206_v11 }
 0x4aa   : > { %vm3144_vm15 = vcmp.ge.s32.totalorder %v3142_v58, 0 }
 0x4ac   : > { %7312 = vmatpush3.bf16.msra.mxu0 %v7961_v59  ;;  %7336 = vmatpush3.bf16.msra.mxu1 %v7962_v61  ;;  %v7994_v59 = vld [vmem:[%s9182_s12 + $0x28] sm:$0xff]  }
 0x4ad   : > { %7313 = vmatprep.subr.bf16.mxu0 %v8206_v11  ;;  %7361 = vmatprep.subr.bf16.mxu1 %v8206_v11 }
 0x4af   : > { %7338 = vmatmul.mubr.bf16.vlgmr.msra.gmra.mrb[36].mxu1 %v3371_v2 }
 0x4b0   : > { %7314 = vmatpush3.bf16.msra.mxu0 %v7963_v0  ;;  %7362 = vmatpush3.bf16.msra.mxu1 %v7964_v1 }
 0x4b1   : > { %7315 = vmatprep.subr.bf16.mxu0 %v8206_v11  ;;  %7363 = vmatprep.subr.bf16.mxu1 %v8206_v11 }
 0x4b2   : > { %7377 = vmatprep.mubr.msk.bf16.mxu1 %vm8207_vm0, %v8206_v11 }
 0x4b4   : > { %7316 = vmatpush3.bf16.msra.mxu0 %v7965_v3  ;;  %7364 = vmatpush3.bf16.msra.mxu1 %v7966_v4  ;;  %v7995_v3 = vld [vmem:[%s9182_s12 + $0x30] sm:$0xff]  }
 0x4b5   : > { %7341 = vmatprep.subr.bf16.mxu0 %v8206_v11  ;;  %7365 = vmatprep.subr.bf16.mxu1 %v8206_v11 }
 0x4b7   : > { %7318 = vmatmul.mubr.bf16.vlgmr.msra.gmra.mrb[32].mxu0 %v3246_v8  ;;  %v3353_v8 = vadd.s32 4294967294, %v8768_v45 }
 0x4b8   : > { %7342 = vmatpush3.bf16.msra.mxu0 %v7967_v6  ;;  %7366 = vmatpush3.bf16.msra.mxu1 %v7968_v7 }
 0x4b9   : > { %7343 = vmatprep.subr.bf16.mxu0 %v8206_v11  ;;  %7367 = vmatprep.subr.bf16.mxu1 %v8206_v11  ;;  %vm3355_vm2 = vcmp.ge.s32.totalorder %v3353_v8, 0 }
 0x4ba   : > { %7357 = vmatprep.mubr.msk.bf16.mxu0 %vm8207_vm0, %v8206_v11 }
 0x4bc   : > { %7344 = vmatpush3.bf16.msra.mxu0 %v7969_v9  ;;  %7368 = vmatpush3.bf16.msra.mxu1 %v7970_v14 }
 0x4bd   : > { %7345 = vmatprep.subr.bf16.mxu0 %v8206_v11  ;;  %7369 = vmatprep.subr.bf16.mxu1 %v8206_v11 }
 0x4c0   : > { %7346 = vmatpush3.bf16.msra.mxu0 %v7971_v15  ;;  %7370 = vmatpush3.bf16.msra.mxu1 %v7972_v16  ;;  %v3478_v15 = vadd.s32 4294967295, %v8768_v45  ;;  %v3354_v16 = vadd.s32 4294967294, %v8772_v47 }
 0x4c1   : > { %7347 = vmatprep.subr.bf16.mxu0 %v8206_v11  ;;  %7371 = vmatprep.subr.bf16.mxu1 %v8206_v11 }
 0x4c2   : > { %vm3480_vm3 = vcmp.ge.s32.totalorder %v3478_v15, 0  ;;  %vm3356_vm4 = vcmp.ge.s32.totalorder %v3354_v16, 0  ;;  %v7998_v15 = vld [vmem:[%s9190_s2 + $0xc8] sm:$0xff]   ;;  %v8000_v16 = vld [vmem:[%s9190_s2 + $0xd0] sm:$0xff]  }
 0x4c4   : > { %7348 = vmatpush3.bf16.msra.mxu0 %v7973_v17  ;;  %7372 = vmatpush3.bf16.msra.mxu1 %v7974_v18 }
 0x4c5   : > { %7349 = vmatprep.subr.bf16.mxu0 %v8206_v11  ;;  %7373 = vmatprep.subr.bf16.mxu1 %v8206_v11 }
 0x4c8   : > { %7350 = vmatpush3.bf16.msra.mxu0 %v7975_v19  ;;  %7374 = vmatpush3.bf16.msra.mxu1 %v7976_v20 }
 0x4c9   : > { %7351 = vmatprep.subr.bf16.mxu0 %v8206_v11  ;;  %7375 = vmatprep.subr.bf16.mxu1 %v8206_v11 }
 0x4cc   : > { %7352 = vmatpush3.bf16.msra.mxu0 %v7977_v21  ;;  %7376 = vmatpush3.bf16.msra.mxu1 %v7978_v22 }
 0x4cd   : > { %7353 = vmatprep.subr.bf16.mxu0 %v8206_v11  ;;  %7401 = vmatprep.subr.bf16.mxu1 %v8206_v11 }
 0x4cf   : > { %7378 = vmatmul.mubr.bf16.vlgmr.msra.gmra.mrb[40].mxu1 %v3621_v26 }
 0x4d0   : > { %7354 = vmatpush3.bf16.msra.mxu0 %v7979_v25  ;;  %7403 = vmatprep.mubr.msk.bf16.mxu1 %vm8207_vm0, %v8206_v11 }
 0x4d1   : > { %7355 = vmatprep.subr.bf16.mxu0 %v8206_v11 }
 0x4d4   : > { %7356 = vmatpush3.bf16.msra.mxu0 %v7980_v27 }
 0x4d5   : > { %7381 = vmatprep.subr.bf16.mxu0 %v8206_v11 }
 0x4d7   : > { %7358 = vmatmul.mubr.bf16.vlgmr.msra.gmra.mrb[36].mxu0 %v3496_v31 }
 0x4d8   : > { %7382 = vmatpush3.bf16.msra.mxu0 %v7981_v30  ;;  %7397 = vmatprep.mubr.msk.bf16.mxu0 %vm8207_vm0, %v8206_v11 }
 0x4d9   : > { %7383 = vmatprep.subr.bf16.mxu0 %v8206_v11 }
 0x4dc   : > { %7384 = vmatpush3.bf16.msra.mxu0 %v7982_v32  ;;  %v3603_v32 = vadd.s32 1, %v8768_v45 }
 0x4dd   : > { %7385 = vmatprep.subr.bf16.mxu0 %v8206_v11 }
 0x4de   : > { %vm3607_vm6 = vcmp.lt.s32.totalorder %v3603_v32, 8 }
 0x4e0   : > { %7386 = vmatpush3.bf16.msra.mxu0 %v7983_v33 }
 0x4e1   : > { %7387 = vmatprep.subr.bf16.mxu0 %v8206_v11 }
 0x4e4   : > { %7388 = vmatpush3.bf16.msra.mxu0 %v7984_v34 }
 0x4e5   : > { %7389 = vmatprep.subr.bf16.mxu0 %v8206_v11 }
 0x4e8   : > { %7390 = vmatpush3.bf16.msra.mxu0 %v7985_v35  ;;  %v3728_v35 = vadd.s32 2, %v8768_v45 }
 0x4e9   : > { %7391 = vmatprep.subr.bf16.mxu0 %v8206_v11 }
 0x4ea   : > { %vm3732_vm7 = vcmp.lt.s32.totalorder %v3728_v35, 8 }
 0x4ec   : > { %7392 = vmatpush3.bf16.msra.mxu0 %v7986_v36  ;;  %v3604_v36 = vadd.s32 1, %v8772_v47  ;;  %v3879_v47 = vld [vmem:[%s9189_s28] sm:$0xf]  ;;  %s9194_s28 = sld [smem:[#allocation21_spill]] }
 0x4ed   : > { %7393 = vmatprep.subr.bf16.mxu0 %v8206_v11 }
 0x4ee   : > { %vm3608_vm8 = vcmp.lt.s32.totalorder %v3604_v36, 8 }
 0x4f0   : > { %7394 = vmatpush3.bf16.msra.mxu0 %v7987_v37 }
 0x4f1   : > { %7395 = vmatprep.subr.bf16.mxu0 %v8206_v11 }
 0x4f4   : > { %7396 = vmatpush3.bf16.msra.mxu0 %v7988_v38 }
 0x4f5   : > { %7407 = vmatprep.subr.bf16.mxu0 %v8206_v11 }
 0x4f7   : > { %7398 = vmatmul.mubr.bf16.vlgmr.msra.gmra.mrb[40].mxu0 %v3746_v41 }
 0x4f8   : > { %7423 = vmatprep.mubr.msk.bf16.mxu0 %vm8207_vm0, %v8206_v11  ;;  %7408 = vmatpush3.bf16.msra.mxu0 %v7989_v42 }
 0x4f9   : > { %7409 = vmatprep.subr.bf16.mxu0 %v8206_v11 }
 0x4fc   : > { %7410 = vmatpush3.bf16.msra.mxu0 %v7990_v43 }
 0x4fd   : > { %7411 = vmatprep.subr.bf16.mxu0 %v8206_v11 }
 0x500   : > { %7412 = vmatpush3.bf16.msra.mxu0 %v7991_v44 }
 0x501   : > { %7413 = vmatprep.subr.bf16.mxu0 %v8206_v11 }
 0x504   : > { %7414 = vmatpush3.bf16.msra.mxu0 %v7992_v46 }
 0x505   : > { %7415 = vmatprep.subr.bf16.mxu0 %v8206_v11 }
 0x508   : > { %7416 = vmatpush3.bf16.msra.mxu0 %v7993_v57 }
 0x509   : > { %7417 = vmatprep.subr.bf16.mxu0 %v8206_v11 }
 0x50c   : > { %7418 = vmatpush3.bf16.msra.mxu0 %v7994_v59 }
 0x50d   : > { %7419 = vmatprep.subr.bf16.mxu0 %v8206_v11 }
 0x510   : > { %7420 = vmatpush3.bf16.msra.mxu0 %v7995_v3  ;;  %v7996_v3 = vld [vmem:[%s9182_s12 + $0x38] sm:$0xff]  }
 0x511   : > { %7421 = vmatprep.subr.bf16.mxu0 %v8206_v11 }
 0x514   : > { %7422 = vmatpush3.bf16.msra.mxu0 %v7996_v3 }
 0x515   : > { %7447 = vmatprep.subr.bf16.mxu0 %v8206_v11 }
 0x562   : > { %v3237_v50 = vpop.f32.mrb[32].mxu1 }
 0x563   : > { %v7299_v53 = vpop.f32.mrb[33].mxu1 }
 0x564   : > { %v3240_v54 = vpop.f32.mrb[34].mxu1 }
 0x565   : > { %v7300_v56 = vpop.f32.mrb[35].mxu1 }
 0x56a   : > { %v3134_v51 = vpop.f32.mrb[28].mxu0 }
 0x56b   : > { %v3153_v61 = vsel %vm3143_vm14, %v3134_v51, 0.0  ;;  %v7279_v62 = vpop.f32.mrb[29].mxu0 }
 0x56c   : > { %v3238_v63 = vadd.f32 %v3237_v50, %v3153_v61  ;;  %v3137_v0 = vpop.f32.mrb[30].mxu0  ;;  %v6414_v61 = vld [vmem:[%s8277_s30] ss:$0 sm:$0xff] }
 0x56d   : > { %v3154_v1 = vsel %vm3144_vm15, %v3137_v0, 0.0  ;;  %v7280_v2 = vpop.f32.mrb[31].mxu0 }
 0x56e   : > { %v3241_v4 = vadd.f32 %v3240_v54, %v3154_v1  ;;  %v3853_v54 = vadd.s32 3, %v8768_v45 }
 0x570   : > { %vm3857_vm9 = vcmp.lt.s32.totalorder %v3853_v54, 8  ;;  %v8014_v54 = vld [vmem:[%s9190_s2 + $0x88] sm:$0xff]  }
 0x582   : > { %v3471_v5 = vpop.f32.mrb[36].mxu1 }
 0x583   : > { %v7339_v6 = vpop.f32.mrb[37].mxu1  ;;  %v3490_v22 = vsel %vm3480_vm3, %v3471_v5, 0.0  ;;  %vm4878_vm3 = vcmask 1043456  }
 0x584   : > { %v3474_v7 = vpop.f32.mrb[38].mxu1  ;;  %v7997_v6 = vld [vmem:[%s9190_s2 + $0xc0] sm:$0xff]  }
 0x585   : > { %v3491_v9 = vsel %vm3481_vm1, %v3474_v7, 0.0  ;;  %v7340_v14 = vpop.f32.mrb[39].mxu1 }
 0x58a   : > { %v3346_v17 = vpop.f32.mrb[32].mxu0 }
 0x58b   : > { %v3365_v18 = vsel %vm3355_vm2, %v3346_v17, 0.0  ;;  %v7319_v19 = vpop.f32.mrb[33].mxu0  ;;  %v8002_v17 = vld [vmem:[%s9190_s2 + $0xd8] sm:$0xff]  }
 0x58c   : > { %v3367_v20 = vadd.f32 %v3365_v18, %v3238_v63  ;;  %v3349_v21 = vpop.f32.mrb[34].mxu0  ;;  %v8003_v18 = vld [vmem:[%s9190_s2 + $0x10] sm:$0xff]   ;;  %v8004_v19 = vld [vmem:[%s9190_s2 + $0xe0] sm:$0xff]  }
 0x58d   : > { %v3366_v23 = vsel %vm3356_vm4, %v3349_v21, 0.0  ;;  %v7320_v24 = vpop.f32.mrb[35].mxu0  ;;  %v8006_v21 = vld [vmem:[%s9190_s2 + $0xe8] sm:$0xff]   ;;  %vm4874_vm4 = vcmask 64512  }
 0x58e   : > { %v3368_v25 = vadd.f32 %v3366_v23, %v3241_v4  ;;  %v3492_v26 = vadd.f32 %v3490_v22, %v3367_v20  ;;  %v7999_v4 = vld [vmem:[%s9190_s2] sm:$0xff]   ;;  %v8005_v20 = vld [vmem:[%s9190_s2 + $0x18] sm:$0xff]   ;;  %v8008_v23 = vld [vmem:[%s9190_s2 + $0xf0] sm:$0xff]  }
 0x58f   : > { %v8007_v22 = vld [vmem:[%s9190_s2 + $0x20] sm:$0xff]   ;;  %v8009_v24 = vld [vmem:[%s9190_s2 + $0x28] sm:$0xff]  }
 0x590   : > { %v3493_v27 = vadd.f32 %v3491_v9, %v3368_v25  ;;  %v8010_v25 = vld [vmem:[%s9190_s2 + $0xf8] sm:$0xff]  }
 0x5a2   : > { %v3721_v29 = vpop.f32.mrb[40].mxu1 }
 0x5a3   : > { %v7379_v30 = vpop.f32.mrb[41].mxu1  ;;  %v3740_v42 = vsel %vm3732_vm7, %v3721_v29, 0.0  ;;  %v6416_v29 = vld [vmem:[%s9192_s18] ss:$0 sm:$0xff]  ;;  %s9196_s18 = sld [smem:[#allocation26_spill]] }
 0x5a4   : > { %v3724_v31 = vpop.f32.mrb[42].mxu1  ;;  %v4040_v30 = vrot.slane %v4036_v28, %v8526_v49 }
 0x5a5   : > { %v3741_v33 = vsel %vm3733_vm5, %v3724_v31, 0.0  ;;  %v7380_v34 = vpop.f32.mrb[43].mxu1  ;;  %vm5055_vm5 = vcmask 519168  }
 0x5aa   : > { %v3596_v37 = vpop.f32.mrb[36].mxu0 }
 0x5ab   : > { %v3615_v38 = vsel %vm3607_vm6, %v3596_v37, 0.0  ;;  %v7359_v39 = vpop.f32.mrb[37].mxu0  ;;  %vm5114_vm6 = vcmask 523264  }
 0x5ac   : > { %v3617_v40 = vadd.f32 %v3615_v38, %v3492_v26  ;;  %v3599_v41 = vpop.f32.mrb[38].mxu0  ;;  %v8011_v26 = vld [vmem:[%s9190_s2 + $0x30] sm:$0xff]   ;;  %v4051_v39 = vrot.slane %v4036_v28, %v8535_v60 }
 0x5ad   : > { %v3616_v43 = vsel %vm3608_vm8, %v3599_v41, 0.0  ;;  %v7360_v44 = vpop.f32.mrb[39].mxu0 }
 0x5ae   : > { %v3618_v46 = vadd.f32 %v3616_v43, %v3493_v27  ;;  %v3742_v50 = vadd.f32 %v3740_v42, %v3617_v40  ;;  %v8013_v27 = vld [vmem:[%s9190_s2 + $0x38] sm:$0xff]  }
 0x5b0   : > { %v3743_v53 = vadd.f32 %v3741_v33, %v3618_v46  ;;  %v4045_v33 = vrot.slane %v4036_v28, %v8530_v52 }
 0x5ca   : > { %v3846_v56 = vpop.f32.mrb[40].mxu0 }
 0x5cb   : > { %v3865_v57 = vsel %vm3857_vm9, %v3846_v56, 0.0  ;;  %v7399_v58 = vpop.f32.mrb[41].mxu0  ;;  %v8015_v56 = vld [vmem:[%s9190_s2 + $0x40] sm:$0xff]   ;;  %vm5768_vm9 = vcmask 1041408  }
 0x5cc   : > { %v3867_v59 = vadd.f32 %v3865_v57, %v3742_v50  ;;  %v3849_v51 = vpop.f32.mrb[42].mxu0  ;;  %v8012_v50 = vld [vmem:[%s9190_s2 + $0x80] sm:$0xff]   ;;  %v8016_v57 = vld [vmem:[%s9190_s2 + $0x90] sm:$0xff]  }
 0x5cd   : > { %v3866_v62 = vsel %vm3858_vm10, %v3849_v51, 0.0  ;;  %v7400_v63 = vpop.f32.mrb[43].mxu0  ;;  %v8018_v51 = vld [vmem:[%s9190_s2 + $0x98] sm:$0xff]   ;;  %vm5764_vm10 = vcmask 31744  }
 0x5ce   : > { %v3868_v0 = vadd.f32 %v3866_v62, %v3743_v53  ;;  %v3876_v1 = vadd.f32 %v6414_v61, %v3867_v59  ;;  %v8017_v59 = vld [vmem:[%s9190_s2 + $0x48] sm:$0xff]   ;;  %v8020_v62 = vld [vmem:[%s9190_s2 + $0xa0] sm:$0xff]   ;;  %v8021_v63 = vld [vmem:[%s9190_s2 + $0x58] sm:$0xff]  }
 0x5d0   : > { %v3877_v2 = vadd.f32 %v6414_v61, %v3868_v0  ;;  %v8019_v61 = vld [vmem:[%s9190_s2 + $0x50] sm:$0xff]   ;;  %v8022_v0 = vld [vmem:[%s9190_s2 + $0xa8] sm:$0xff]  }
 0x5d2   : > { %v3878_v45 = vpack.c.bf16 %v3877_v2, %v3876_v1  ;;  %v8023_v1 = vld [vmem:[%s9190_s2 + $0x60] sm:$0xff]   ;;  %v8024_v2 = vld [vmem:[%s9190_s2 + $0xb0] sm:$0xff]  }
 0x5d4   : > { %7402 = vmatpush3.bf16.msra.mxu1 %v3878_v45  ;;  %v8025_v45 = vld [vmem:[%s9190_s2 + $0x68] sm:$0xff]  }
 0x5d5   : > { %7427 = vmatprep.subr.bf16.mxu1 %v8206_v11 }
 0x5d7   : > { %7404 = vmatmul.mubr.msk.bf16.vlgmr.msra.gmra.mrb[44].mxu1 %vm3880_vm11, %v3879_v47  ;;  %v8026_v47 = vld [vmem:[%s9190_s2 + $0xb8] sm:$0xff]  }
 0x5d8   : > { %7443 = vmatprep.mubr.msk.bf16.mxu1 %vm8207_vm0, %v8206_v11  ;;  %7428 = vmatpush3.bf16.msra.mxu1 %v7999_v4  ;;  %v8027_v4 = vld [vmem:[%s9190_s2 + $0x70] sm:$0xff]  }
 0x5d9   : > { %7429 = vmatprep.subr.bf16.mxu1 %v8206_v11 }
 0x5dc   : > { %7430 = vmatpush3.bf16.msra.mxu1 %v8001_v13  ;;  %v8028_v13 = vld [vmem:[%s9190_s2 + $0x140] sm:$0xff]  }
 0x5dd   : > { %7431 = vmatprep.subr.bf16.mxu1 %v8206_v11 }
 0x5e0   : > { %7432 = vmatpush3.bf16.msra.mxu1 %v8003_v18  ;;  %v8035_v18 = vld [vmem:[%s9190_s2 + $0x110] sm:$0xff]  }
 0x5e1   : > { %7433 = vmatprep.subr.bf16.mxu1 %v8206_v11 }
 0x5e4   : > { %7434 = vmatpush3.bf16.msra.mxu1 %v8005_v20  ;;  %v8037_v20 = vld [vmem:[%s9190_s2 + $0x118] sm:$0xff]  }
 0x5e5   : > { %7435 = vmatprep.subr.bf16.mxu1 %v8206_v11 }
 0x5e8   : > { %7436 = vmatpush3.bf16.msra.mxu1 %v8007_v22  ;;  %v8039_v22 = vld [vmem:[%s9190_s2 + $0x120] sm:$0xff]  }
 0x5e9   : > { %7437 = vmatprep.subr.bf16.mxu1 %v8206_v11 }
 0x5ec   : > { %7438 = vmatpush3.bf16.msra.mxu1 %v8009_v24  ;;  %v8041_v24 = vld [vmem:[%s9190_s2 + $0x128] sm:$0xff]  }
 0x5ed   : > { %7439 = vmatprep.subr.bf16.mxu1 %v8206_v11 }
 0x5f0   : > { %7440 = vmatpush3.bf16.msra.mxu1 %v8011_v26 }
 0x5f1   : > { %7441 = vmatprep.subr.bf16.mxu1 %v8206_v11 }
 0x5f4   : > { %7442 = vmatpush3.bf16.msra.mxu1 %v8013_v27  ;;  %v8043_v27 = vld [vmem:[%s9190_s2 + $0x130] sm:$0xff]  }
 0x5f5   : > { %7467 = vmatprep.subr.bf16.mxu1 %v8206_v11 }
 0x6aa   : > { %v3918_v5 = vpop.f32.mrb[44].mxu1 }
 0x6ab   : > { %v3924_v7 = vpack.c.bf16 %v3918_v5, %v3918_v5  ;;  %v7405_v8 = vpop.f32.mrb[45].mxu1 }
 0x6ac   : > { %v3921_v9 = vpop.f32.mrb[46].mxu1 }
 0x6ad   : > { %v7406_v14 = vpop.f32.mrb[47].mxu1  ;;  %7424 = vmatmul.mubr.bf16.vlgmr.msra.gmra.mrb[44].mxu0 %v3924_v7  ;;  %v8030_v7 = vld [vmem:[%s9190_s2 + $0x148] sm:$0xff]   ;;  %v8031_v9 = vld [vmem:[%s9190_s2 + $0x100] sm:$0xff]  }
 0x6ae   : > { %7448 = vmatpush3.bf16.msra.mxu0 %v7997_v6  ;;  %7463 = vmatprep.mubr.msk.bf16.mxu0 %vm8207_vm0, %v8206_v11  ;;  %v8029_v6 = vld [vmem:[%s9190_s2 + $0x78] sm:$0xff]   ;;  %v8032_v14 = vld [vmem:[%s9190_s2 + $0x150] sm:$0xff]  }
 0x6af   : > { %7449 = vmatprep.subr.bf16.mxu0 %v8206_v11 }
 0x6b2   : > { %7450 = vmatpush3.bf16.msra.mxu0 %v7998_v15 }
 0x6b3   : > { %7451 = vmatprep.subr.bf16.mxu0 %v8206_v11 }
 0x6b6   : > { %7452 = vmatpush3.bf16.msra.mxu0 %v8000_v16  ;;  %v8033_v16 = vld [vmem:[%s9190_s2 + $0x108] sm:$0xff]  }
 0x6b7   : > { %7453 = vmatprep.subr.bf16.mxu0 %v8206_v11 }
 0x6ba   : > { %7454 = vmatpush3.bf16.msra.mxu0 %v8002_v17  ;;  %v8034_v17 = vld [vmem:[%s9190_s2 + $0x158] sm:$0xff]  }
 0x6bb   : > { %7455 = vmatprep.subr.bf16.mxu0 %v8206_v11 }
 0x6be   : > { %7456 = vmatpush3.bf16.msra.mxu0 %v8004_v19  ;;  %v8036_v19 = vld [vmem:[%s9190_s2 + $0x160] sm:$0xff]  }
 0x6bf   : > { %7457 = vmatprep.subr.bf16.mxu0 %v8206_v11 }
 0x6c2   : > { %7458 = vmatpush3.bf16.msra.mxu0 %v8006_v21  ;;  %v8038_v21 = vld [vmem:[%s9190_s2 + $0x168] sm:$0xff]  }
 0x6c3   : > { %7459 = vmatprep.subr.bf16.mxu0 %v8206_v11 }
 0x6c6   : > { %7460 = vmatpush3.bf16.msra.mxu0 %v8008_v23  ;;  %v8040_v23 = vld [vmem:[%s9190_s2 + $0x170] sm:$0xff]  }
 0x6c7   : > { %7461 = vmatprep.subr.bf16.mxu0 %v8206_v11 }
 0x6ca   : > { %7462 = vmatpush3.bf16.msra.mxu0 %v8010_v25  ;;  %v8042_v25 = vld [vmem:[%s9190_s2 + $0x178] sm:$0xff]  }
 0x6cb   : > { %7487 = vmatprep.subr.bf16.mxu0 %v8206_v11 }
 0x780   : > { %v4030_v31 = vpop.f32.mrb[44].mxu0 }
 0x781   : > { %v4031_v32 = vadd.f32 %v6416_v29, %v4030_v31  ;;  %v7425_v34 = vpop.f32.mrb[45].mxu0  ;;  %v8044_v29 = vld [vmem:[%s9190_s2 + $0x138] sm:$0xff]   ;;  %v8045_v31 = vld [vmem:[%s9190_s2 + $0x180] sm:$0xff]  }
 0x782   : > { %v4033_v35 = vpop.f32.mrb[46].mxu0  ;;  %v8047_v34 = vld [vmem:[%s9190_s2 + $0x190] sm:$0xff]  }
 0x783   : > { %v4041_v36 = vmul.f32 %v4040_v30, %v4031_v32  ;;  %v7426_v37 = vpop.f32.mrb[47].mxu0  ;;  %v4053_v41 = vmax.f32 %v4031_v32, 0.0  ;;  %v8048_v35 = vld [vmem:[%s9190_s2 + $0x198] sm:$0xff]  }
 0x784   : > { %v8050_v37 = vld [vmem:[%s9190_s2 + $0x1a8] sm:$0xff]  }
 0x785   : > { %v4046_v38 = vadd.f32 %v4045_v33, %v4041_v36  ;;  %v4054_v43 = vmul.f32 %v4053_v41, %v8538_v10  ;;  %v8046_v33 = vld [vmem:[%s9190_s2 + $0x188] sm:$0xff]   ;;  %v8049_v36 = vld [vmem:[%s9190_s2 + $0x1a0] sm:$0xff]  }
 0x787   : > { %v4047_v40 = vmul.f32 %v4046_v38, %v4031_v32  ;;  %v8051_v38 = vld [vmem:[%s9190_s2 + $0x1b0] sm:$0xff]  }
 0x789   : > { %v4052_v42 = vadd.f32 %v4051_v39, %v4047_v40  ;;  %v8052_v39 = vld [vmem:[%s9190_s2 + $0x1b8] sm:$0xff]   ;;  %s9201_s2 = sld [smem:[#allocation27_spill]] }
 0x78b   : > { %v4055_v44 = vmul.f32 %v4052_v42, %v8540_v12  ;;  %v8053_v42 = vld [vmem:[%s9193_s27] sm:$0xff]  }
 0x78d   : > { %v4056_v46 = vadd.f32 %v4055_v44, %v4054_v43  ;;  %v8054_v43 = vld [vmem:[%s9193_s27 + $0x8] sm:$0xff]   ;;  %v8055_v44 = vld [vmem:[%s9193_s27 + $0x10] sm:$0xff]  }
 0x78f   : > { %4057 = vst [vmem:[#allocation4 + $0x3] sm:$0xff] %v4056_v46  ;;  %v4058_v53 = vpack.c.bf16 %v4056_v46, %v4056_v46  ;;  %v4080_v46 = vand.u32 3, %v8523_v48 }
 0x791   : > { %7464 = vmatmul.mubr.bf16.vlgmr.msra.gmra.mrb[48].mxu0 %v4058_v53 }
 0x792   : > { %7488 = vmatpush3.bf16.msra.mxu0 %v8012_v50  ;;  %7503 = vmatprep.mubr.msk.bf16.mxu0 %vm8207_vm0, %v8206_v11  ;;  %v8056_v50 = vld [vmem:[%s9193_s27 + $0x18] sm:$0xff]  }
 0x793   : > { %7489 = vmatprep.subr.bf16.mxu0 %v8206_v11 }
 0x796   : > { %7490 = vmatpush3.bf16.msra.mxu0 %v8014_v54  ;;  %v4088_v55 = vld [vmem:[#allocation4] sm:$0xff] }
 0x797   : > { %7491 = vmatprep.subr.bf16.mxu0 %v8206_v11  ;;  %v4089_v58 = vpack.c.bf16 %v4088_v55, %v4088_v55  ;;  %v4404_v3 = vld [vmem:[#allocation4 + $0x2] sm:$0xff] }
 0x798   : > { %v4405_v5 = vpack.c.bf16 %v4404_v3, %v4404_v3  ;;  %v4289_v8 = vld [vmem:[#allocation4 + $0x1] sm:$0xff] }
 0x799   : > { %7444 = vmatmul.mubr.bf16.vlgmr.msra.gmra.mrb[48].mxu1 %v4089_v58  ;;  %v4290_v15 = vpack.c.bf16 %v4289_v8, %v4289_v8  ;;  %v4634_v26 = vld [vmem:[#allocation4 + $0x5] sm:$0xff] }
 0x79a   : > { %7468 = vmatpush3.bf16.msra.mxu1 %v8015_v56  ;;  %7492 = vmatpush3.bf16.msra.mxu0 %v8016_v57  ;;  %v4635_v28 = vpack.c.bf16 %v4634_v26, %v4634_v26  ;;  %v4519_v30 = vld [vmem:[#allocation4 + $0x4] sm:$0xff]  ;;  %v4194_v56 = vadd.s32 4294967293, %v4080_v46 }
 0x79b   : > { %7469 = vmatprep.subr.bf16.mxu1 %v8206_v11  ;;  %7493 = vmatprep.subr.bf16.mxu0 %v8206_v11  ;;  %v4520_v32 = vpack.c.bf16 %v4519_v30, %v4519_v30  ;;  %v4749_v40 = vld [vmem:[#allocation4 + $0x6] sm:$0xff] }
 0x79c   : > { %7483 = vmatprep.mubr.msk.bf16.mxu1 %vm8207_vm0, %v8206_v11  ;;  %v4750_v41 = vpack.c.bf16 %v4749_v40, %v4749_v40  ;;  %v8057_v57 = vld [vmem:[%s9193_s27 + $0x20] sm:$0xff]   ;;  %vm4195_vm12 = vcmp.ge.s32.totalorder %v4194_v56, 0 }
 0x79d   : > { %v8061_v56 = vld [vmem:[%s9196_s18 + $0x40] sm:$0xff]  }
 0x79e   : > { %7470 = vmatpush3.bf16.msra.mxu1 %v8017_v59  ;;  %7494 = vmatpush3.bf16.msra.mxu0 %v8018_v51  ;;  %v8058_v59 = vld [vmem:[%s9193_s27 + $0x28] sm:$0xff]  }
 0x79f   : > { %7471 = vmatprep.subr.bf16.mxu1 %v8206_v11  ;;  %7495 = vmatprep.subr.bf16.mxu0 %v8206_v11 }
 0x7a2   : > { %7472 = vmatpush3.bf16.msra.mxu1 %v8019_v61  ;;  %7496 = vmatpush3.bf16.msra.mxu0 %v8020_v62 }
 0x7a3   : > { %7473 = vmatprep.subr.bf16.mxu1 %v8206_v11  ;;  %7497 = vmatprep.subr.bf16.mxu0 %v8206_v11 }
 0x7a6   : > { %7474 = vmatpush3.bf16.msra.mxu1 %v8021_v63  ;;  %7498 = vmatpush3.bf16.msra.mxu0 %v8022_v0 }
 0x7a7   : > { %7475 = vmatprep.subr.bf16.mxu1 %v8206_v11  ;;  %7499 = vmatprep.subr.bf16.mxu0 %v8206_v11 }
 0x7aa   : > { %7476 = vmatpush3.bf16.msra.mxu1 %v8023_v1  ;;  %7500 = vmatpush3.bf16.msra.mxu0 %v8024_v2  ;;  %v8059_v1 = vld [vmem:[%s9193_s27 + $0x30] sm:$0xff]  }
 0x7ab   : > { %7477 = vmatprep.subr.bf16.mxu1 %v8206_v11  ;;  %7501 = vmatprep.subr.bf16.mxu0 %v8206_v11 }
 0x7ae   : > { %7478 = vmatpush3.bf16.msra.mxu1 %v8025_v45  ;;  %7502 = vmatpush3.bf16.msra.mxu0 %v8026_v47 }
 0x7af   : > { %7479 = vmatprep.subr.bf16.mxu1 %v8206_v11  ;;  %7527 = vmatprep.subr.bf16.mxu0 %v8206_v11 }
 0x7b1   : > { %7504 = vmatmul.mubr.bf16.vlgmr.msra.gmra.mrb[52].mxu0 %v4405_v5  ;;  %v4511_v5 = vadd.s32 4294967295, %v4080_v46 }
 0x7b2   : > { %7480 = vmatpush3.bf16.msra.mxu1 %v8027_v4  ;;  %7528 = vmatpush3.bf16.msra.mxu0 %v8028_v13  ;;  %v4396_v4 = vadd.s32 4294967294, %v4080_v46 }
 0x7b3   : > { %7481 = vmatprep.subr.bf16.mxu1 %v8206_v11  ;;  %7529 = vmatprep.subr.bf16.mxu0 %v8206_v11  ;;  %vm4512_vm14 = vcmp.ge.s32.totalorder %v4511_v5, 0 }
 0x7b4   : > { %7543 = vmatprep.mubr.msk.bf16.mxu0 %vm8207_vm0, %v8206_v11  ;;  %vm4397_vm13 = vcmp.ge.s32.totalorder %v4396_v4, 0 }
 0x7b6   : > { %7482 = vmatpush3.bf16.msra.mxu1 %v8029_v6  ;;  %7530 = vmatpush3.bf16.msra.mxu0 %v8030_v7 }
 0x7b7   : > { %7507 = vmatprep.subr.bf16.mxu1 %v8206_v11  ;;  %7531 = vmatprep.subr.bf16.mxu0 %v8206_v11 }
 0x7b9   : > { %7484 = vmatmul.mubr.bf16.vlgmr.msra.gmra.mrb[52].mxu1 %v4290_v15 }
 0x7ba   : > { %7508 = vmatpush3.bf16.msra.mxu1 %v8031_v9  ;;  %7532 = vmatpush3.bf16.msra.mxu0 %v8032_v14 }
 0x7bb   : > { %7509 = vmatprep.subr.bf16.mxu1 %v8206_v11  ;;  %7533 = vmatprep.subr.bf16.mxu0 %v8206_v11 }
 0x7bc   : > { %7523 = vmatprep.mubr.msk.bf16.mxu1 %vm8207_vm0, %v8206_v11 }
 0x7be   : > { %7510 = vmatpush3.bf16.msra.mxu1 %v8033_v16  ;;  %7534 = vmatpush3.bf16.msra.mxu0 %v8034_v17 }
 0x7bf   : > { %7511 = vmatprep.subr.bf16.mxu1 %v8206_v11  ;;  %7535 = vmatprep.subr.bf16.mxu0 %v8206_v11 }
 0x7c2   : > { %7512 = vmatpush3.bf16.msra.mxu1 %v8035_v18  ;;  %7536 = vmatpush3.bf16.msra.mxu0 %v8036_v19 }
 0x7c3   : > { %7513 = vmatprep.subr.bf16.mxu1 %v8206_v11  ;;  %7537 = vmatprep.subr.bf16.mxu0 %v8206_v11 }
 0x7c6   : > { %7514 = vmatpush3.bf16.msra.mxu1 %v8037_v20  ;;  %7538 = vmatpush3.bf16.msra.mxu0 %v8038_v21  ;;  %v4626_v21 = vadd.s32 1, %v4080_v46 }
 0x7c7   : > { %7515 = vmatprep.subr.bf16.mxu1 %v8206_v11  ;;  %7539 = vmatprep.subr.bf16.mxu0 %v8206_v11 }
 0x7c8   : > { %vm4628_vm15 = vcmp.lt.s32.totalorder %v4626_v21, 4 }
 0x7ca   : > { %7516 = vmatpush3.bf16.msra.mxu1 %v8039_v22  ;;  %7540 = vmatpush3.bf16.msra.mxu0 %v8040_v23  ;;  %v4741_v23 = vadd.s32 2, %v4080_v46 }
 0x7cb   : > { %7517 = vmatprep.subr.bf16.mxu1 %v8206_v11  ;;  %7541 = vmatprep.subr.bf16.mxu0 %v8206_v11 }
 0x7cc   : > { %vm4743_vm1 = vcmp.lt.s32.totalorder %v4741_v23, 4 }
 0x7ce   : > { %7518 = vmatpush3.bf16.msra.mxu1 %v8041_v24  ;;  %7542 = vmatpush3.bf16.msra.mxu0 %v8042_v25 }
 0x7cf   : > { %7519 = vmatprep.subr.bf16.mxu1 %v8206_v11  ;;  %7567 = vmatprep.subr.bf16.mxu0 %v8206_v11 }
 0x7d1   : > { %7544 = vmatmul.mubr.bf16.vlgmr.msra.gmra.mrb[56].mxu0 %v4635_v28 }
 0x7d2   : > { %7520 = vmatpush3.bf16.msra.mxu1 %v8043_v27  ;;  %7569 = vmatprep.mubr.msk.bf16.mxu0 %vm8207_vm0, %v8206_v11 }
 0x7d3   : > { %7521 = vmatprep.subr.bf16.mxu1 %v8206_v11 }
 0x7d6   : > { %7522 = vmatpush3.bf16.msra.mxu1 %v8044_v29 }
 0x7d7   : > { %7547 = vmatprep.subr.bf16.mxu1 %v8206_v11 }
 0x7d9   : > { %7524 = vmatmul.mubr.bf16.vlgmr.msra.gmra.mrb[56].mxu1 %v4520_v32  ;;  %v4856_v32 = vadd.s32 3, %v4080_v46 }
 0x7da   : > { %7548 = vmatpush3.bf16.msra.mxu1 %v8045_v31  ;;  %7563 = vmatprep.mubr.msk.bf16.mxu1 %vm8207_vm0, %v8206_v11 }
 0x7db   : > { %7549 = vmatprep.subr.bf16.mxu1 %v8206_v11  ;;  %vm4858_vm2 = vcmp.lt.s32.totalorder %v4856_v32, 4 }
 0x7de   : > { %7550 = vmatpush3.bf16.msra.mxu1 %v8046_v33 }
 0x7df   : > { %7551 = vmatprep.subr.bf16.mxu1 %v8206_v11 }
 0x7e2   : > { %7552 = vmatpush3.bf16.msra.mxu1 %v8047_v34 }
 0x7e3   : > { %7553 = vmatprep.subr.bf16.mxu1 %v8206_v11 }
 0x7e6   : > { %7554 = vmatpush3.bf16.msra.mxu1 %v8048_v35  ;;  %v6577_v35 = vld [vmem:[%s9194_s28] ss:$0 sm:$0xff]  ;;  %s9197_s28 = sld [smem:[#allocation25_spill]] }
 0x7e7   : > { %7555 = vmatprep.subr.bf16.mxu1 %v8206_v11 }
 0x7ea   : > { %7556 = vmatpush3.bf16.msra.mxu1 %v8049_v36 }
 0x7eb   : > { %7557 = vmatprep.subr.bf16.mxu1 %v8206_v11 }
 0x7ee   : > { %7558 = vmatpush3.bf16.msra.mxu1 %v8050_v37 }
 0x7ef   : > { %7559 = vmatprep.subr.bf16.mxu1 %v8206_v11 }
 0x7f2   : > { %7560 = vmatpush3.bf16.msra.mxu1 %v8051_v38 }
 0x7f3   : > { %7561 = vmatprep.subr.bf16.mxu1 %v8206_v11 }
 0x7f6   : > { %7562 = vmatpush3.bf16.msra.mxu1 %v8052_v39 }
 0x7f7   : > { %7573 = vmatprep.subr.bf16.mxu1 %v8206_v11 }
 0x7f9   : > { %7564 = vmatmul.mubr.bf16.vlgmr.msra.gmra.mrb[60].mxu1 %v4750_v41 }
 0x7fa   : > { %7589 = vmatprep.mubr.msk.bf16.mxu1 %vm8207_vm0, %v8206_v11  ;;  %7574 = vmatpush3.bf16.msra.mxu1 %v8053_v42 }
 0x7fb   : > { %7575 = vmatprep.subr.bf16.mxu1 %v8206_v11 }
 0x7fe   : > { %7576 = vmatpush3.bf16.msra.mxu1 %v8054_v43  ;;  %v4873_v43 = vld [vmem:[%s9195_s5] sm:$0x3]  ;;  %s9198_s5 = sld [smem:[#allocation24_spill]] }
 0x7ff   : > { %7577 = vmatprep.subr.bf16.mxu1 %v8206_v11 }
 0x802   : > { %7578 = vmatpush3.bf16.msra.mxu1 %v8055_v44  ;;  %v8060_v44 = vld [vmem:[%s9193_s27 + $0x38] sm:$0xff]  }
 0x803   : > { %7579 = vmatprep.subr.bf16.mxu1 %v8206_v11 }
 0x806   : > { %7580 = vmatpush3.bf16.msra.mxu1 %v8056_v50 }
 0x807   : > { %7581 = vmatprep.subr.bf16.mxu1 %v8206_v11 }
 0x80a   : > { %7582 = vmatpush3.bf16.msra.mxu1 %v8057_v57  ;;  %v8062_v57 = vld [vmem:[%s9196_s18 + $0x80] sm:$0xff]  }
 0x80b   : > { %7583 = vmatprep.subr.bf16.mxu1 %v8206_v11 }
 0x80e   : > { %7584 = vmatpush3.bf16.msra.mxu1 %v8058_v59  ;;  %v8064_v59 = vld [vmem:[%s9196_s18 + $0x88] sm:$0xff]  }
 0x80f   : > { %7585 = vmatprep.subr.bf16.mxu1 %v8206_v11 }
 0x812   : > { %7586 = vmatpush3.bf16.msra.mxu1 %v8059_v1  ;;  %v6579_v1 = vld [vmem:[%s9198_s5] ss:$0 sm:$0xff]  ;;  %s9200_s5 = sld [smem:[#allocation31_spill]] }
 0x813   : > { %7587 = vmatprep.subr.bf16.mxu1 %v8206_v11 }
 0x816   : > { %7588 = vmatpush3.bf16.msra.mxu1 %v8060_v44 }
 0x817   : > { %7617 = vmatprep.subr.bf16.mxu1 %v8206_v11 }
 0x818   : > { %v8079_v32 = vld [vmem:[%s9200_s5 + $0x80] sm:$0xff]  }
 0x864   : > { %v4283_v53 = vpop.f32.mrb[48].mxu0 }
 0x865   : > { %v7465_v54 = vpop.f32.mrb[49].mxu0 }
 0x866   : > { %v4286_v55 = vpop.f32.mrb[50].mxu0 }
 0x867   : > { %v7466_v58 = vpop.f32.mrb[51].mxu0 }
 0x868   : > { %v8063_v58 = vld [vmem:[%s9196_s18 + $0x48] sm:$0xff]  }
 0x86c   : > { %v4188_v51 = vpop.f32.mrb[48].mxu1 }
 0x86d   : > { %v4200_v61 = vsel %vm4195_vm12, %v4188_v51, 0.0  ;;  %v7445_v62 = vpop.f32.mrb[49].mxu1  ;;  %v8065_v51 = vld [vmem:[%s9196_s18 + $0x50] sm:$0xff]  }
 0x86e   : > { %v4284_v63 = vadd.f32 %v4283_v53, %v4200_v61  ;;  %v4191_v0 = vpop.f32.mrb[50].mxu1  ;;  %v8066_v61 = vld [vmem:[%s9196_s18 + $0x90] sm:$0xff]   ;;  %v8067_v62 = vld [vmem:[%s9196_s18 + $0x58] sm:$0xff]  }
 0x86f   : > { %v7446_v2 = vpop.f32.mrb[51].mxu1  ;;  %v5034_v0 = vld [vmem:[%s9197_s28] sm:$0x7]  ;;  %s9199_s28 = sld [smem:[#allocation28_spill]] }
 0x870   : > { %v5038_v2 = vrot.slane %v5034_v0, %v8526_v49 }
 0x884   : > { %v4505_v45 = vpop.f32.mrb[52].mxu0 }
 0x885   : > { %v7505_v47 = vpop.f32.mrb[53].mxu0  ;;  %v4517_v15 = vsel %vm4512_vm14, %v4505_v45, 0.0 }
 0x886   : > { %v4508_v3 = vpop.f32.mrb[54].mxu0 }
 0x887   : > { %v7506_v13 = vpop.f32.mrb[55].mxu0  ;;  %v5043_v3 = vrot.slane %v5034_v0, %v8530_v52 }
 0x88c   : > { %v4390_v6 = vpop.f32.mrb[52].mxu1 }
 0x88d   : > { %v4402_v7 = vsel %vm4397_vm13, %v4390_v6, 0.0  ;;  %v7485_v8 = vpop.f32.mrb[53].mxu1 }
 0x88e   : > { %v4403_v9 = vadd.f32 %v4402_v7, %v4284_v63  ;;  %v4393_v14 = vpop.f32.mrb[54].mxu1  ;;  %v8068_v63 = vld [vmem:[%s9196_s18 + $0x98] sm:$0xff]   ;;  %v5049_v8 = vrot.slane %v5034_v0, %v8535_v60 }
 0x88f   : > { %v7486_v16 = vpop.f32.mrb[55].mxu1  ;;  %v8082_v0 = vld [vmem:[%s9200_s5 + $0xd8] sm:$0xff]  }
 0x890   : > { %v4518_v17 = vadd.f32 %v4517_v15, %v4403_v9 }
 0x8a4   : > { %v4735_v18 = vpop.f32.mrb[56].mxu0 }
 0x8a5   : > { %v7545_v19 = vpop.f32.mrb[57].mxu0  ;;  %v4747_v29 = vsel %vm4743_vm1, %v4735_v18, 0.0 }
 0x8a6   : > { %v4738_v20 = vpop.f32.mrb[58].mxu0 }
 0x8a7   : > { %v7546_v22 = vpop.f32.mrb[59].mxu0  ;;  %v8069_v20 = vld [vmem:[%s9196_s18 + $0x60] sm:$0xff]  }
 0x8ac   : > { %v4620_v24 = vpop.f32.mrb[56].mxu1 }
 0x8ad   : > { %v4632_v25 = vsel %vm4628_vm15, %v4620_v24, 0.0  ;;  %v7525_v26 = vpop.f32.mrb[57].mxu1  ;;  %v8070_v24 = vld [vmem:[%s9196_s18 + $0x68] sm:$0xff]  }
 0x8ae   : > { %v4633_v27 = vadd.f32 %v4632_v25, %v4518_v17  ;;  %v4623_v28 = vpop.f32.mrb[58].mxu1  ;;  %v8071_v25 = vld [vmem:[%s9196_s18 + $0x70] sm:$0xff]   ;;  %v8072_v26 = vld [vmem:[%s9196_s18 + $0x78] sm:$0xff]  }
 0x8af   : > { %v7526_v30 = vpop.f32.mrb[59].mxu1  ;;  %v8073_v28 = vld [vmem:[%s9199_s28] sm:$0xff]  }
 0x8b0   : > { %v4748_v31 = vadd.f32 %v4747_v29, %v4633_v27  ;;  %v8074_v29 = vld [vmem:[%s9199_s28 + $0x8] sm:$0xff]   ;;  %v8075_v30 = vld [vmem:[%s9199_s28 + $0x10] sm:$0xff]  }
 0x8cc   : > { %v4850_v33 = vpop.f32.mrb[60].mxu1 }
 0x8cd   : > { %v4862_v34 = vsel %vm4858_vm2, %v4850_v33, 0.0  ;;  %v7565_v36 = vpop.f32.mrb[61].mxu1  ;;  %v8081_v33 = vld [vmem:[%s9200_s5 + $0x88] sm:$0xff]  }
 0x8ce   : > { %v4863_v37 = vadd.f32 %v4862_v34, %v4748_v31  ;;  %v4853_v38 = vpop.f32.mrb[62].mxu1  ;;  %v8076_v31 = vld [vmem:[%s9199_s28 + $0x18] sm:$0xff]  }
 0x8cf   : > { %v7566_v39 = vpop.f32.mrb[63].mxu1 }
 0x8d0   : > { %v4871_v40 = vadd.f32 %v6577_v35, %v4863_v37 }
 0x8d2   : > { %v4872_v41 = vpack.c.bf16 %v4871_v40, %v4871_v40 }
 0x8d4   : > { %v4880_v42 = vsel %vm4878_vm3, %v4872_v41, 0 }
 0x8d5   : > { %7568 = vmatpush3.bf16.msra.mxu0 %v4880_v42  ;;  %v5071_v42 = vand.u32 1, %v8523_v48  ;;  %v6627_v48 = vld [vmem:[%s9201_s2] ss:$0 sm:$0xff]  ;;  %s9202_s2 = sld [smem:[#allocation30_spill]] }
 0x8d6   : > { %7593 = vmatprep.subr.bf16.mxu0 %v8206_v11 }
 0x8d7   : > { %v9015_v44 = vadd.s32 1, %v5071_v42 }
 0x8d8   : > { %7570 = vmatmul.mubr.msk.bf16.vlgmr.msra.gmra.mrb[60].mxu0 %vm4874_vm4, %v4873_v43  ;;  %v9013_v43 = vadd.s32 4294967295, %v5071_v42 }
 0x8d9   : > { %7601 = vmatprep.mubr.msk.bf16.mxu0 %vm8207_vm0, %v8206_v11  ;;  %7594 = vmatpush3.bf16.msra.mxu0 %v8061_v56  ;;  %vm5312_vm8 = vcmp.lt.s32.totalorder %v9015_v44, 2  ;;  %v8102_v44 = vld [vmem:[%s8372_s23 + $0x8] sm:$0xff]  }
 0x8da   : > { %7595 = vmatprep.subr.bf16.mxu0 %v8206_v11  ;;  %vm5159_vm7 = vcmp.ge.s32.totalorder %v9013_v43, 0 }
 0x8dd   : > { %7596 = vmatpush3.bf16.msra.mxu0 %v8063_v58 }
 0x8de   : > { %7597 = vmatprep.subr.bf16.mxu0 %v8206_v11 }
 0x8e1   : > { %7598 = vmatpush3.bf16.msra.mxu0 %v8065_v51  ;;  %v8077_v51 = vld [vmem:[%s9200_s5 + $0xc0] sm:$0xff]  }
 0x8e2   : > { %7599 = vmatprep.subr.bf16.mxu0 %v8206_v11 }
 0x8e5   : > { %7600 = vmatpush3.bf16.msra.mxu0 %v8067_v62  ;;  %v8078_v62 = vld [vmem:[%s9200_s5 + $0xc8] sm:$0xff]  }
 0x8e6   : > { %7605 = vmatprep.subr.bf16.mxu0 %v8206_v11 }
 0x9ab   : > { %v4916_v46 = vpop.f32.mrb[60].mxu0 }
 0x9ac   : > { %v4922_v50 = vpack.c.bf16 %v4916_v46, %v4916_v46  ;;  %v7571_v53 = vpop.f32.mrb[61].mxu0 }
 0x9ad   : > { %v4919_v54 = vpop.f32.mrb[62].mxu0 }
 0x9ae   : > { %v7572_v55 = vpop.f32.mrb[63].mxu0  ;;  %7590 = vmatmul.mubr.bf16.vlgmr.msra.gmra.mrb[64].mxu1 %v4922_v50 }
 0x9af   : > { %7625 = vmatprep.mubr.msk.bf16.mxu1 %vm8207_vm0, %v8206_v11  ;;  %7618 = vmatpush3.bf16.msra.mxu1 %v8062_v57 }
 0x9b0   : > { %7619 = vmatprep.subr.bf16.mxu1 %v8206_v11 }
 0x9b3   : > { %7620 = vmatpush3.bf16.msra.mxu1 %v8064_v59 }
 0x9b4   : > { %7621 = vmatprep.subr.bf16.mxu1 %v8206_v11 }
 0x9b7   : > { %7622 = vmatpush3.bf16.msra.mxu1 %v8066_v61 }
 0x9b8   : > { %7623 = vmatprep.subr.bf16.mxu1 %v8206_v11 }
 0x9bb   : > { %7624 = vmatpush3.bf16.msra.mxu1 %v8068_v63  ;;  %v8080_v63 = vld [vmem:[%s9200_s5 + $0xd0] sm:$0xff]  }
 0x9bc   : > { %7641 = vmatprep.subr.bf16.mxu1 %v8206_v11 }
 0xa81   : > { %v5028_v45 = vpop.f32.mrb[64].mxu1 }
 0xa82   : > { %v5029_v47 = vadd.f32 %v6579_v1, %v5028_v45  ;;  %v7591_v4 = vpop.f32.mrb[65].mxu1  ;;  %v8083_v1 = vld [vmem:[%s9200_s5 + $0x90] sm:$0xff]   ;;  %v8085_v45 = vld [vmem:[%s9200_s5 + $0x98] sm:$0xff]  }
 0xa83   : > { %v5031_v13 = vpop.f32.mrb[66].mxu1  ;;  %v8088_v4 = vld [vmem:[%s9200_s5 + $0xf0] sm:$0xff]  }
 0xa84   : > { %v5039_v5 = vmul.f32 %v5038_v2, %v5029_v47  ;;  %v7592_v6 = vpop.f32.mrb[67].mxu1  ;;  %v5051_v14 = vmax.f32 %v5029_v47, 0.0  ;;  %v8084_v2 = vld [vmem:[%s9200_s5 + $0xe0] sm:$0xff]   ;;  %v8089_v13 = vld [vmem:[%s9200_s5 + $0xa8] sm:$0xff]  }
 0xa85   : > { %v8091_v6 = vld [vmem:[%s9200_s5 + $0xb0] sm:$0xff]  }
 0xa86   : > { %v5044_v7 = vadd.f32 %v5043_v3, %v5039_v5  ;;  %v5052_v16 = vmul.f32 %v5051_v14, %v8538_v10  ;;  %v8087_v3 = vld [vmem:[%s9200_s5 + $0xa0] sm:$0xff]   ;;  %v8090_v5 = vld [vmem:[%s9200_s5 + $0xf8] sm:$0xff]  }
 0xa88   : > { %v5045_v9 = vmul.f32 %v5044_v7, %v5029_v47  ;;  %v8086_v47 = vld [vmem:[%s9200_s5 + $0xe8] sm:$0xff]   ;;  %v8092_v7 = vld [vmem:[%s9200_s5 + $0xb8] sm:$0xff]  }
 0xa8a   : > { %v5050_v15 = vadd.f32 %v5049_v8, %v5045_v9  ;;  %v5409_v8 = vld [vmem:[%s9202_s2] sm:$0x7]  ;;  %s1034_s2 = sand.u32 1, %s8163_s7  }
 0xa8b   : > { %v6628_v9 = vld [vmem:[%s9203_s3] ss:$0 sm:$0xff]  ;;  %v5413_v14 = vrot.slane %v5409_v8, %v8526_v49  ;;  %s9204_s3 = sld [smem:[#allocation32_spill]]  ;;  %s5926_s13 = scalar_lea.sflag [#allocation9], %s1034_s2 }
 0xa8c   : > { %v5053_v17 = vmul.f32 %v5050_v15, %v8540_v12 }
 0xa8e   : > { %v5054_v18 = vadd.f32 %v5053_v17, %v5052_v16  ;;  %v5418_v17 = vrot.slane %v5409_v8, %v8530_v52 }
 0xa90   : > { %5056 = vst.msk [vmem:[#allocation5 + $0x3] sm:$0xf] %vm5055_vm5, %v5054_v18  ;;  %v5057_v27 = vpack.c.bf16 %v5054_v18, %v5054_v18 }
 0xa97   : > { %v5079_v19 = vld [vmem:[#allocation5 + $0x2] sm:$0xf] }
 0xa98   : > { %v5232_v21 = vld [vmem:[#allocation5 + $0x4] sm:$0xf]  ;;  %v5080_v22 = vpack.c.bf16 %v5079_v19, %v5079_v19 }
 0xa99   : > { %v5233_v23 = vpack.c.bf16 %v5232_v21, %v5232_v21 }
 0xa9a   : > { %7602 = vmatmul.mubr.msk.bf16.vlgmr.msra.gmra.mrb[64].mxu0 %vm5114_vm6, %v5080_v22 }
 0xa9b   : > { %7626 = vmatmul.mubr.msk.bf16.vlgmr.msra.gmra.mrb[68].mxu1 %vm5114_vm6, %v5233_v23  ;;  %7606 = vmatpush3.bf16.msra.mxu0 %v8069_v20  ;;  %v5424_v23 = vrot.slane %v5409_v8, %v8535_v60  ;;  %v8093_v60 = vld [vmem:[%s9200_s5 + $0x100] sm:$0xff]  }
 0xa9c   : > { %7613 = vmatprep.mubr.msk.bf16.mxu0 %vm8207_vm0, %v8206_v11  ;;  %7607 = vmatprep.subr.bf16.mxu0 %v8206_v11 }
 0xa9d   : > { %7657 = vmatprep.mubr.msk.bf16.mxu1 %vm8207_vm0, %v8206_v11  ;;  %7642 = vmatpush3.bf16.msra.mxu1 %v8079_v32  ;;  %v8097_v32 = vld [vmem:[%s9200_s5 + $0x120] sm:$0xff]  }
 0xa9e   : > { %7643 = vmatprep.subr.bf16.mxu1 %v8206_v11 }
 0xa9f   : > { %7608 = vmatpush3.bf16.msra.mxu0 %v8070_v24 }
 0xaa0   : > { %7609 = vmatprep.subr.bf16.mxu0 %v8206_v11 }
 0xaa1   : > { %7644 = vmatpush3.bf16.msra.mxu1 %v8081_v33  ;;  %v8098_v33 = vld [vmem:[%s9200_s5 + $0x128] sm:$0xff]  }
 0xaa2   : > { %7645 = vmatprep.subr.bf16.mxu1 %v8206_v11 }
 0xaa3   : > { %7610 = vmatpush3.bf16.msra.mxu0 %v8071_v25 }
 0xaa4   : > { %7611 = vmatprep.subr.bf16.mxu0 %v8206_v11 }
 0xaa5   : > { %7646 = vmatpush3.bf16.msra.mxu1 %v8083_v1  ;;  %v8101_v1 = vld [vmem:[%s8372_s23] sm:$0xff]  }
 0xaa6   : > { %7647 = vmatprep.subr.bf16.mxu1 %v8206_v11 }
 0xaa7   : > { %7612 = vmatpush3.bf16.msra.mxu0 %v8072_v26 }
 0xaa8   : > { %7629 = vmatprep.subr.bf16.mxu0 %v8206_v11 }
 0xaa9   : > { %7648 = vmatpush3.bf16.msra.mxu1 %v8085_v45  ;;  %v8104_v45 = vld [vmem:[%s8372_s23 + $0x18] sm:$0xff]  }
 0xaaa   : > { %7614 = vmatmul.mubr.msk.bf16.vlgmr.msra.gmra.mrb[68].mxu0 %vm5114_vm6, %v5057_v27  ;;  %7649 = vmatprep.subr.bf16.mxu1 %v8206_v11 }
 0xaab   : > { %7637 = vmatprep.mubr.msk.bf16.mxu0 %vm8207_vm0, %v8206_v11  ;;  %7630 = vmatpush3.bf16.msra.mxu0 %v8073_v28 }
 0xaac   : > { %7631 = vmatprep.subr.bf16.mxu0 %v8206_v11 }
 0xaad   : > { %7650 = vmatpush3.bf16.msra.mxu1 %v8087_v3  ;;  %v8106_v3 = vld [vmem:[%s8372_s23 + $0x28] sm:$0xff]  }
 0xaae   : > { %7651 = vmatprep.subr.bf16.mxu1 %v8206_v11 }
 0xaaf   : > { %7632 = vmatpush3.bf16.msra.mxu0 %v8074_v29 }
 0xab0   : > { %7633 = vmatprep.subr.bf16.mxu0 %v8206_v11 }
 0xab1   : > { %7652 = vmatpush3.bf16.msra.mxu1 %v8089_v13  ;;  %v8108_v13 = vld [vmem:[%s8372_s23 + $0x38] sm:$0xff]  }
 0xab2   : > { %7653 = vmatprep.subr.bf16.mxu1 %v8206_v11 }
 0xab3   : > { %7634 = vmatpush3.bf16.msra.mxu0 %v8075_v30 }
 0xab4   : > { %7635 = vmatprep.subr.bf16.mxu0 %v8206_v11 }
 0xab5   : > { %7654 = vmatpush3.bf16.msra.mxu1 %v8091_v6 }
 0xab6   : > { %7655 = vmatprep.subr.bf16.mxu1 %v8206_v11 }
 0xab7   : > { %7636 = vmatpush3.bf16.msra.mxu0 %v8076_v31  ;;  %v8094_v31 = vld [vmem:[%s9200_s5 + $0x108] sm:$0xff]  }
 0xab8   : > { %7661 = vmatprep.subr.bf16.mxu0 %v8206_v11 }
 0xab9   : > { %7656 = vmatpush3.bf16.msra.mxu1 %v8092_v7 }
 0xaba   : > { %7681 = vmatprep.subr.bf16.mxu1 %v8206_v11 }
 0xb6d   : > { %v5152_v34 = vpop.f32.mrb[64].mxu0 }
 0xb6e   : > { %v5304_v35 = vpop.f32.mrb[68].mxu1  ;;  %v7603_v36 = vpop.f32.mrb[65].mxu0  ;;  %v5164_v46 = vsel %vm5159_vm7, %v5152_v34, 0.0  ;;  %v8099_v34 = vld [vmem:[%s9200_s5 + $0x130] sm:$0xff]  }
 0xb6f   : > { %v7627_v37 = vpop.f32.mrb[69].mxu1  ;;  %v5155_v38 = vpop.f32.mrb[66].mxu0  ;;  %v5316_v55 = vsel %vm5312_vm8, %v5304_v35, 0.0  ;;  %v8100_v35 = vld [vmem:[%s9200_s5 + $0x138] sm:$0xff]  }
 0xb70   : > { %v5307_v39 = vpop.f32.mrb[70].mxu1  ;;  %v7604_v40 = vpop.f32.mrb[67].mxu0 }
 0xb71   : > { %v7628_v41 = vpop.f32.mrb[71].mxu1 }
 0xb7d   : > { %v5226_v50 = vpop.f32.mrb[68].mxu0 }
 0xb7e   : > { %v5227_v53 = vadd.f32 %v5226_v50, %v5164_v46  ;;  %v7615_v54 = vpop.f32.mrb[69].mxu0 }
 0xb7f   : > { %v5229_v56 = vpop.f32.mrb[70].mxu0 }
 0xb80   : > { %v5317_v57 = vadd.f32 %v5316_v55, %v5227_v53  ;;  %v7616_v58 = vpop.f32.mrb[71].mxu0 }
 0xb82   : > { %v5325_v59 = vadd.f32 %v6627_v48, %v5317_v57  ;;  %v6706_v57 = vld [vmem:[%s9204_s3] ss:$0 sm:$0xff]  ;;  %s6035_s3 = sshll.u32 %s1034_s2, 1 }
 0xb83   : > { %s1036_s8 = scalar_lea.vmem [#allocation8], %s6035_s3 }
 0xb84   : > { %v5326_v61 = vpack.c.bf16 %v5325_v59, %v5325_v59  ;;  %s5939_s9 = sshll.u32 %s1036_s8, 4  ;;  %s9111_s9 = int_to_ptr.vmem [resolvable:$true] %s5939_s9 }
 0xb85   : > { %s8109_s14 = scalar_lea.vmem %s9111_s9, 32 }
 0xb86   : > { %7638 = vmatmul.mubr.msk.bf16.vlgmr.msra.gmra.mrb[72].mxu0 %vm5114_vm6, %v5326_v61  ;;  %p8110_p11 = scmp.ne.s32.totalorder %s9111_s9, %s8109_s14 }
 0xb87   : > { %7662 = vmatpush3.bf16.msra.mxu0 %v8077_v51  ;;  %7677 = vmatprep.mubr.msk.bf16.mxu0 %vm8207_vm0, %v8206_v11 }
 0xb88   : > { %7663 = vmatprep.subr.bf16.mxu0 %v8206_v11  ;;  %p8111_p12 = pnand %p8110_p11, %p8423_p5 }
 0xb8a   : > { %p8112_p13 = pneg %p8111_p12 }
 0xb8b   : > { %7664 = vmatpush3.bf16.msra.mxu0 %v8078_v62 }
 0xb8c   : > { %7665 = vmatprep.subr.bf16.mxu0 %v8206_v11 }
 0xb8f   : > { %7666 = vmatpush3.bf16.msra.mxu0 %v8080_v63 }
 0xb90   : > { %7667 = vmatprep.subr.bf16.mxu0 %v8206_v11 }
 0xb93   : > { %7668 = vmatpush3.bf16.msra.mxu0 %v8082_v0  ;;  %v5762_v0 = vld [vmem:[%s8367_s20] sm:$0x1] }
 0xb94   : > { %7669 = vmatprep.subr.bf16.mxu0 %v8206_v11 }
 0xb97   : > { %7670 = vmatpush3.bf16.msra.mxu0 %v8084_v2  ;;  %v8103_v2 = vld [vmem:[%s8372_s23 + $0x10] sm:$0xff]  }
 0xb98   : > { %7671 = vmatprep.subr.bf16.mxu0 %v8206_v11 }
 0xb9b   : > { %7672 = vmatpush3.bf16.msra.mxu0 %v8086_v47  ;;  %v8105_v47 = vld [vmem:[%s8372_s23 + $0x20] sm:$0xff]  }
 0xb9c   : > { %7673 = vmatprep.subr.bf16.mxu0 %v8206_v11 }
 0xb9f   : > { %7674 = vmatpush3.bf16.msra.mxu0 %v8088_v4  ;;  %v8107_v4 = vld [vmem:[%s8372_s23 + $0x30] sm:$0xff]  }
 0xba0   : > { %7675 = vmatprep.subr.bf16.mxu0 %v8206_v11 }
 0xba3   : > { %7676 = vmatpush3.bf16.msra.mxu0 %v8090_v5 }
 0xba4   : > { %7701 = vmatprep.subr.bf16.mxu0 %v8206_v11 }
 0xc59   : > { %v5403_v15 = vpop.f32.mrb[72].mxu0 }
 0xc5a   : > { %v5404_v16 = vadd.f32 %v6628_v9, %v5403_v15  ;;  %v7639_v18 = vpop.f32.mrb[73].mxu0 }
 0xc5b   : > { %v5406_v19 = vpop.f32.mrb[74].mxu0 }
 0xc5c   : > { %v5414_v20 = vmul.f32 %v5413_v14, %v5404_v16  ;;  %v7640_v21 = vpop.f32.mrb[75].mxu0  ;;  %v5426_v25 = vmax.f32 %v5404_v16, 0.0  ;;  %v6708_v14 = vld [vmem:[%s9205_s1] ss:$0 sm:$0xff] }
 0xc5e   : > { %v5419_v22 = vadd.f32 %v5418_v17, %v5414_v20  ;;  %v5427_v27 = vmul.f32 %v5426_v25, %v8538_v10  ;;  %v8095_v10 = vld [vmem:[%s9200_s5 + $0x110] sm:$0xff]  }
 0xc60   : > { %v5420_v24 = vmul.f32 %v5419_v22, %v5404_v16 }
 0xc62   : > { %v5425_v26 = vadd.f32 %v5424_v23, %v5420_v24 }
 0xc64   : > { %v5428_v49 = vmul.f32 %v5425_v26, %v8540_v12  ;;  %v8096_v12 = vld [vmem:[%s9200_s5 + $0x118] sm:$0xff]   ;;  %s6718_s5 = sshll.u32 %s8406_s0, 5  ;;  %s8208_s0 = smov [#allocation8]  }
 0xc65   : > { %s9109_s12 = scalar_lea.hbm %s8382_s10, %s6718_s5  ;;  %s8113_s3 = sshll.u32 %s8208_s0, 4  ;;  %s8114_s3 = int_to_ptr.vmem [resolvable:$false] %s8113_s3 }
 0xc66   : > { %v5429_v28 = vadd.f32 %v5428_v49, %v5427_v27  ;;  %s8115_s1 = scalar_lea.vmem %s8114_s3, 64  ;;  %p8116_p0 = scmp.lt.s32.totalorder %s9111_s9, %s8114_s3 }
 0xc67   : > { %p8117_p1 = scmp.lt.s32.totalorder %s8115_s1, %s8109_s14 }
 0xc68   : > { %5430 = vst [vmem:[#allocation6 + $0x3] sm:$0xf] %v5429_v28  ;;  %v5431_v52 = vpack.c.bf16 %v5429_v28, %v5429_v28 }
 0xc69   : > { %p8118_p2 = por %p8117_p1, %p8116_p0 }
 0xc6a   : > { %7678 = vmatmul.mubr.bf16.vlgmr.msra.gmra.mrb[76].mxu0 %v5431_v52 }
 0xc6b   : > { %7703 = vmatprep.mubr.msk.bf16.mxu0 %vm8207_vm0, %v8206_v11  ;;  %p8119_p3 = pnand %p8118_p2, %p8112_p13 }
 0xc6f   : > { %v5449_v29 = vld [vmem:[#allocation6 + $0x2] sm:$0xf] }
 0xc70   : > { %v5450_v30 = vpack.c.bf16 %v5449_v29, %v5449_v29  ;;  %v5645_v36 = vld [vmem:[#allocation6 + $0x4] sm:$0xf] }
 0xc71   : > { %v5646_v37 = vpack.c.bf16 %v5645_v36, %v5645_v36 }
 0xc72   : > { %7658 = vmatmul.mubr.bf16.vlgmr.msra.gmra.mrb[72].mxu1 %v5450_v30 }
 0xc73   : > { %7682 = vmatpush3.bf16.msra.mxu1 %v8093_v60  ;;  %7697 = vmatprep.mubr.msk.bf16.mxu1 %vm8207_vm0, %v8206_v11 }
 0xc74   : > { %7683 = vmatprep.subr.bf16.mxu1 %v8206_v11 }
 0xc77   : > { %7684 = vmatpush3.bf16.msra.mxu1 %v8094_v31 }
 0xc78   : > { %7685 = vmatprep.subr.bf16.mxu1 %v8206_v11 }
 0xc7b   : > { %7686 = vmatpush3.bf16.msra.mxu1 %v8095_v10 }
 0xc7c   : > { %7687 = vmatprep.subr.bf16.mxu1 %v8206_v11 }
 0xc7f   : > { %7688 = vmatpush3.bf16.msra.mxu1 %v8096_v12 }
 0xc80   : > { %7689 = vmatprep.subr.bf16.mxu1 %v8206_v11 }
 0xc83   : > { %7690 = vmatpush3.bf16.msra.mxu1 %v8097_v32 }
 0xc84   : > { %7691 = vmatprep.subr.bf16.mxu1 %v8206_v11 }
 0xc87   : > { %7692 = vmatpush3.bf16.msra.mxu1 %v8098_v33 }
 0xc88   : > { %7693 = vmatprep.subr.bf16.mxu1 %v8206_v11 }
 0xc8b   : > { %7694 = vmatpush3.bf16.msra.mxu1 %v8099_v34 }
 0xc8c   : > { %7695 = vmatprep.subr.bf16.mxu1 %v8206_v11 }
 0xc8f   : > { %7696 = vmatpush3.bf16.msra.mxu1 %v8100_v35 }
 0xc92   : > { %7698 = vmatmul.mubr.bf16.vlgmr.msra.gmra.mrb[76].mxu1 %v5646_v37 }
 0xd3d   : > { %v5639_v38 = vpop.f32.mrb[76].mxu0 }
 0xd3e   : > { %v7679_v39 = vpop.f32.mrb[77].mxu0 }
 0xd3f   : > { %v5642_v40 = vpop.f32.mrb[78].mxu0 }
 0xd40   : > { %v7680_v41 = vpop.f32.mrb[79].mxu0 }
 0xd45   : > { %v5550_v42 = vpop.f32.mrb[72].mxu1 }
 0xd46   : > { %v5556_v46 = vsel %vm5159_vm7, %v5550_v42, 0.0  ;;  %v7659_v50 = vpop.f32.mrb[73].mxu1 }
 0xd47   : > { %v5640_v53 = vadd.f32 %v5639_v38, %v5556_v46  ;;  %v5553_v54 = vpop.f32.mrb[74].mxu1 }
 0xd48   : > { %v7660_v55 = vpop.f32.mrb[75].mxu1 }
 0xd65   : > { %v5746_v48 = vpop.f32.mrb[76].mxu1 }
 0xd66   : > { %v5752_v56 = vsel %vm5312_vm8, %v5746_v48, 0.0  ;;  %v7699_v58 = vpop.f32.mrb[77].mxu1 }
 0xd67   : > { %v5753_v59 = vadd.f32 %v5752_v56, %v5640_v53  ;;  %v5749_v51 = vpop.f32.mrb[78].mxu1 }
 0xd68   : > { %v7700_v61 = vpop.f32.mrb[79].mxu1 }
 0xd69   : > { %v5761_v62 = vadd.f32 %v6706_v57, %v5753_v59 }
 0xd6b   : > { %v5763_v43 = vpack.c.bf16 %v5761_v62, %v5761_v62 }
 0xd6d   : > { %v5770_v63 = vsel %vm5768_vm9, %v5763_v43, 0 }
 0xd6e   : > { %7702 = vmatpush3.bf16.msra.mxu0 %v5770_v63 }
 0xd6f   : > { %7707 = vmatprep.subr.bf16.mxu0 %v8206_v11 }
 0xd71   : > { %7704 = vmatmul.mubr.msk.bf16.vlgmr.msra.gmra.mrb[80].mxu0 %vm5764_vm10, %v5762_v0 }
 0xd72   : > { %7708 = vmatpush3.bf16.msra.mxu0 %v8101_v1  ;;  %7723 = vmatprep.mubr.msk.bf16.mxu0 %vm8207_vm0, %v8206_v11 }
 0xd73   : > { %7709 = vmatprep.subr.bf16.mxu0 %v8206_v11 }
 0xd76   : > { %7710 = vmatpush3.bf16.msra.mxu0 %v8102_v44 }
 0xd77   : > { %7711 = vmatprep.subr.bf16.mxu0 %v8206_v11 }
 0xd7a   : > { %7712 = vmatpush3.bf16.msra.mxu0 %v8103_v2 }
 0xd7b   : > { %7713 = vmatprep.subr.bf16.mxu0 %v8206_v11 }
 0xd7e   : > { %7714 = vmatpush3.bf16.msra.mxu0 %v8104_v45 }
 0xd7f   : > { %7715 = vmatprep.subr.bf16.mxu0 %v8206_v11 }
 0xd82   : > { %7716 = vmatpush3.bf16.msra.mxu0 %v8105_v47 }
 0xd83   : > { %7717 = vmatprep.subr.bf16.mxu0 %v8206_v11 }
 0xd86   : > { %7718 = vmatpush3.bf16.msra.mxu0 %v8106_v3 }
 0xd87   : > { %7719 = vmatprep.subr.bf16.mxu0 %v8206_v11 }
 0xd8a   : > { %7720 = vmatpush3.bf16.msra.mxu0 %v8107_v4 }
 0xd8b   : > { %7721 = vmatprep.subr.bf16.mxu0 %v8206_v11 }
 0xd8e   : > { %7722 = vmatpush3.bf16.msra.mxu0 %v8108_v13 }
 0xe44   : > { %v5806_v5 = vpop.f32.mrb[80].mxu0 }
 0xe45   : > { %v5812_v6 = vpack.c.bf16 %v5806_v5, %v5806_v5  ;;  %v7705_v7 = vpop.f32.mrb[81].mxu0 }
 0xe46   : > { %v5809_v8 = vpop.f32.mrb[82].mxu0 }
 0xe47   : > { %v7706_v9 = vpop.f32.mrb[83].mxu0  ;;  %7724 = vmatmul.mubr.bf16.vlgmr.msra.gmra.mrb[84].mxu0 %v5812_v6 }
 0xf1a   : > { %v5918_v15 = vpop.f32.mrb[84].mxu0 }
 0xf1b   : > { %v5919_v16 = vadd.f32 %v6708_v14, %v5918_v15  ;;  %v7725_v17 = vpop.f32.mrb[85].mxu0 }
 0xf1c   : > { %v5921_v11 = vpop.f32.mrb[86].mxu0 }
 0xf1d   : > { %5924 = vst [vmem:[%s1036_s8] sm:$0x3] %v5919_v16  ;;  %v7726_v18 = vpop.f32.mrb[87].mxu0 }
 0xf1e   : > { %8122 = shalt.err (!%p8119_p3)
}
 0xf1f   : > { %s8123_s8 = scalar_lea.hbm %s9109_s12, 32  ;;  %s8127_s5 = scalar_lea.hbm %s8382_s10, 64 }
 0xf20   : > { %p8124_p4 = scmp.ne.s32.totalorder %s9109_s12, %s8123_s8  ;;  %p8128_p9 = scmp.lt.u32.totalorder %s9109_s12, %s8382_s10 }
 0xf21   : > { %p8129_p10 = scmp.lt.u32.totalorder %s8127_s5, %s8123_s8  ;;  %p8131_p12 = scmp.lt.u32.totalorder %s8123_s8, %s9109_s12 }
 0xf22   : > { %p8125_p7 = pnand %p8124_p4, %p8423_p5 }
 0xf23   : > { %p8130_p11 = por %p8129_p10, %p8128_p9 }
 0xf24   : > { %p8126_p8 = pneg %p8125_p7 }
 0xf25   : > { %p8132_p0 = por %p8131_p12, %p8130_p11 }
 0xf27   : > { %p8133_p13 = pnand %p8132_p0, %p8126_p8 }
 0xf29   : > { %8136 = shalt.err (!%p8133_p13)
}
 0xf2a   : > { %7728 = dma.vmem_to_hbm [thread:$0]  (%p8423_p5), %s9111_s9, 32, %s9109_s12, %s5926_s13  }
 0xf2b PF: > { %p7734_p1 = scmp.ge.s32.totalorder %s8171_s6, 2  ;;  %s5951_s14 = sand.u32 1, %s8159_s16  }
 0xf2c   : > { %s5952_s1 = scalar_lea.sflag [#allocation9], %s5951_s14 }
 0xf2d   : > { %p7731_p2 = pnand %p7734_p1, %p8427_p6 }
 0xf2f   : > { %8154 = dma.done.wait (!%p7731_p2), %s5952_s1, 32  }
 0xf30   : > { %8156 = vsyncadd (!%p7731_p2), %s5952_s1, 4294967264  ;;  %p80_p3 = scmp.ge.s32.totalorder %s8410_s15, 4   ;;  %s9206_s16 = smov %s8163_s7 }
 0xf31   : > { %s9207_s7 = smov %s8167_s11  ;;  %s9208_s11 = smov %s8421_s22 }
 0xf32   : > { %s9209_s6 = smov %s8410_s15  ;;  %82 = sbr.rel (!%p80_p3) target bundleno = 70 (0x46), region = 249 }
 0xf39   :  { %5957 = vsyncpa [#allocation9], 1 }
 0xf3a   :  { %5959 = vsyncpa [#allocation9 + $0x1], 1 }

</bundles_post_ra>
